<compile_context>
chip_gen: v5e
topology: v5e:2x2
jax: 0.10.0
libtpu: 0.0.40
codegen_flags: <defaults>
</compile_context>

<pallas_src>
import functools

import jax
import jax.numpy as jnp
from jax import lax
from jax.experimental import pallas as pl
from jax.experimental.pallas import tpu as pltpu


def _toxicity_kernel(
    x_ref,                                   # (S*B, E)  embedded input, time-major rows
    wih1f, wih1b, whh1f, whh1b, b1f, b1b,    # bi-LSTM layer 1 (fwd / bwd)
    w2ff, w2fb, w2bf, w2bb,                  # layer-2 W_ih split: (direction)(from-fwd / from-bwd half)
    whh2f, whh2b, b2f, b2b,                  # bi-LSTM layer 2 recurrent weights / biases
    wl1, bl1, wl2, bl2, wfc, bfc,            # dense head
    out_ref,                                 # (B, out_dim)
    l1f_scr, l1b_scr,                        # (S*B, H) layer-1 outputs per direction
    *, seq_len, batch,
):
    S, B = seq_len, batch
    H = whh1f.shape[0]                       # W_hh passed transposed: (H, 4H)
    f32 = jnp.float32

    def cell(xg, h, c, whh):
        # xg already holds x_t @ W_ih + b_ih + b_hh, so only the dependent
        # h @ W_hh matmul lives on the serial critical path.
        gates = xg + jnp.dot(h, whh, preferred_element_type=f32)      # (B, 4H)
        sg = jax.nn.sigmoid(gates)        # one full-vreg EUP pass
        th = jnp.tanh(gates)              # one full-vreg EUP pass
        i = sg[:, 0 * H:1 * H]
        f = sg[:, 1 * H:2 * H]
        g = th[:, 2 * H:3 * H]
        o = sg[:, 3 * H:4 * H]
        c_new = f * c + i * g
        h_new = o * jnp.tanh(c_new)
        return h_new, c_new

    # ---- Layer 1: hoisted batched input projections (one matmul per direction).
    x2d = x_ref[...]                                                   # (S*B, E)
    xg1f = jnp.dot(x2d, wih1f[...], preferred_element_type=f32) + b1f[...]
    xg1b = jnp.dot(x2d, wih1b[...], preferred_element_type=f32) + b1b[...]

    whh1f_v, whh1b_v = whh1f[...], whh1b[...]
    zeros = jnp.zeros((B, H), f32)
    hf, cf, hb, cb = zeros, zeros, zeros, zeros

    # Fused fwd/bwd recurrence, fully unrolled (S is a static Python int) so
    # every scratch access below uses a static offset.
    for s in range(S):
        tb = S - 1 - s
        hf, cf = cell(xg1f[s * B:(s + 1) * B, :], hf, cf, whh1f_v)
        hb, cb = cell(xg1b[tb * B:(tb + 1) * B, :], hb, cb, whh1b_v)
        l1f_scr[s * B:(s + 1) * B, :] = hf
        l1b_scr[tb * B:(tb + 1) * B, :] = hb

    # ---- Layer 2: hoisted batched input projections.  PyTorch feeds
    # concat(h_fwd, h_bwd) into layer 2; the concat is avoided by splitting
    # W_ih into its fwd/bwd halves and summing the two partial matmuls.
    l1f_all = l1f_scr[...]                                             # (S*B, H)
    l1b_all = l1b_scr[...]
    xg2f = (jnp.dot(l1f_all, w2ff[...], preferred_element_type=f32)
            + jnp.dot(l1b_all, w2fb[...], preferred_element_type=f32) + b2f[...])
    xg2b = (jnp.dot(l1f_all, w2bf[...], preferred_element_type=f32)
            + jnp.dot(l1b_all, w2bb[...], preferred_element_type=f32) + b2b[...])

    whh2f_v, whh2b_v = whh2f[...], whh2b[...]
    hf, cf, hb, cb = zeros, zeros, zeros, zeros
    # Online time pooling: running max / sum per direction (cheap VPU ops,
    # no per-timestep layer-2 stores and no trailing reduction over S).
    neg_inf = jnp.full((B, H), -jnp.inf, f32)
    mxf, mxb = neg_inf, neg_inf
    smf, smb = zeros, zeros

    for s in range(S):
        tb = S - 1 - s
        hf, cf = cell(xg2f[s * B:(s + 1) * B, :], hf, cf, whh2f_v)
        hb, cb = cell(xg2b[tb * B:(tb + 1) * B, :], hb, cb, whh2b_v)
        mxf = jnp.maximum(mxf, hf)
        mxb = jnp.maximum(mxb, hb)
        smf = smf + hf
        smb = smb + hb

    inv_s = 1.0 / float(S)
    # pool = [max_fwd, max_bwd, avg_fwd, avg_bwd]  ==  torch.cat((max_pool, avg_pool), 1)
    pool = jnp.concatenate([mxf, mxb, smf * inv_s, smb * inv_s], axis=1)   # (B, 4H)

    lin1 = jnp.maximum(jnp.dot(pool, wl1[...], preferred_element_type=f32) + bl1[...], 0.0)
    lin2 = jnp.maximum(jnp.dot(pool, wl2[...], preferred_element_type=f32) + bl2[...], 0.0)
    final = pool + lin1 + lin2
    out_ref[...] = jnp.dot(final, wfc[...], preferred_element_type=f32) + bfc[...]


def prepare_params(params):
    """One-time weight prep: transposes, b_ih+b_hh sums, layer-2 W_ih split."""
    H = params["l1_whh_f"].shape[1]
    tr = lambda w: jnp.transpose(w).astype(jnp.float32)              # (4H,in)->(in,4H)
    bsum = lambda a, b: (params[a] + params[b]).reshape(1, -1).astype(jnp.float32)
    w2f, w2b = tr(params["l2_wih_f"]), tr(params["l2_wih_b"])        # (2H, 4H)
    return dict(
        embedding=params["embedding"].astype(jnp.float32),
        wih1f=tr(params["l1_wih_f"]), wih1b=tr(params["l1_wih_b"]),
        whh1f=tr(params["l1_whh_f"]), whh1b=tr(params["l1_whh_b"]),
        b1f=bsum("l1_bih_f", "l1_bhh_f"), b1b=bsum("l1_bih_b", "l1_bhh_b"),
        w2ff=w2f[:H], w2fb=w2f[H:], w2bf=w2b[:H], w2bb=w2b[H:],
        whh2f=tr(params["l2_whh_f"]), whh2b=tr(params["l2_whh_b"]),
        b2f=bsum("l2_bih_f", "l2_bhh_f"), b2b=bsum("l2_bih_b", "l2_bhh_b"),
        wl1=tr(params["lin1_w"]), bl1=params["lin1_b"].reshape(1, -1).astype(jnp.float32),
        wl2=tr(params["lin2_w"]), bl2=params["lin2_b"].reshape(1, -1).astype(jnp.float32),
        wfc=tr(params["fc_w"]), bfc=params["fc_b"].reshape(1, -1).astype(jnp.float32),
    )


@jax.jit
def toxicity_forward(x_ids, prep):
    """Forward pass matching ToxicityClassifierLSTM.forward (eval mode)."""
    # Frozen-embedding lookup, gathered directly time-major (gather is glue).
    # TODO(synk): nn.Dropout1d(0.3) is identity in eval mode; training-mode
    # channel dropout is not implemented here.
    emb = prep["embedding"][x_ids.T]                       # (S, B, E)
    S, B, E = emb.shape
    x2d = emb.reshape(S * B, E)
    H = prep["whh1f"].shape[0]
    out_dim = prep["wfc"].shape[1]

    args = (
        x2d,
        prep["wih1f"], prep["wih1b"], prep["whh1f"], prep["whh1b"], prep["b1f"], prep["b1b"],
        prep["w2ff"], prep["w2fb"], prep["w2bf"], prep["w2bb"],
        prep["whh2f"], prep["whh2b"], prep["b2f"], prep["b2b"],
        prep["wl1"], prep["bl1"], prep["wl2"], prep["bl2"], prep["wfc"], prep["bfc"],
    )
    vmem = pl.BlockSpec(memory_space=pltpu.MemorySpace.VMEM)
    kernel = functools.partial(_toxicity_kernel, seq_len=S, batch=B)
    return pl.pallas_call(
        kernel,
        out_shape=jax.ShapeDtypeStruct((B, out_dim), jnp.float32),
        in_specs=[vmem] * len(args),
        out_specs=vmem,
        scratch_shapes=[pltpu.VMEM((S * B, H), jnp.float32),
                        pltpu.VMEM((S * B, H), jnp.float32)],
    )(*args)


def _reference_forward(x_ids, params):
    """Pure-JAX reference mirroring the PyTorch module (eval mode)."""
    emb = params["embedding"][x_ids]                       # (B, S, E)

    def lstm_dir(x_seq, wih, whh, bih, bhh, reverse):
        Hd = whh.shape[1]
        Bd = x_seq.shape[0]

        def step(carry, x_t):
            h, c = carry
            gates = x_t @ wih.T + h @ whh.T + bih + bhh
            i, f, g, o = jnp.split(gates, 4, axis=-1)
            i, f, o = jax.nn.sigmoid(i), jax.nn.sigmoid(f), jax.nn.sigmoid(o)
            g = jnp.tanh(g)
            c = f * c + i * g
            h = o * jnp.tanh(c)
            return (h, c), h

        xs = jnp.swapaxes(x_seq, 0, 1)                     # (S, B, in)
        if reverse:
            xs = xs[::-1]
        _, hs = lax.scan(step, (jnp.zeros((Bd, Hd)), jnp.zeros((Bd, Hd))), xs)
        if reverse:
            hs = hs[::-1]
        return jnp.swapaxes(hs, 0, 1)                      # (B, S, H)

    def bilstm(x_seq, layer):
        hf = lstm_dir(x_seq, params[f"l{layer}_wih_f"], params[f"l{layer}_whh_f"],
                      params[f"l{layer}_bih_f"], params[f"l{layer}_bhh_f"], False)
        hb = lstm_dir(x_seq, params[f"l{layer}_wih_b"], params[f"l{layer}_whh_b"],
                      params[f"l{layer}_bih_b"], params[f"l{layer}_bhh_b"], True)
        return jnp.concatenate([hf, hb], axis=-1)

    out2 = bilstm(bilstm(emb, 1), 2)                       # (B, S, 2H)
    avg_pool = jnp.mean(out2, axis=1)
    max_pool = jnp.max(out2, axis=1)
    pool = jnp.concatenate([max_pool, avg_pool], axis=1)
    l1 = jax.nn.relu(pool @ params["lin1_w"].T + params["lin1_b"])
    l2 = jax.nn.relu(pool @ params["lin2_w"].T + params["lin2_b"])
    final = pool + l1 + l2
    return final @ params["fc_w"].T + params["fc_b"]


def init_params(key, vocab_size=50, embedding_dim=16, hidden_dim=32, output_dim=1):
    """Deterministic synthetic parameters (shapes follow the nn.Module __init__)."""
    keys = list(jax.random.split(key, 24))
    kit = iter(keys)

    def u(k, shape, scale):
        return jax.random.uniform(k, shape, jnp.float32, -scale, scale)

    s = 1.0 / float(hidden_dim) ** 0.5
    p = {"hidden_dim": hidden_dim}
    p["embedding"] = jax.random.normal(next(kit), (vocab_size, embedding_dim),
                                       jnp.float32)
    for d in ("f", "b"):   # forward / backward directions of the two bi-LSTMs
        p[f"l1_wih_{d}"] = u(next(kit), (4 * hidden_dim, embedding_dim), s)
        p[f"l1_whh_{d}"] = u(next(kit), (4 * hidden_dim, hidden_dim), s)
        p[f"l1_bih_{d}"] = u(next(kit), (4 * hidden_dim,), s)
        p[f"l1_bhh_{d}"] = u(next(kit), (4 * hidden_dim,), s)
        p[f"l2_wih_{d}"] = u(next(kit), (4 * hidden_dim, 2 * hidden_dim), s)
        p[f"l2_whh_{d}"] = u(next(kit), (4 * hidden_dim, hidden_dim), s)
        p[f"l2_bih_{d}"] = u(next(kit), (4 * hidden_dim,), s)
        p[f"l2_bhh_{d}"] = u(next(kit), (4 * hidden_dim,), s)
    p["lin1_w"] = u(next(kit), (4 * hidden_dim, 4 * hidden_dim), s)
    p["lin1_b"] = u(next(kit), (4 * hidden_dim,), s)
    p["lin2_w"] = u(next(kit), (4 * hidden_dim, 4 * hidden_dim), s)
    p["lin2_b"] = u(next(kit), (4 * hidden_dim,), s)
    p["fc_w"] = u(next(kit), (output_dim, 4 * hidden_dim), s)
    p["fc_b"] = u(next(kit), (output_dim,), s)
    return p


if __name__ == "__main__":
    key = jax.random.PRNGKey(0)
    pkey, xkey = jax.random.split(key)

    VOCAB, EMB, HID, OUT = 50, 16, 32, 1
    B, S = 2, 8

    params = init_params(pkey, vocab_size=VOCAB, embedding_dim=EMB,
                         hidden_dim=HID, output_dim=OUT)
    x_ids = jax.random.randint(xkey, (B, S), 0, VOCAB, dtype=jnp.int32)

    prep = prepare_params(params)            # one-time weight preprocessing
    out = toxicity_forward(x_ids, prep)
    out = jax.block_until_ready(out)

    ref = _reference_forward(x_ids, params)

    assert out.shape == (B, OUT), out.shape
    assert bool(jnp.all(jnp.isfinite(out)))
    assert bool(jnp.allclose(out, ref, atol=1e-2, rtol=1e-2))
    print("KERNEL_OK")
</pallas_src>

<mosaic_0001>
module attributes {stable_mosaic.version = 11 : i64} {
  func.func @_toxicity_kernel(%arg0: memref<16x16xf32, #tpu.memory_space<vmem>>, %arg1: memref<16x128xf32, #tpu.memory_space<vmem>>, %arg2: memref<16x128xf32, #tpu.memory_space<vmem>>, %arg3: memref<32x128xf32, #tpu.memory_space<vmem>>, %arg4: memref<32x128xf32, #tpu.memory_space<vmem>>, %arg5: memref<1x128xf32, #tpu.memory_space<vmem>>, %arg6: memref<1x128xf32, #tpu.memory_space<vmem>>, %arg7: memref<32x128xf32, #tpu.memory_space<vmem>>, %arg8: memref<32x128xf32, #tpu.memory_space<vmem>>, %arg9: memref<32x128xf32, #tpu.memory_space<vmem>>, %arg10: memref<32x128xf32, #tpu.memory_space<vmem>>, %arg11: memref<32x128xf32, #tpu.memory_space<vmem>>, %arg12: memref<32x128xf32, #tpu.memory_space<vmem>>, %arg13: memref<1x128xf32, #tpu.memory_space<vmem>>, %arg14: memref<1x128xf32, #tpu.memory_space<vmem>>, %arg15: memref<128x128xf32, #tpu.memory_space<vmem>>, %arg16: memref<1x128xf32, #tpu.memory_space<vmem>>, %arg17: memref<128x128xf32, #tpu.memory_space<vmem>>, %arg18: memref<1x128xf32, #tpu.memory_space<vmem>>, %arg19: memref<128x1xf32, #tpu.memory_space<vmem>>, %arg20: memref<1x1xf32, #tpu.memory_space<vmem>>, %arg21: memref<2x1xf32, #tpu.memory_space<vmem>>, %arg22: memref<16x32xf32, #tpu.memory_space<vmem>>, %arg23: memref<16x32xf32, #tpu.memory_space<vmem>>) attributes {dimension_semantics = [], scalar_prefetch = 0 : i64, scratch_operands = 2 : i64, tpu.core_type = #tpu.core_type<tc>} {
    %c0 = arith.constant 0 : index
    %c0_0 = arith.constant 0 : index
    %0 = vector.load %arg0[%c0, %c0_0] : memref<16x16xf32, #tpu.memory_space<vmem>>, vector<16x16xf32>
    %c0_1 = arith.constant 0 : index
    %c0_2 = arith.constant 0 : index
    %1 = vector.load %arg1[%c0_1, %c0_2] : memref<16x128xf32, #tpu.memory_space<vmem>>, vector<16x128xf32>
    %cst = arith.constant dense<0.000000e+00> : vector<16x128xf32>
    %2 = tpu.matmul %0, %1, %cst {dimension_numbers = #tpu.dot_dimension_numbers<[1], [0], [0], [1], [0, 0, 1, 1], [], []>} : vector<16x16xf32>, vector<16x128xf32>, vector<16x128xf32> -> vector<16x128xf32>
    %c0_3 = arith.constant 0 : index
    %c0_4 = arith.constant 0 : index
    %3 = vector.load %arg5[%c0_3, %c0_4] : memref<1x128xf32, #tpu.memory_space<vmem>>, vector<1x128xf32>
    %4 = vector.broadcast %3 : vector<1x128xf32> to vector<16x128xf32>
    %5 = arith.addf %2, %4 : vector<16x128xf32>
    %c0_5 = arith.constant 0 : index
    %c0_6 = arith.constant 0 : index
    %6 = vector.load %arg2[%c0_5, %c0_6] : memref<16x128xf32, #tpu.memory_space<vmem>>, vector<16x128xf32>
    %cst_7 = arith.constant dense<0.000000e+00> : vector<16x128xf32>
    %7 = tpu.matmul %0, %6, %cst_7 {dimension_numbers = #tpu.dot_dimension_numbers<[1], [0], [0], [1], [0, 0, 1, 1], [], []>} : vector<16x16xf32>, vector<16x128xf32>, vector<16x128xf32> -> vector<16x128xf32>
    %c0_8 = arith.constant 0 : index
    %c0_9 = arith.constant 0 : index
    %8 = vector.load %arg6[%c0_8, %c0_9] : memref<1x128xf32, #tpu.memory_space<vmem>>, vector<1x128xf32>
    %9 = vector.broadcast %8 : vector<1x128xf32> to vector<16x128xf32>
    %10 = arith.addf %7, %9 : vector<16x128xf32>
    %c0_10 = arith.constant 0 : index
    %c0_11 = arith.constant 0 : index
    %11 = vector.load %arg3[%c0_10, %c0_11] : memref<32x128xf32, #tpu.memory_space<vmem>>, vector<32x128xf32>
    %c0_12 = arith.constant 0 : index
    %c0_13 = arith.constant 0 : index
    %12 = vector.load %arg4[%c0_12, %c0_13] : memref<32x128xf32, #tpu.memory_space<vmem>>, vector<32x128xf32>
    %cst_14 = arith.constant 0.000000e+00 : f32
    %13 = vector.broadcast %cst_14 : f32 to vector<2x32xf32>
    %14 = vector.extract_strided_slice %5 {offsets = [0, 0], sizes = [2, 128], strides = [1, 1]} : vector<16x128xf32> to vector<2x128xf32>
    %cst_15 = arith.constant dense<0.000000e+00> : vector<2x128xf32>
    %15 = tpu.matmul %13, %11, %cst_15 {dimension_numbers = #tpu.dot_dimension_numbers<[1], [0], [0], [1], [0, 0, 1, 1], [], []>} : vector<2x32xf32>, vector<32x128xf32>, vector<2x128xf32> -> vector<2x128xf32>
    %16 = arith.addf %14, %15 : vector<2x128xf32>
    %17 = arith.negf %16 : vector<2x128xf32>
    %18 = math.exp %17 : vector<2x128xf32>
    %cst_16 = arith.constant 1.000000e+00 : f32
    %19 = vector.broadcast %cst_16 : f32 to vector<2x128xf32>
    %20 = arith.addf %19, %18 : vector<2x128xf32>
    %21 = arith.divf %19, %20 : vector<2x128xf32>
    %22 = math.tanh %16 : vector<2x128xf32>
    %23 = vector.extract_strided_slice %21 {offsets = [0, 0], sizes = [2, 32], strides = [1, 1]} : vector<2x128xf32> to vector<2x32xf32>
    %24 = vector.extract_strided_slice %21 {offsets = [0, 32], sizes = [2, 32], strides = [1, 1]} : vector<2x128xf32> to vector<2x32xf32>
    %25 = vector.extract_strided_slice %22 {offsets = [0, 64], sizes = [2, 32], strides = [1, 1]} : vector<2x128xf32> to vector<2x32xf32>
    %26 = vector.extract_strided_slice %21 {offsets = [0, 96], sizes = [2, 32], strides = [1, 1]} : vector<2x128xf32> to vector<2x32xf32>
    %27 = arith.mulf %24, %13 : vector<2x32xf32>
    %28 = arith.mulf %23, %25 : vector<2x32xf32>
    %29 = arith.addf %27, %28 : vector<2x32xf32>
    %30 = math.tanh %29 : vector<2x32xf32>
    %31 = arith.mulf %26, %30 : vector<2x32xf32>
    %32 = vector.extract_strided_slice %10 {offsets = [14, 0], sizes = [2, 128], strides = [1, 1]} : vector<16x128xf32> to vector<2x128xf32>
    %cst_17 = arith.constant dense<0.000000e+00> : vector<2x128xf32>
    %33 = tpu.matmul %13, %12, %cst_17 {dimension_numbers = #tpu.dot_dimension_numbers<[1], [0], [0], [1], [0, 0, 1, 1], [], []>} : vector<2x32xf32>, vector<32x128xf32>, vector<2x128xf32> -> vector<2x128xf32>
    %34 = arith.addf %32, %33 : vector<2x128xf32>
    %35 = arith.negf %34 : vector<2x128xf32>
    %36 = math.exp %35 : vector<2x128xf32>
    %cst_18 = arith.constant 1.000000e+00 : f32
    %37 = vector.broadcast %cst_18 : f32 to vector<2x128xf32>
    %38 = arith.addf %37, %36 : vector<2x128xf32>
    %39 = arith.divf %37, %38 : vector<2x128xf32>
    %40 = math.tanh %34 : vector<2x128xf32>
    %41 = vector.extract_strided_slice %39 {offsets = [0, 0], sizes = [2, 32], strides = [1, 1]} : vector<2x128xf32> to vector<2x32xf32>
    %42 = vector.extract_strided_slice %39 {offsets = [0, 32], sizes = [2, 32], strides = [1, 1]} : vector<2x128xf32> to vector<2x32xf32>
    %43 = vector.extract_strided_slice %40 {offsets = [0, 64], sizes = [2, 32], strides = [1, 1]} : vector<2x128xf32> to vector<2x32xf32>
    %44 = vector.extract_strided_slice %39 {offsets = [0, 96], sizes = [2, 32], strides = [1, 1]} : vector<2x128xf32> to vector<2x32xf32>
    %45 = arith.mulf %42, %13 : vector<2x32xf32>
    %46 = arith.mulf %41, %43 : vector<2x32xf32>
    %47 = arith.addf %45, %46 : vector<2x32xf32>
    %48 = math.tanh %47 : vector<2x32xf32>
    %49 = arith.mulf %44, %48 : vector<2x32xf32>
    %c0_19 = arith.constant 0 : index
    %c0_20 = arith.constant 0 : index
    %50 = vector.load %arg22[%c0_19, %c0_20] : memref<16x32xf32, #tpu.memory_space<vmem>>, vector<2x32xf32>
    tpu.vector_store %arg22[%c0_19, %c0_20], %31 {strides = array<i32>} : memref<16x32xf32, #tpu.memory_space<vmem>>, vector<2x32xf32>,
    %c14 = arith.constant 14 : index
    %c0_21 = arith.constant 0 : index
    %51 = vector.load %arg23[%c14, %c0_21] : memref<16x32xf32, #tpu.memory_space<vmem>>, vector<2x32xf32>
    tpu.vector_store %arg23[%c14, %c0_21], %49 {strides = array<i32>} : memref<16x32xf32, #tpu.memory_space<vmem>>, vector<2x32xf32>,
    %52 = vector.extract_strided_slice %5 {offsets = [2, 0], sizes = [2, 128], strides = [1, 1]} : vector<16x128xf32> to vector<2x128xf32>
    %cst_22 = arith.constant dense<0.000000e+00> : vector<2x128xf32>
    %53 = tpu.matmul %31, %11, %cst_22 {dimension_numbers = #tpu.dot_dimension_numbers<[1], [0], [0], [1], [0, 0, 1, 1], [], []>} : vector<2x32xf32>, vector<32x128xf32>, vector<2x128xf32> -> vector<2x128xf32>
    %54 = arith.addf %52, %53 : vector<2x128xf32>
    %55 = arith.negf %54 : vector<2x128xf32>
    %56 = math.exp %55 : vector<2x128xf32>
    %cst_23 = arith.constant 1.000000e+00 : f32
    %57 = vector.broadcast %cst_23 : f32 to vector<2x128xf32>
    %58 = arith.addf %57, %56 : vector<2x128xf32>
    %59 = arith.divf %57, %58 : vector<2x128xf32>
    %60 = math.tanh %54 : vector<2x128xf32>
    %61 = vector.extract_strided_slice %59 {offsets = [0, 0], sizes = [2, 32], strides = [1, 1]} : vector<2x128xf32> to vector<2x32xf32>
    %62 = vector.extract_strided_slice %59 {offsets = [0, 32], sizes = [2, 32], strides = [1, 1]} : vector<2x128xf32> to vector<2x32xf32>
    %63 = vector.extract_strided_slice %60 {offsets = [0, 64], sizes = [2, 32], strides = [1, 1]} : vector<2x128xf32> to vector<2x32xf32>
    %64 = vector.extract_strided_slice %59 {offsets = [0, 96], sizes = [2, 32], strides = [1, 1]} : vector<2x128xf32> to vector<2x32xf32>
    %65 = arith.mulf %62, %29 : vector<2x32xf32>
    %66 = arith.mulf %61, %63 : vector<2x32xf32>
    %67 = arith.addf %65, %66 : vector<2x32xf32>
    %68 = math.tanh %67 : vector<2x32xf32>
    %69 = arith.mulf %64, %68 : vector<2x32xf32>
    %70 = vector.extract_strided_slice %10 {offsets = [12, 0], sizes = [2, 128], strides = [1, 1]} : vector<16x128xf32> to vector<2x128xf32>
    %cst_24 = arith.constant dense<0.000000e+00> : vector<2x128xf32>
    %71 = tpu.matmul %49, %12, %cst_24 {dimension_numbers = #tpu.dot_dimension_numbers<[1], [0], [0], [1], [0, 0, 1, 1], [], []>} : vector<2x32xf32>, vector<32x128xf32>, vector<2x128xf32> -> vector<2x128xf32>
    %72 = arith.addf %70, %71 : vector<2x128xf32>
    %73 = arith.negf %72 : vector<2x128xf32>
    %74 = math.exp %73 : vector<2x128xf32>
    %cst_25 = arith.constant 1.000000e+00 : f32
    %75 = vector.broadcast %cst_25 : f32 to vector<2x128xf32>
    %76 = arith.addf %75, %74 : vector<2x128xf32>
    %77 = arith.divf %75, %76 : vector<2x128xf32>
    %78 = math.tanh %72 : vector<2x128xf32>
    %79 = vector.extract_strided_slice %77 {offsets = [0, 0], sizes = [2, 32], strides = [1, 1]} : vector<2x128xf32> to vector<2x32xf32>
    %80 = vector.extract_strided_slice %77 {offsets = [0, 32], sizes = [2, 32], strides = [1, 1]} : vector<2x128xf32> to vector<2x32xf32>
    %81 = vector.extract_strided_slice %78 {offsets = [0, 64], sizes = [2, 32], strides = [1, 1]} : vector<2x128xf32> to vector<2x32xf32>
    %82 = vector.extract_strided_slice %77 {offsets = [0, 96], sizes = [2, 32], strides = [1, 1]} : vector<2x128xf32> to vector<2x32xf32>
    %83 = arith.mulf %80, %47 : vector<2x32xf32>
    %84 = arith.mulf %79, %81 : vector<2x32xf32>
    %85 = arith.addf %83, %84 : vector<2x32xf32>
    %86 = math.tanh %85 : vector<2x32xf32>
    %87 = arith.mulf %82, %86 : vector<2x32xf32>
    %c2 = arith.constant 2 : index
    %c0_26 = arith.constant 0 : index
    %88 = vector.load %arg22[%c2, %c0_26] : memref<16x32xf32, #tpu.memory_space<vmem>>, vector<2x32xf32>
    tpu.vector_store %arg22[%c2, %c0_26], %69 {strides = array<i32>} : memref<16x32xf32, #tpu.memory_space<vmem>>, vector<2x32xf32>,
    %c12 = arith.constant 12 : index
    %c0_27 = arith.constant 0 : index
    %89 = vector.load %arg23[%c12, %c0_27] : memref<16x32xf32, #tpu.memory_space<vmem>>, vector<2x32xf32>
    tpu.vector_store %arg23[%c12, %c0_27], %87 {strides = array<i32>} : memref<16x32xf32, #tpu.memory_space<vmem>>, vector<2x32xf32>,
    %90 = vector.extract_strided_slice %5 {offsets = [4, 0], sizes = [2, 128], strides = [1, 1]} : vector<16x128xf32> to vector<2x128xf32>
    %cst_28 = arith.constant dense<0.000000e+00> : vector<2x128xf32>
    %91 = tpu.matmul %69, %11, %cst_28 {dimension_numbers = #tpu.dot_dimension_numbers<[1], [0], [0], [1], [0, 0, 1, 1], [], []>} : vector<2x32xf32>, vector<32x128xf32>, vector<2x128xf32> -> vector<2x128xf32>
    %92 = arith.addf %90, %91 : vector<2x128xf32>
    %93 = arith.negf %92 : vector<2x128xf32>
    %94 = math.exp %93 : vector<2x128xf32>
    %cst_29 = arith.constant 1.000000e+00 : f32
    %95 = vector.broadcast %cst_29 : f32 to vector<2x128xf32>
    %96 = arith.addf %95, %94 : vector<2x128xf32>
    %97 = arith.divf %95, %96 : vector<2x128xf32>
    %98 = math.tanh %92 : vector<2x128xf32>
    %99 = vector.extract_strided_slice %97 {offsets = [0, 0], sizes = [2, 32], strides = [1, 1]} : vector<2x128xf32> to vector<2x32xf32>
    %100 = vector.extract_strided_slice %97 {offsets = [0, 32], sizes = [2, 32], strides = [1, 1]} : vector<2x128xf32> to vector<2x32xf32>
    %101 = vector.extract_strided_slice %98 {offsets = [0, 64], sizes = [2, 32], strides = [1, 1]} : vector<2x128xf32> to vector<2x32xf32>
    %102 = vector.extract_strided_slice %97 {offsets = [0, 96], sizes = [2, 32], strides = [1, 1]} : vector<2x128xf32> to vector<2x32xf32>
    %103 = arith.mulf %100, %67 : vector<2x32xf32>
    %104 = arith.mulf %99, %101 : vector<2x32xf32>
    %105 = arith.addf %103, %104 : vector<2x32xf32>
    %106 = math.tanh %105 : vector<2x32xf32>
    %107 = arith.mulf %102, %106 : vector<2x32xf32>
    %108 = vector.extract_strided_slice %10 {offsets = [10, 0], sizes = [2, 128], strides = [1, 1]} : vector<16x128xf32> to vector<2x128xf32>
    %cst_30 = arith.constant dense<0.000000e+00> : vector<2x128xf32>
    %109 = tpu.matmul %87, %12, %cst_30 {dimension_numbers = #tpu.dot_dimension_numbers<[1], [0], [0], [1], [0, 0, 1, 1], [], []>} : vector<2x32xf32>, vector<32x128xf32>, vector<2x128xf32> -> vector<2x128xf32>
    %110 = arith.addf %108, %109 : vector<2x128xf32>
    %111 = arith.negf %110 : vector<2x128xf32>
    %112 = math.exp %111 : vector<2x128xf32>
    %cst_31 = arith.constant 1.000000e+00 : f32
    %113 = vector.broadcast %cst_31 : f32 to vector<2x128xf32>
    %114 = arith.addf %113, %112 : vector<2x128xf32>
    %115 = arith.divf %113, %114 : vector<2x128xf32>
    %116 = math.tanh %110 : vector<2x128xf32>
    %117 = vector.extract_strided_slice %115 {offsets = [0, 0], sizes = [2, 32], strides = [1, 1]} : vector<2x128xf32> to vector<2x32xf32>
    %118 = vector.extract_strided_slice %115 {offsets = [0, 32], sizes = [2, 32], strides = [1, 1]} : vector<2x128xf32> to vector<2x32xf32>
    %119 = vector.extract_strided_slice %116 {offsets = [0, 64], sizes = [2, 32], strides = [1, 1]} : vector<2x128xf32> to vector<2x32xf32>
    %120 = vector.extract_strided_slice %115 {offsets = [0, 96], sizes = [2, 32], strides = [1, 1]} : vector<2x128xf32> to vector<2x32xf32>
    %121 = arith.mulf %118, %85 : vector<2x32xf32>
    %122 = arith.mulf %117, %119 : vector<2x32xf32>
    %123 = arith.addf %121, %122 : vector<2x32xf32>
    %124 = math.tanh %123 : vector<2x32xf32>
    %125 = arith.mulf %120, %124 : vector<2x32xf32>
    %c4 = arith.constant 4 : index
    %c0_32 = arith.constant 0 : index
    %126 = vector.load %arg22[%c4, %c0_32] : memref<16x32xf32, #tpu.memory_space<vmem>>, vector<2x32xf32>
    tpu.vector_store %arg22[%c4, %c0_32], %107 {strides = array<i32>} : memref<16x32xf32, #tpu.memory_space<vmem>>, vector<2x32xf32>,
    %c10 = arith.constant 10 : index
    %c0_33 = arith.constant 0 : index
    %127 = vector.load %arg23[%c10, %c0_33] : memref<16x32xf32, #tpu.memory_space<vmem>>, vector<2x32xf32>
    tpu.vector_store %arg23[%c10, %c0_33], %125 {strides = array<i32>} : memref<16x32xf32, #tpu.memory_space<vmem>>, vector<2x32xf32>,
    %128 = vector.extract_strided_slice %5 {offsets = [6, 0], sizes = [2, 128], strides = [1, 1]} : vector<16x128xf32> to vector<2x128xf32>
    %cst_34 = arith.constant dense<0.000000e+00> : vector<2x128xf32>
    %129 = tpu.matmul %107, %11, %cst_34 {dimension_numbers = #tpu.dot_dimension_numbers<[1], [0], [0], [1], [0, 0, 1, 1], [], []>} : vector<2x32xf32>, vector<32x128xf32>, vector<2x128xf32> -> vector<2x128xf32>
    %130 = arith.addf %128, %129 : vector<2x128xf32>
    %131 = arith.negf %130 : vector<2x128xf32>
    %132 = math.exp %131 : vector<2x128xf32>
    %cst_35 = arith.constant 1.000000e+00 : f32
    %133 = vector.broadcast %cst_35 : f32 to vector<2x128xf32>
    %134 = arith.addf %133, %132 : vector<2x128xf32>
    %135 = arith.divf %133, %134 : vector<2x128xf32>
    %136 = math.tanh %130 : vector<2x128xf32>
    %137 = vector.extract_strided_slice %135 {offsets = [0, 0], sizes = [2, 32], strides = [1, 1]} : vector<2x128xf32> to vector<2x32xf32>
    %138 = vector.extract_strided_slice %135 {offsets = [0, 32], sizes = [2, 32], strides = [1, 1]} : vector<2x128xf32> to vector<2x32xf32>
    %139 = vector.extract_strided_slice %136 {offsets = [0, 64], sizes = [2, 32], strides = [1, 1]} : vector<2x128xf32> to vector<2x32xf32>
    %140 = vector.extract_strided_slice %135 {offsets = [0, 96], sizes = [2, 32], strides = [1, 1]} : vector<2x128xf32> to vector<2x32xf32>
    %141 = arith.mulf %138, %105 : vector<2x32xf32>
    %142 = arith.mulf %137, %139 : vector<2x32xf32>
    %143 = arith.addf %141, %142 : vector<2x32xf32>
    %144 = math.tanh %143 : vector<2x32xf32>
    %145 = arith.mulf %140, %144 : vector<2x32xf32>
    %146 = vector.extract_strided_slice %10 {offsets = [8, 0], sizes = [2, 128], strides = [1, 1]} : vector<16x128xf32> to vector<2x128xf32>
    %cst_36 = arith.constant dense<0.000000e+00> : vector<2x128xf32>
    %147 = tpu.matmul %125, %12, %cst_36 {dimension_numbers = #tpu.dot_dimension_numbers<[1], [0], [0], [1], [0, 0, 1, 1], [], []>} : vector<2x32xf32>, vector<32x128xf32>, vector<2x128xf32> -> vector<2x128xf32>
    %148 = arith.addf %146, %147 : vector<2x128xf32>
    %149 = arith.negf %148 : vector<2x128xf32>
    %150 = math.exp %149 : vector<2x128xf32>
    %cst_37 = arith.constant 1.000000e+00 : f32
    %151 = vector.broadcast %cst_37 : f32 to vector<2x128xf32>
    %152 = arith.addf %151, %150 : vector<2x128xf32>
    %153 = arith.divf %151, %152 : vector<2x128xf32>
    %154 = math.tanh %148 : vector<2x128xf32>
    %155 = vector.extract_strided_slice %153 {offsets = [0, 0], sizes = [2, 32], strides = [1, 1]} : vector<2x128xf32> to vector<2x32xf32>
    %156 = vector.extract_strided_slice %153 {offsets = [0, 32], sizes = [2, 32], strides = [1, 1]} : vector<2x128xf32> to vector<2x32xf32>
    %157 = vector.extract_strided_slice %154 {offsets = [0, 64], sizes = [2, 32], strides = [1, 1]} : vector<2x128xf32> to vector<2x32xf32>
    %158 = vector.extract_strided_slice %153 {offsets = [0, 96], sizes = [2, 32], strides = [1, 1]} : vector<2x128xf32> to vector<2x32xf32>
    %159 = arith.mulf %156, %123 : vector<2x32xf32>
    %160 = arith.mulf %155, %157 : vector<2x32xf32>
    %161 = arith.addf %159, %160 : vector<2x32xf32>
    %162 = math.tanh %161 : vector<2x32xf32>
    %163 = arith.mulf %158, %162 : vector<2x32xf32>
    %c6 = arith.constant 6 : index
    %c0_38 = arith.constant 0 : index
    %164 = vector.load %arg22[%c6, %c0_38] : memref<16x32xf32, #tpu.memory_space<vmem>>, vector<2x32xf32>
    tpu.vector_store %arg22[%c6, %c0_38], %145 {strides = array<i32>} : memref<16x32xf32, #tpu.memory_space<vmem>>, vector<2x32xf32>,
    %c8 = arith.constant 8 : index
    %c0_39 = arith.constant 0 : index
    %165 = vector.load %arg23[%c8, %c0_39] : memref<16x32xf32, #tpu.memory_space<vmem>>, vector<2x32xf32>
    tpu.vector_store %arg23[%c8, %c0_39], %163 {strides = array<i32>} : memref<16x32xf32, #tpu.memory_space<vmem>>, vector<2x32xf32>,
    %166 = vector.extract_strided_slice %5 {offsets = [8, 0], sizes = [2, 128], strides = [1, 1]} : vector<16x128xf32> to vector<2x128xf32>
    %cst_40 = arith.constant dense<0.000000e+00> : vector<2x128xf32>
    %167 = tpu.matmul %145, %11, %cst_40 {dimension_numbers = #tpu.dot_dimension_numbers<[1], [0], [0], [1], [0, 0, 1, 1], [], []>} : vector<2x32xf32>, vector<32x128xf32>, vector<2x128xf32> -> vector<2x128xf32>
    %168 = arith.addf %166, %167 : vector<2x128xf32>
    %169 = arith.negf %168 : vector<2x128xf32>
    %170 = math.exp %169 : vector<2x128xf32>
    %cst_41 = arith.constant 1.000000e+00 : f32
    %171 = vector.broadcast %cst_41 : f32 to vector<2x128xf32>
    %172 = arith.addf %171, %170 : vector<2x128xf32>
    %173 = arith.divf %171, %172 : vector<2x128xf32>
    %174 = math.tanh %168 : vector<2x128xf32>
    %175 = vector.extract_strided_slice %173 {offsets = [0, 0], sizes = [2, 32], strides = [1, 1]} : vector<2x128xf32> to vector<2x32xf32>
    %176 = vector.extract_strided_slice %173 {offsets = [0, 32], sizes = [2, 32], strides = [1, 1]} : vector<2x128xf32> to vector<2x32xf32>
    %177 = vector.extract_strided_slice %174 {offsets = [0, 64], sizes = [2, 32], strides = [1, 1]} : vector<2x128xf32> to vector<2x32xf32>
    %178 = vector.extract_strided_slice %173 {offsets = [0, 96], sizes = [2, 32], strides = [1, 1]} : vector<2x128xf32> to vector<2x32xf32>
    %179 = arith.mulf %176, %143 : vector<2x32xf32>
    %180 = arith.mulf %175, %177 : vector<2x32xf32>
    %181 = arith.addf %179, %180 : vector<2x32xf32>
    %182 = math.tanh %181 : vector<2x32xf32>
    %183 = arith.mulf %178, %182 : vector<2x32xf32>
    %184 = vector.extract_strided_slice %10 {offsets = [6, 0], sizes = [2, 128], strides = [1, 1]} : vector<16x128xf32> to vector<2x128xf32>
    %cst_42 = arith.constant dense<0.000000e+00> : vector<2x128xf32>
    %185 = tpu.matmul %163, %12, %cst_42 {dimension_numbers = #tpu.dot_dimension_numbers<[1], [0], [0], [1], [0, 0, 1, 1], [], []>} : vector<2x32xf32>, vector<32x128xf32>, vector<2x128xf32> -> vector<2x128xf32>
    %186 = arith.addf %184, %185 : vector<2x128xf32>
    %187 = arith.negf %186 : vector<2x128xf32>
    %188 = math.exp %187 : vector<2x128xf32>
    %cst_43 = arith.constant 1.000000e+00 : f32
    %189 = vector.broadcast %cst_43 : f32 to vector<2x128xf32>
    %190 = arith.addf %189, %188 : vector<2x128xf32>
    %191 = arith.divf %189, %190 : vector<2x128xf32>
    %192 = math.tanh %186 : vector<2x128xf32>
    %193 = vector.extract_strided_slice %191 {offsets = [0, 0], sizes = [2, 32], strides = [1, 1]} : vector<2x128xf32> to vector<2x32xf32>
    %194 = vector.extract_strided_slice %191 {offsets = [0, 32], sizes = [2, 32], strides = [1, 1]} : vector<2x128xf32> to vector<2x32xf32>
    %195 = vector.extract_strided_slice %192 {offsets = [0, 64], sizes = [2, 32], strides = [1, 1]} : vector<2x128xf32> to vector<2x32xf32>
    %196 = vector.extract_strided_slice %191 {offsets = [0, 96], sizes = [2, 32], strides = [1, 1]} : vector<2x128xf32> to vector<2x32xf32>
    %197 = arith.mulf %194, %161 : vector<2x32xf32>
    %198 = arith.mulf %193, %195 : vector<2x32xf32>
    %199 = arith.addf %197, %198 : vector<2x32xf32>
    %200 = math.tanh %199 : vector<2x32xf32>
    %201 = arith.mulf %196, %200 : vector<2x32xf32>
    %c8_44 = arith.constant 8 : index
    %c0_45 = arith.constant 0 : index
    %202 = vector.load %arg22[%c8_44, %c0_45] : memref<16x32xf32, #tpu.memory_space<vmem>>, vector<2x32xf32>
    tpu.vector_store %arg22[%c8_44, %c0_45], %183 {strides = array<i32>} : memref<16x32xf32, #tpu.memory_space<vmem>>, vector<2x32xf32>,
    %c6_46 = arith.constant 6 : index
    %c0_47 = arith.constant 0 : index
    %203 = vector.load %arg23[%c6_46, %c0_47] : memref<16x32xf32, #tpu.memory_space<vmem>>, vector<2x32xf32>
    tpu.vector_store %arg23[%c6_46, %c0_47], %201 {strides = array<i32>} : memref<16x32xf32, #tpu.memory_space<vmem>>, vector<2x32xf32>,
    %204 = vector.extract_strided_slice %5 {offsets = [10, 0], sizes = [2, 128], strides = [1, 1]} : vector<16x128xf32> to vector<2x128xf32>
    %cst_48 = arith.constant dense<0.000000e+00> : vector<2x128xf32>
    %205 = tpu.matmul %183, %11, %cst_48 {dimension_numbers = #tpu.dot_dimension_numbers<[1], [0], [0], [1], [0, 0, 1, 1], [], []>} : vector<2x32xf32>, vector<32x128xf32>, vector<2x128xf32> -> vector<2x128xf32>
    %206 = arith.addf %204, %205 : vector<2x128xf32>
    %207 = arith.negf %206 : vector<2x128xf32>
    %208 = math.exp %207 : vector<2x128xf32>
    %cst_49 = arith.constant 1.000000e+00 : f32
    %209 = vector.broadcast %cst_49 : f32 to vector<2x128xf32>
    %210 = arith.addf %209, %208 : vector<2x128xf32>
    %211 = arith.divf %209, %210 : vector<2x128xf32>
    %212 = math.tanh %206 : vector<2x128xf32>
    %213 = vector.extract_strided_slice %211 {offsets = [0, 0], sizes = [2, 32], strides = [1, 1]} : vector<2x128xf32> to vector<2x32xf32>
    %214 = vector.extract_strided_slice %211 {offsets = [0, 32], sizes = [2, 32], strides = [1, 1]} : vector<2x128xf32> to vector<2x32xf32>
    %215 = vector.extract_strided_slice %212 {offsets = [0, 64], sizes = [2, 32], strides = [1, 1]} : vector<2x128xf32> to vector<2x32xf32>
    %216 = vector.extract_strided_slice %211 {offsets = [0, 96], sizes = [2, 32], strides = [1, 1]} : vector<2x128xf32> to vector<2x32xf32>
    %217 = arith.mulf %214, %181 : vector<2x32xf32>
    %218 = arith.mulf %213, %215 : vector<2x32xf32>
    %219 = arith.addf %217, %218 : vector<2x32xf32>
    %220 = math.tanh %219 : vector<2x32xf32>
    %221 = arith.mulf %216, %220 : vector<2x32xf32>
    %222 = vector.extract_strided_slice %10 {offsets = [4, 0], sizes = [2, 128], strides = [1, 1]} : vector<16x128xf32> to vector<2x128xf32>
    %cst_50 = arith.constant dense<0.000000e+00> : vector<2x128xf32>
    %223 = tpu.matmul %201, %12, %cst_50 {dimension_numbers = #tpu.dot_dimension_numbers<[1], [0], [0], [1], [0, 0, 1, 1], [], []>} : vector<2x32xf32>, vector<32x128xf32>, vector<2x128xf32> -> vector<2x128xf32>
    %224 = arith.addf %222, %223 : vector<2x128xf32>
    %225 = arith.negf %224 : vector<2x128xf32>
    %226 = math.exp %225 : vector<2x128xf32>
    %cst_51 = arith.constant 1.000000e+00 : f32
    %227 = vector.broadcast %cst_51 : f32 to vector<2x128xf32>
    %228 = arith.addf %227, %226 : vector<2x128xf32>
    %229 = arith.divf %227, %228 : vector<2x128xf32>
    %230 = math.tanh %224 : vector<2x128xf32>
    %231 = vector.extract_strided_slice %229 {offsets = [0, 0], sizes = [2, 32], strides = [1, 1]} : vector<2x128xf32> to vector<2x32xf32>
    %232 = vector.extract_strided_slice %229 {offsets = [0, 32], sizes = [2, 32], strides = [1, 1]} : vector<2x128xf32> to vector<2x32xf32>
    %233 = vector.extract_strided_slice %230 {offsets = [0, 64], sizes = [2, 32], strides = [1, 1]} : vector<2x128xf32> to vector<2x32xf32>
    %234 = vector.extract_strided_slice %229 {offsets = [0, 96], sizes = [2, 32], strides = [1, 1]} : vector<2x128xf32> to vector<2x32xf32>
    %235 = arith.mulf %232, %199 : vector<2x32xf32>
    %236 = arith.mulf %231, %233 : vector<2x32xf32>
    %237 = arith.addf %235, %236 : vector<2x32xf32>
    %238 = math.tanh %237 : vector<2x32xf32>
    %239 = arith.mulf %234, %238 : vector<2x32xf32>
    %c10_52 = arith.constant 10 : index
    %c0_53 = arith.constant 0 : index
    %240 = vector.load %arg22[%c10_52, %c0_53] : memref<16x32xf32, #tpu.memory_space<vmem>>, vector<2x32xf32>
    tpu.vector_store %arg22[%c10_52, %c0_53], %221 {strides = array<i32>} : memref<16x32xf32, #tpu.memory_space<vmem>>, vector<2x32xf32>,
    %c4_54 = arith.constant 4 : index
    %c0_55 = arith.constant 0 : index
    %241 = vector.load %arg23[%c4_54, %c0_55] : memref<16x32xf32, #tpu.memory_space<vmem>>, vector<2x32xf32>
    tpu.vector_store %arg23[%c4_54, %c0_55], %239 {strides = array<i32>} : memref<16x32xf32, #tpu.memory_space<vmem>>, vector<2x32xf32>,
    %242 = vector.extract_strided_slice %5 {offsets = [12, 0], sizes = [2, 128], strides = [1, 1]} : vector<16x128xf32> to vector<2x128xf32>
    %cst_56 = arith.constant dense<0.000000e+00> : vector<2x128xf32>
    %243 = tpu.matmul %221, %11, %cst_56 {dimension_numbers = #tpu.dot_dimension_numbers<[1], [0], [0], [1], [0, 0, 1, 1], [], []>} : vector<2x32xf32>, vector<32x128xf32>, vector<2x128xf32> -> vector<2x128xf32>
    %244 = arith.addf %242, %243 : vector<2x128xf32>
    %245 = arith.negf %244 : vector<2x128xf32>
    %246 = math.exp %245 : vector<2x128xf32>
    %cst_57 = arith.constant 1.000000e+00 : f32
    %247 = vector.broadcast %cst_57 : f32 to vector<2x128xf32>
    %248 = arith.addf %247, %246 : vector<2x128xf32>
    %249 = arith.divf %247, %248 : vector<2x128xf32>
    %250 = math.tanh %244 : vector<2x128xf32>
    %251 = vector.extract_strided_slice %249 {offsets = [0, 0], sizes = [2, 32], strides = [1, 1]} : vector<2x128xf32> to vector<2x32xf32>
    %252 = vector.extract_strided_slice %249 {offsets = [0, 32], sizes = [2, 32], strides = [1, 1]} : vector<2x128xf32> to vector<2x32xf32>
    %253 = vector.extract_strided_slice %250 {offsets = [0, 64], sizes = [2, 32], strides = [1, 1]} : vector<2x128xf32> to vector<2x32xf32>
    %254 = vector.extract_strided_slice %249 {offsets = [0, 96], sizes = [2, 32], strides = [1, 1]} : vector<2x128xf32> to vector<2x32xf32>
    %255 = arith.mulf %252, %219 : vector<2x32xf32>
    %256 = arith.mulf %251, %253 : vector<2x32xf32>
    %257 = arith.addf %255, %256 : vector<2x32xf32>
    %258 = math.tanh %257 : vector<2x32xf32>
    %259 = arith.mulf %254, %258 : vector<2x32xf32>
    %260 = vector.extract_strided_slice %10 {offsets = [2, 0], sizes = [2, 128], strides = [1, 1]} : vector<16x128xf32> to vector<2x128xf32>
    %cst_58 = arith.constant dense<0.000000e+00> : vector<2x128xf32>
    %261 = tpu.matmul %239, %12, %cst_58 {dimension_numbers = #tpu.dot_dimension_numbers<[1], [0], [0], [1], [0, 0, 1, 1], [], []>} : vector<2x32xf32>, vector<32x128xf32>, vector<2x128xf32> -> vector<2x128xf32>
    %262 = arith.addf %260, %261 : vector<2x128xf32>
    %263 = arith.negf %262 : vector<2x128xf32>
    %264 = math.exp %263 : vector<2x128xf32>
    %cst_59 = arith.constant 1.000000e+00 : f32
    %265 = vector.broadcast %cst_59 : f32 to vector<2x128xf32>
    %266 = arith.addf %265, %264 : vector<2x128xf32>
    %267 = arith.divf %265, %266 : vector<2x128xf32>
    %268 = math.tanh %262 : vector<2x128xf32>
    %269 = vector.extract_strided_slice %267 {offsets = [0, 0], sizes = [2, 32], strides = [1, 1]} : vector<2x128xf32> to vector<2x32xf32>
    %270 = vector.extract_strided_slice %267 {offsets = [0, 32], sizes = [2, 32], strides = [1, 1]} : vector<2x128xf32> to vector<2x32xf32>
    %271 = vector.extract_strided_slice %268 {offsets = [0, 64], sizes = [2, 32], strides = [1, 1]} : vector<2x128xf32> to vector<2x32xf32>
    %272 = vector.extract_strided_slice %267 {offsets = [0, 96], sizes = [2, 32], strides = [1, 1]} : vector<2x128xf32> to vector<2x32xf32>
    %273 = arith.mulf %270, %237 : vector<2x32xf32>
    %274 = arith.mulf %269, %271 : vector<2x32xf32>
    %275 = arith.addf %273, %274 : vector<2x32xf32>
    %276 = math.tanh %275 : vector<2x32xf32>
    %277 = arith.mulf %272, %276 : vector<2x32xf32>
    %c12_60 = arith.constant 12 : index
    %c0_61 = arith.constant 0 : index
    %278 = vector.load %arg22[%c12_60, %c0_61] : memref<16x32xf32, #tpu.memory_space<vmem>>, vector<2x32xf32>
    tpu.vector_store %arg22[%c12_60, %c0_61], %259 {strides = array<i32>} : memref<16x32xf32, #tpu.memory_space<vmem>>, vector<2x32xf32>,
    %c2_62 = arith.constant 2 : index
    %c0_63 = arith.constant 0 : index
    %279 = vector.load %arg23[%c2_62, %c0_63] : memref<16x32xf32, #tpu.memory_space<vmem>>, vector<2x32xf32>
    tpu.vector_store %arg23[%c2_62, %c0_63], %277 {strides = array<i32>} : memref<16x32xf32, #tpu.memory_space<vmem>>, vector<2x32xf32>,
    %280 = vector.extract_strided_slice %5 {offsets = [14, 0], sizes = [2, 128], strides = [1, 1]} : vector<16x128xf32> to vector<2x128xf32>
    %cst_64 = arith.constant dense<0.000000e+00> : vector<2x128xf32>
    %281 = tpu.matmul %259, %11, %cst_64 {dimension_numbers = #tpu.dot_dimension_numbers<[1], [0], [0], [1], [0, 0, 1, 1], [], []>} : vector<2x32xf32>, vector<32x128xf32>, vector<2x128xf32> -> vector<2x128xf32>
    %282 = arith.addf %280, %281 : vector<2x128xf32>
    %283 = arith.negf %282 : vector<2x128xf32>
    %284 = math.exp %283 : vector<2x128xf32>
    %cst_65 = arith.constant 1.000000e+00 : f32
    %285 = vector.broadcast %cst_65 : f32 to vector<2x128xf32>
    %286 = arith.addf %285, %284 : vector<2x128xf32>
    %287 = arith.divf %285, %286 : vector<2x128xf32>
    %288 = math.tanh %282 : vector<2x128xf32>
    %289 = vector.extract_strided_slice %287 {offsets = [0, 0], sizes = [2, 32], strides = [1, 1]} : vector<2x128xf32> to vector<2x32xf32>
    %290 = vector.extract_strided_slice %287 {offsets = [0, 32], sizes = [2, 32], strides = [1, 1]} : vector<2x128xf32> to vector<2x32xf32>
    %291 = vector.extract_strided_slice %288 {offsets = [0, 64], sizes = [2, 32], strides = [1, 1]} : vector<2x128xf32> to vector<2x32xf32>
    %292 = vector.extract_strided_slice %287 {offsets = [0, 96], sizes = [2, 32], strides = [1, 1]} : vector<2x128xf32> to vector<2x32xf32>
    %293 = arith.mulf %290, %257 : vector<2x32xf32>
    %294 = arith.mulf %289, %291 : vector<2x32xf32>
    %295 = arith.addf %293, %294 : vector<2x32xf32>
    %296 = math.tanh %295 : vector<2x32xf32>
    %297 = arith.mulf %292, %296 : vector<2x32xf32>
    %298 = vector.extract_strided_slice %10 {offsets = [0, 0], sizes = [2, 128], strides = [1, 1]} : vector<16x128xf32> to vector<2x128xf32>
    %cst_66 = arith.constant dense<0.000000e+00> : vector<2x128xf32>
    %299 = tpu.matmul %277, %12, %cst_66 {dimension_numbers = #tpu.dot_dimension_numbers<[1], [0], [0], [1], [0, 0, 1, 1], [], []>} : vector<2x32xf32>, vector<32x128xf32>, vector<2x128xf32> -> vector<2x128xf32>
    %300 = arith.addf %298, %299 : vector<2x128xf32>
    %301 = arith.negf %300 : vector<2x128xf32>
    %302 = math.exp %301 : vector<2x128xf32>
    %cst_67 = arith.constant 1.000000e+00 : f32
    %303 = vector.broadcast %cst_67 : f32 to vector<2x128xf32>
    %304 = arith.addf %303, %302 : vector<2x128xf32>
    %305 = arith.divf %303, %304 : vector<2x128xf32>
    %306 = math.tanh %300 : vector<2x128xf32>
    %307 = vector.extract_strided_slice %305 {offsets = [0, 0], sizes = [2, 32], strides = [1, 1]} : vector<2x128xf32> to vector<2x32xf32>
    %308 = vector.extract_strided_slice %305 {offsets = [0, 32], sizes = [2, 32], strides = [1, 1]} : vector<2x128xf32> to vector<2x32xf32>
    %309 = vector.extract_strided_slice %306 {offsets = [0, 64], sizes = [2, 32], strides = [1, 1]} : vector<2x128xf32> to vector<2x32xf32>
    %310 = vector.extract_strided_slice %305 {offsets = [0, 96], sizes = [2, 32], strides = [1, 1]} : vector<2x128xf32> to vector<2x32xf32>
    %311 = arith.mulf %308, %275 : vector<2x32xf32>
    %312 = arith.mulf %307, %309 : vector<2x32xf32>
    %313 = arith.addf %311, %312 : vector<2x32xf32>
    %314 = math.tanh %313 : vector<2x32xf32>
    %315 = arith.mulf %310, %314 : vector<2x32xf32>
    %c14_68 = arith.constant 14 : index
    %c0_69 = arith.constant 0 : index
    %316 = vector.load %arg22[%c14_68, %c0_69] : memref<16x32xf32, #tpu.memory_space<vmem>>, vector<2x32xf32>
    tpu.vector_store %arg22[%c14_68, %c0_69], %297 {strides = array<i32>} : memref<16x32xf32, #tpu.memory_space<vmem>>, vector<2x32xf32>,
    %c0_70 = arith.constant 0 : index
    %c0_71 = arith.constant 0 : index
    %317 = vector.load %arg23[%c0_70, %c0_71] : memref<16x32xf32, #tpu.memory_space<vmem>>, vector<2x32xf32>
    tpu.vector_store %arg23[%c0_70, %c0_71], %315 {strides = array<i32>} : memref<16x32xf32, #tpu.memory_space<vmem>>, vector<2x32xf32>,
    %c0_72 = arith.constant 0 : index
    %c0_73 = arith.constant 0 : index
    %318 = vector.load %arg22[%c0_72, %c0_73] : memref<16x32xf32, #tpu.memory_space<vmem>>, vector<16x32xf32>
    %c0_74 = arith.constant 0 : index
    %c0_75 = arith.constant 0 : index
    %319 = vector.load %arg23[%c0_74, %c0_75] : memref<16x32xf32, #tpu.memory_space<vmem>>, vector<16x32xf32>
    %c0_76 = arith.constant 0 : index
    %c0_77 = arith.constant 0 : index
    %320 = vector.load %arg7[%c0_76, %c0_77] : memref<32x128xf32, #tpu.memory_space<vmem>>, vector<32x128xf32>
    %cst_78 = arith.constant dense<0.000000e+00> : vector<16x128xf32>
    %321 = tpu.matmul %318, %320, %cst_78 {dimension_numbers = #tpu.dot_dimension_numbers<[1], [0], [0], [1], [0, 0, 1, 1], [], []>} : vector<16x32xf32>, vector<32x128xf32>, vector<16x128xf32> -> vector<16x128xf32>
    %c0_79 = arith.constant 0 : index
    %c0_80 = arith.constant 0 : index
    %322 = vector.load %arg8[%c0_79, %c0_80] : memref<32x128xf32, #tpu.memory_space<vmem>>, vector<32x128xf32>
    %cst_81 = arith.constant dense<0.000000e+00> : vector<16x128xf32>
    %323 = tpu.matmul %319, %322, %cst_81 {dimension_numbers = #tpu.dot_dimension_numbers<[1], [0], [0], [1], [0, 0, 1, 1], [], []>} : vector<16x32xf32>, vector<32x128xf32>, vector<16x128xf32> -> vector<16x128xf32>
    %324 = arith.addf %321, %323 : vector<16x128xf32>
    %c0_82 = arith.constant 0 : index
    %c0_83 = arith.constant 0 : index
    %325 = vector.load %arg13[%c0_82, %c0_83] : memref<1x128xf32, #tpu.memory_space<vmem>>, vector<1x128xf32>
    %326 = vector.broadcast %325 : vector<1x128xf32> to vector<16x128xf32>
    %327 = arith.addf %324, %326 : vector<16x128xf32>
    %c0_84 = arith.constant 0 : index
    %c0_85 = arith.constant 0 : index
    %328 = vector.load %arg9[%c0_84, %c0_85] : memref<32x128xf32, #tpu.memory_space<vmem>>, vector<32x128xf32>
    %cst_86 = arith.constant dense<0.000000e+00> : vector<16x128xf32>
    %329 = tpu.matmul %318, %328, %cst_86 {dimension_numbers = #tpu.dot_dimension_numbers<[1], [0], [0], [1], [0, 0, 1, 1], [], []>} : vector<16x32xf32>, vector<32x128xf32>, vector<16x128xf32> -> vector<16x128xf32>
    %c0_87 = arith.constant 0 : index
    %c0_88 = arith.constant 0 : index
    %330 = vector.load %arg10[%c0_87, %c0_88] : memref<32x128xf32, #tpu.memory_space<vmem>>, vector<32x128xf32>
    %cst_89 = arith.constant dense<0.000000e+00> : vector<16x128xf32>
    %331 = tpu.matmul %319, %330, %cst_89 {dimension_numbers = #tpu.dot_dimension_numbers<[1], [0], [0], [1], [0, 0, 1, 1], [], []>} : vector<16x32xf32>, vector<32x128xf32>, vector<16x128xf32> -> vector<16x128xf32>
    %332 = arith.addf %329, %331 : vector<16x128xf32>
    %c0_90 = arith.constant 0 : index
    %c0_91 = arith.constant 0 : index
    %333 = vector.load %arg14[%c0_90, %c0_91] : memref<1x128xf32, #tpu.memory_space<vmem>>, vector<1x128xf32>
    %334 = vector.broadcast %333 : vector<1x128xf32> to vector<16x128xf32>
    %335 = arith.addf %332, %334 : vector<16x128xf32>
    %c0_92 = arith.constant 0 : index
    %c0_93 = arith.constant 0 : index
    %336 = vector.load %arg11[%c0_92, %c0_93] : memref<32x128xf32, #tpu.memory_space<vmem>>, vector<32x128xf32>
    %c0_94 = arith.constant 0 : index
    %c0_95 = arith.constant 0 : index
    %337 = vector.load %arg12[%c0_94, %c0_95] : memref<32x128xf32, #tpu.memory_space<vmem>>, vector<32x128xf32>
    %cst_96 = arith.constant 0xFF800000 : f32
    %338 = vector.broadcast %cst_96 : f32 to vector<2x32xf32>
    %339 = vector.extract_strided_slice %327 {offsets = [0, 0], sizes = [2, 128], strides = [1, 1]} : vector<16x128xf32> to vector<2x128xf32>
    %cst_97 = arith.constant dense<0.000000e+00> : vector<2x128xf32>
    %340 = tpu.matmul %13, %336, %cst_97 {dimension_numbers = #tpu.dot_dimension_numbers<[1], [0], [0], [1], [0, 0, 1, 1], [], []>} : vector<2x32xf32>, vector<32x128xf32>, vector<2x128xf32> -> vector<2x128xf32>
    %341 = arith.addf %339, %340 : vector<2x128xf32>
    %342 = arith.negf %341 : vector<2x128xf32>
    %343 = math.exp %342 : vector<2x128xf32>
    %cst_98 = arith.constant 1.000000e+00 : f32
    %344 = vector.broadcast %cst_98 : f32 to vector<2x128xf32>
    %345 = arith.addf %344, %343 : vector<2x128xf32>
    %346 = arith.divf %344, %345 : vector<2x128xf32>
    %347 = math.tanh %341 : vector<2x128xf32>
    %348 = vector.extract_strided_slice %346 {offsets = [0, 0], sizes = [2, 32], strides = [1, 1]} : vector<2x128xf32> to vector<2x32xf32>
    %349 = vector.extract_strided_slice %346 {offsets = [0, 32], sizes = [2, 32], strides = [1, 1]} : vector<2x128xf32> to vector<2x32xf32>
    %350 = vector.extract_strided_slice %347 {offsets = [0, 64], sizes = [2, 32], strides = [1, 1]} : vector<2x128xf32> to vector<2x32xf32>
    %351 = vector.extract_strided_slice %346 {offsets = [0, 96], sizes = [2, 32], strides = [1, 1]} : vector<2x128xf32> to vector<2x32xf32>
    %352 = arith.mulf %349, %13 : vector<2x32xf32>
    %353 = arith.mulf %348, %350 : vector<2x32xf32>
    %354 = arith.addf %352, %353 : vector<2x32xf32>
    %355 = math.tanh %354 : vector<2x32xf32>
    %356 = arith.mulf %351, %355 : vector<2x32xf32>
    %357 = vector.extract_strided_slice %335 {offsets = [14, 0], sizes = [2, 128], strides = [1, 1]} : vector<16x128xf32> to vector<2x128xf32>
    %cst_99 = arith.constant dense<0.000000e+00> : vector<2x128xf32>
    %358 = tpu.matmul %13, %337, %cst_99 {dimension_numbers = #tpu.dot_dimension_numbers<[1], [0], [0], [1], [0, 0, 1, 1], [], []>} : vector<2x32xf32>, vector<32x128xf32>, vector<2x128xf32> -> vector<2x128xf32>
    %359 = arith.addf %357, %358 : vector<2x128xf32>
    %360 = arith.negf %359 : vector<2x128xf32>
    %361 = math.exp %360 : vector<2x128xf32>
    %cst_100 = arith.constant 1.000000e+00 : f32
    %362 = vector.broadcast %cst_100 : f32 to vector<2x128xf32>
    %363 = arith.addf %362, %361 : vector<2x128xf32>
    %364 = arith.divf %362, %363 : vector<2x128xf32>
    %365 = math.tanh %359 : vector<2x128xf32>
    %366 = vector.extract_strided_slice %364 {offsets = [0, 0], sizes = [2, 32], strides = [1, 1]} : vector<2x128xf32> to vector<2x32xf32>
    %367 = vector.extract_strided_slice %364 {offsets = [0, 32], sizes = [2, 32], strides = [1, 1]} : vector<2x128xf32> to vector<2x32xf32>
    %368 = vector.extract_strided_slice %365 {offsets = [0, 64], sizes = [2, 32], strides = [1, 1]} : vector<2x128xf32> to vector<2x32xf32>
    %369 = vector.extract_strided_slice %364 {offsets = [0, 96], sizes = [2, 32], strides = [1, 1]} : vector<2x128xf32> to vector<2x32xf32>
    %370 = arith.mulf %367, %13 : vector<2x32xf32>
    %371 = arith.mulf %366, %368 : vector<2x32xf32>
    %372 = arith.addf %370, %371 : vector<2x32xf32>
    %373 = math.tanh %372 : vector<2x32xf32>
    %374 = arith.mulf %369, %373 : vector<2x32xf32>
    %375 = arith.maximumf %338, %356 : vector<2x32xf32>
    %376 = arith.maximumf %338, %374 : vector<2x32xf32>
    %377 = arith.addf %13, %356 : vector<2x32xf32>
    %378 = arith.addf %13, %374 : vector<2x32xf32>
    %379 = vector.extract_strided_slice %327 {offsets = [2, 0], sizes = [2, 128], strides = [1, 1]} : vector<16x128xf32> to vector<2x128xf32>
    %cst_101 = arith.constant dense<0.000000e+00> : vector<2x128xf32>
    %380 = tpu.matmul %356, %336, %cst_101 {dimension_numbers = #tpu.dot_dimension_numbers<[1], [0], [0], [1], [0, 0, 1, 1], [], []>} : vector<2x32xf32>, vector<32x128xf32>, vector<2x128xf32> -> vector<2x128xf32>
    %381 = arith.addf %379, %380 : vector<2x128xf32>
    %382 = arith.negf %381 : vector<2x128xf32>
    %383 = math.exp %382 : vector<2x128xf32>
    %cst_102 = arith.constant 1.000000e+00 : f32
    %384 = vector.broadcast %cst_102 : f32 to vector<2x128xf32>
    %385 = arith.addf %384, %383 : vector<2x128xf32>
    %386 = arith.divf %384, %385 : vector<2x128xf32>
    %387 = math.tanh %381 : vector<2x128xf32>
    %388 = vector.extract_strided_slice %386 {offsets = [0, 0], sizes = [2, 32], strides = [1, 1]} : vector<2x128xf32> to vector<2x32xf32>
    %389 = vector.extract_strided_slice %386 {offsets = [0, 32], sizes = [2, 32], strides = [1, 1]} : vector<2x128xf32> to vector<2x32xf32>
    %390 = vector.extract_strided_slice %387 {offsets = [0, 64], sizes = [2, 32], strides = [1, 1]} : vector<2x128xf32> to vector<2x32xf32>
    %391 = vector.extract_strided_slice %386 {offsets = [0, 96], sizes = [2, 32], strides = [1, 1]} : vector<2x128xf32> to vector<2x32xf32>
    %392 = arith.mulf %389, %354 : vector<2x32xf32>
    %393 = arith.mulf %388, %390 : vector<2x32xf32>
    %394 = arith.addf %392, %393 : vector<2x32xf32>
    %395 = math.tanh %394 : vector<2x32xf32>
    %396 = arith.mulf %391, %395 : vector<2x32xf32>
    %397 = vector.extract_strided_slice %335 {offsets = [12, 0], sizes = [2, 128], strides = [1, 1]} : vector<16x128xf32> to vector<2x128xf32>
    %cst_103 = arith.constant dense<0.000000e+00> : vector<2x128xf32>
    %398 = tpu.matmul %374, %337, %cst_103 {dimension_numbers = #tpu.dot_dimension_numbers<[1], [0], [0], [1], [0, 0, 1, 1], [], []>} : vector<2x32xf32>, vector<32x128xf32>, vector<2x128xf32> -> vector<2x128xf32>
    %399 = arith.addf %397, %398 : vector<2x128xf32>
    %400 = arith.negf %399 : vector<2x128xf32>
    %401 = math.exp %400 : vector<2x128xf32>
    %cst_104 = arith.constant 1.000000e+00 : f32
    %402 = vector.broadcast %cst_104 : f32 to vector<2x128xf32>
    %403 = arith.addf %402, %401 : vector<2x128xf32>
    %404 = arith.divf %402, %403 : vector<2x128xf32>
    %405 = math.tanh %399 : vector<2x128xf32>
    %406 = vector.extract_strided_slice %404 {offsets = [0, 0], sizes = [2, 32], strides = [1, 1]} : vector<2x128xf32> to vector<2x32xf32>
    %407 = vector.extract_strided_slice %404 {offsets = [0, 32], sizes = [2, 32], strides = [1, 1]} : vector<2x128xf32> to vector<2x32xf32>
    %408 = vector.extract_strided_slice %405 {offsets = [0, 64], sizes = [2, 32], strides = [1, 1]} : vector<2x128xf32> to vector<2x32xf32>
    %409 = vector.extract_strided_slice %404 {offsets = [0, 96], sizes = [2, 32], strides = [1, 1]} : vector<2x128xf32> to vector<2x32xf32>
    %410 = arith.mulf %407, %372 : vector<2x32xf32>
    %411 = arith.mulf %406, %408 : vector<2x32xf32>
    %412 = arith.addf %410, %411 : vector<2x32xf32>
    %413 = math.tanh %412 : vector<2x32xf32>
    %414 = arith.mulf %409, %413 : vector<2x32xf32>
    %415 = arith.maximumf %375, %396 : vector<2x32xf32>
    %416 = arith.maximumf %376, %414 : vector<2x32xf32>
    %417 = arith.addf %377, %396 : vector<2x32xf32>
    %418 = arith.addf %378, %414 : vector<2x32xf32>
    %419 = vector.extract_strided_slice %327 {offsets = [4, 0], sizes = [2, 128], strides = [1, 1]} : vector<16x128xf32> to vector<2x128xf32>
    %cst_105 = arith.constant dense<0.000000e+00> : vector<2x128xf32>
    %420 = tpu.matmul %396, %336, %cst_105 {dimension_numbers = #tpu.dot_dimension_numbers<[1], [0], [0], [1], [0, 0, 1, 1], [], []>} : vector<2x32xf32>, vector<32x128xf32>, vector<2x128xf32> -> vector<2x128xf32>
    %421 = arith.addf %419, %420 : vector<2x128xf32>
    %422 = arith.negf %421 : vector<2x128xf32>
    %423 = math.exp %422 : vector<2x128xf32>
    %cst_106 = arith.constant 1.000000e+00 : f32
    %424 = vector.broadcast %cst_106 : f32 to vector<2x128xf32>
    %425 = arith.addf %424, %423 : vector<2x128xf32>
    %426 = arith.divf %424, %425 : vector<2x128xf32>
    %427 = math.tanh %421 : vector<2x128xf32>
    %428 = vector.extract_strided_slice %426 {offsets = [0, 0], sizes = [2, 32], strides = [1, 1]} : vector<2x128xf32> to vector<2x32xf32>
    %429 = vector.extract_strided_slice %426 {offsets = [0, 32], sizes = [2, 32], strides = [1, 1]} : vector<2x128xf32> to vector<2x32xf32>
    %430 = vector.extract_strided_slice %427 {offsets = [0, 64], sizes = [2, 32], strides = [1, 1]} : vector<2x128xf32> to vector<2x32xf32>
    %431 = vector.extract_strided_slice %426 {offsets = [0, 96], sizes = [2, 32], strides = [1, 1]} : vector<2x128xf32> to vector<2x32xf32>
    %432 = arith.mulf %429, %394 : vector<2x32xf32>
    %433 = arith.mulf %428, %430 : vector<2x32xf32>
    %434 = arith.addf %432, %433 : vector<2x32xf32>
    %435 = math.tanh %434 : vector<2x32xf32>
    %436 = arith.mulf %431, %435 : vector<2x32xf32>
    %437 = vector.extract_strided_slice %335 {offsets = [10, 0], sizes = [2, 128], strides = [1, 1]} : vector<16x128xf32> to vector<2x128xf32>
    %cst_107 = arith.constant dense<0.000000e+00> : vector<2x128xf32>
    %438 = tpu.matmul %414, %337, %cst_107 {dimension_numbers = #tpu.dot_dimension_numbers<[1], [0], [0], [1], [0, 0, 1, 1], [], []>} : vector<2x32xf32>, vector<32x128xf32>, vector<2x128xf32> -> vector<2x128xf32>
    %439 = arith.addf %437, %438 : vector<2x128xf32>
    %440 = arith.negf %439 : vector<2x128xf32>
    %441 = math.exp %440 : vector<2x128xf32>
    %cst_108 = arith.constant 1.000000e+00 : f32
    %442 = vector.broadcast %cst_108 : f32 to vector<2x128xf32>
    %443 = arith.addf %442, %441 : vector<2x128xf32>
    %444 = arith.divf %442, %443 : vector<2x128xf32>
    %445 = math.tanh %439 : vector<2x128xf32>
    %446 = vector.extract_strided_slice %444 {offsets = [0, 0], sizes = [2, 32], strides = [1, 1]} : vector<2x128xf32> to vector<2x32xf32>
    %447 = vector.extract_strided_slice %444 {offsets = [0, 32], sizes = [2, 32], strides = [1, 1]} : vector<2x128xf32> to vector<2x32xf32>
    %448 = vector.extract_strided_slice %445 {offsets = [0, 64], sizes = [2, 32], strides = [1, 1]} : vector<2x128xf32> to vector<2x32xf32>
    %449 = vector.extract_strided_slice %444 {offsets = [0, 96], sizes = [2, 32], strides = [1, 1]} : vector<2x128xf32> to vector<2x32xf32>
    %450 = arith.mulf %447, %412 : vector<2x32xf32>
    %451 = arith.mulf %446, %448 : vector<2x32xf32>
    %452 = arith.addf %450, %451 : vector<2x32xf32>
    %453 = math.tanh %452 : vector<2x32xf32>
    %454 = arith.mulf %449, %453 : vector<2x32xf32>
    %455 = arith.maximumf %415, %436 : vector<2x32xf32>
    %456 = arith.maximumf %416, %454 : vector<2x32xf32>
    %457 = arith.addf %417, %436 : vector<2x32xf32>
    %458 = arith.addf %418, %454 : vector<2x32xf32>
    %459 = vector.extract_strided_slice %327 {offsets = [6, 0], sizes = [2, 128], strides = [1, 1]} : vector<16x128xf32> to vector<2x128xf32>
    %cst_109 = arith.constant dense<0.000000e+00> : vector<2x128xf32>
    %460 = tpu.matmul %436, %336, %cst_109 {dimension_numbers = #tpu.dot_dimension_numbers<[1], [0], [0], [1], [0, 0, 1, 1], [], []>} : vector<2x32xf32>, vector<32x128xf32>, vector<2x128xf32> -> vector<2x128xf32>
    %461 = arith.addf %459, %460 : vector<2x128xf32>
    %462 = arith.negf %461 : vector<2x128xf32>
    %463 = math.exp %462 : vector<2x128xf32>
    %cst_110 = arith.constant 1.000000e+00 : f32
    %464 = vector.broadcast %cst_110 : f32 to vector<2x128xf32>
    %465 = arith.addf %464, %463 : vector<2x128xf32>
    %466 = arith.divf %464, %465 : vector<2x128xf32>
    %467 = math.tanh %461 : vector<2x128xf32>
    %468 = vector.extract_strided_slice %466 {offsets = [0, 0], sizes = [2, 32], strides = [1, 1]} : vector<2x128xf32> to vector<2x32xf32>
    %469 = vector.extract_strided_slice %466 {offsets = [0, 32], sizes = [2, 32], strides = [1, 1]} : vector<2x128xf32> to vector<2x32xf32>
    %470 = vector.extract_strided_slice %467 {offsets = [0, 64], sizes = [2, 32], strides = [1, 1]} : vector<2x128xf32> to vector<2x32xf32>
    %471 = vector.extract_strided_slice %466 {offsets = [0, 96], sizes = [2, 32], strides = [1, 1]} : vector<2x128xf32> to vector<2x32xf32>
    %472 = arith.mulf %469, %434 : vector<2x32xf32>
    %473 = arith.mulf %468, %470 : vector<2x32xf32>
    %474 = arith.addf %472, %473 : vector<2x32xf32>
    %475 = math.tanh %474 : vector<2x32xf32>
    %476 = arith.mulf %471, %475 : vector<2x32xf32>
    %477 = vector.extract_strided_slice %335 {offsets = [8, 0], sizes = [2, 128], strides = [1, 1]} : vector<16x128xf32> to vector<2x128xf32>
    %cst_111 = arith.constant dense<0.000000e+00> : vector<2x128xf32>
    %478 = tpu.matmul %454, %337, %cst_111 {dimension_numbers = #tpu.dot_dimension_numbers<[1], [0], [0], [1], [0, 0, 1, 1], [], []>} : vector<2x32xf32>, vector<32x128xf32>, vector<2x128xf32> -> vector<2x128xf32>
    %479 = arith.addf %477, %478 : vector<2x128xf32>
    %480 = arith.negf %479 : vector<2x128xf32>
    %481 = math.exp %480 : vector<2x128xf32>
    %cst_112 = arith.constant 1.000000e+00 : f32
    %482 = vector.broadcast %cst_112 : f32 to vector<2x128xf32>
    %483 = arith.addf %482, %481 : vector<2x128xf32>
    %484 = arith.divf %482, %483 : vector<2x128xf32>
    %485 = math.tanh %479 : vector<2x128xf32>
    %486 = vector.extract_strided_slice %484 {offsets = [0, 0], sizes = [2, 32], strides = [1, 1]} : vector<2x128xf32> to vector<2x32xf32>
    %487 = vector.extract_strided_slice %484 {offsets = [0, 32], sizes = [2, 32], strides = [1, 1]} : vector<2x128xf32> to vector<2x32xf32>
    %488 = vector.extract_strided_slice %485 {offsets = [0, 64], sizes = [2, 32], strides = [1, 1]} : vector<2x128xf32> to vector<2x32xf32>
    %489 = vector.extract_strided_slice %484 {offsets = [0, 96], sizes = [2, 32], strides = [1, 1]} : vector<2x128xf32> to vector<2x32xf32>
    %490 = arith.mulf %487, %452 : vector<2x32xf32>
    %491 = arith.mulf %486, %488 : vector<2x32xf32>
    %492 = arith.addf %490, %491 : vector<2x32xf32>
    %493 = math.tanh %492 : vector<2x32xf32>
    %494 = arith.mulf %489, %493 : vector<2x32xf32>
    %495 = arith.maximumf %455, %476 : vector<2x32xf32>
    %496 = arith.maximumf %456, %494 : vector<2x32xf32>
    %497 = arith.addf %457, %476 : vector<2x32xf32>
    %498 = arith.addf %458, %494 : vector<2x32xf32>
    %499 = vector.extract_strided_slice %327 {offsets = [8, 0], sizes = [2, 128], strides = [1, 1]} : vector<16x128xf32> to vector<2x128xf32>
    %cst_113 = arith.constant dense<0.000000e+00> : vector<2x128xf32>
    %500 = tpu.matmul %476, %336, %cst_113 {dimension_numbers = #tpu.dot_dimension_numbers<[1], [0], [0], [1], [0, 0, 1, 1], [], []>} : vector<2x32xf32>, vector<32x128xf32>, vector<2x128xf32> -> vector<2x128xf32>
    %501 = arith.addf %499, %500 : vector<2x128xf32>
    %502 = arith.negf %501 : vector<2x128xf32>
    %503 = math.exp %502 : vector<2x128xf32>
    %cst_114 = arith.constant 1.000000e+00 : f32
    %504 = vector.broadcast %cst_114 : f32 to vector<2x128xf32>
    %505 = arith.addf %504, %503 : vector<2x128xf32>
    %506 = arith.divf %504, %505 : vector<2x128xf32>
    %507 = math.tanh %501 : vector<2x128xf32>
    %508 = vector.extract_strided_slice %506 {offsets = [0, 0], sizes = [2, 32], strides = [1, 1]} : vector<2x128xf32> to vector<2x32xf32>
    %509 = vector.extract_strided_slice %506 {offsets = [0, 32], sizes = [2, 32], strides = [1, 1]} : vector<2x128xf32> to vector<2x32xf32>
    %510 = vector.extract_strided_slice %507 {offsets = [0, 64], sizes = [2, 32], strides = [1, 1]} : vector<2x128xf32> to vector<2x32xf32>
    %511 = vector.extract_strided_slice %506 {offsets = [0, 96], sizes = [2, 32], strides = [1, 1]} : vector<2x128xf32> to vector<2x32xf32>
    %512 = arith.mulf %509, %474 : vector<2x32xf32>
    %513 = arith.mulf %508, %510 : vector<2x32xf32>
    %514 = arith.addf %512, %513 : vector<2x32xf32>
    %515 = math.tanh %514 : vector<2x32xf32>
    %516 = arith.mulf %511, %515 : vector<2x32xf32>
    %517 = vector.extract_strided_slice %335 {offsets = [6, 0], sizes = [2, 128], strides = [1, 1]} : vector<16x128xf32> to vector<2x128xf32>
    %cst_115 = arith.constant dense<0.000000e+00> : vector<2x128xf32>
    %518 = tpu.matmul %494, %337, %cst_115 {dimension_numbers = #tpu.dot_dimension_numbers<[1], [0], [0], [1], [0, 0, 1, 1], [], []>} : vector<2x32xf32>, vector<32x128xf32>, vector<2x128xf32> -> vector<2x128xf32>
    %519 = arith.addf %517, %518 : vector<2x128xf32>
    %520 = arith.negf %519 : vector<2x128xf32>
    %521 = math.exp %520 : vector<2x128xf32>
    %cst_116 = arith.constant 1.000000e+00 : f32
    %522 = vector.broadcast %cst_116 : f32 to vector<2x128xf32>
    %523 = arith.addf %522, %521 : vector<2x128xf32>
    %524 = arith.divf %522, %523 : vector<2x128xf32>
    %525 = math.tanh %519 : vector<2x128xf32>
    %526 = vector.extract_strided_slice %524 {offsets = [0, 0], sizes = [2, 32], strides = [1, 1]} : vector<2x128xf32> to vector<2x32xf32>
    %527 = vector.extract_strided_slice %524 {offsets = [0, 32], sizes = [2, 32], strides = [1, 1]} : vector<2x128xf32> to vector<2x32xf32>
    %528 = vector.extract_strided_slice %525 {offsets = [0, 64], sizes = [2, 32], strides = [1, 1]} : vector<2x128xf32> to vector<2x32xf32>
    %529 = vector.extract_strided_slice %524 {offsets = [0, 96], sizes = [2, 32], strides = [1, 1]} : vector<2x128xf32> to vector<2x32xf32>
    %530 = arith.mulf %527, %492 : vector<2x32xf32>
    %531 = arith.mulf %526, %528 : vector<2x32xf32>
    %532 = arith.addf %530, %531 : vector<2x32xf32>
    %533 = math.tanh %532 : vector<2x32xf32>
    %534 = arith.mulf %529, %533 : vector<2x32xf32>
    %535 = arith.maximumf %495, %516 : vector<2x32xf32>
    %536 = arith.maximumf %496, %534 : vector<2x32xf32>
    %537 = arith.addf %497, %516 : vector<2x32xf32>
    %538 = arith.addf %498, %534 : vector<2x32xf32>
    %539 = vector.extract_strided_slice %327 {offsets = [10, 0], sizes = [2, 128], strides = [1, 1]} : vector<16x128xf32> to vector<2x128xf32>
    %cst_117 = arith.constant dense<0.000000e+00> : vector<2x128xf32>
    %540 = tpu.matmul %516, %336, %cst_117 {dimension_numbers = #tpu.dot_dimension_numbers<[1], [0], [0], [1], [0, 0, 1, 1], [], []>} : vector<2x32xf32>, vector<32x128xf32>, vector<2x128xf32> -> vector<2x128xf32>
    %541 = arith.addf %539, %540 : vector<2x128xf32>
    %542 = arith.negf %541 : vector<2x128xf32>
    %543 = math.exp %542 : vector<2x128xf32>
    %cst_118 = arith.constant 1.000000e+00 : f32
    %544 = vector.broadcast %cst_118 : f32 to vector<2x128xf32>
    %545 = arith.addf %544, %543 : vector<2x128xf32>
    %546 = arith.divf %544, %545 : vector<2x128xf32>
    %547 = math.tanh %541 : vector<2x128xf32>
    %548 = vector.extract_strided_slice %546 {offsets = [0, 0], sizes = [2, 32], strides = [1, 1]} : vector<2x128xf32> to vector<2x32xf32>
    %549 = vector.extract_strided_slice %546 {offsets = [0, 32], sizes = [2, 32], strides = [1, 1]} : vector<2x128xf32> to vector<2x32xf32>
    %550 = vector.extract_strided_slice %547 {offsets = [0, 64], sizes = [2, 32], strides = [1, 1]} : vector<2x128xf32> to vector<2x32xf32>
    %551 = vector.extract_strided_slice %546 {offsets = [0, 96], sizes = [2, 32], strides = [1, 1]} : vector<2x128xf32> to vector<2x32xf32>
    %552 = arith.mulf %549, %514 : vector<2x32xf32>
    %553 = arith.mulf %548, %550 : vector<2x32xf32>
    %554 = arith.addf %552, %553 : vector<2x32xf32>
    %555 = math.tanh %554 : vector<2x32xf32>
    %556 = arith.mulf %551, %555 : vector<2x32xf32>
    %557 = vector.extract_strided_slice %335 {offsets = [4, 0], sizes = [2, 128], strides = [1, 1]} : vector<16x128xf32> to vector<2x128xf32>
    %cst_119 = arith.constant dense<0.000000e+00> : vector<2x128xf32>
    %558 = tpu.matmul %534, %337, %cst_119 {dimension_numbers = #tpu.dot_dimension_numbers<[1], [0], [0], [1], [0, 0, 1, 1], [], []>} : vector<2x32xf32>, vector<32x128xf32>, vector<2x128xf32> -> vector<2x128xf32>
    %559 = arith.addf %557, %558 : vector<2x128xf32>
    %560 = arith.negf %559 : vector<2x128xf32>
    %561 = math.exp %560 : vector<2x128xf32>
    %cst_120 = arith.constant 1.000000e+00 : f32
    %562 = vector.broadcast %cst_120 : f32 to vector<2x128xf32>
    %563 = arith.addf %562, %561 : vector<2x128xf32>
    %564 = arith.divf %562, %563 : vector<2x128xf32>
    %565 = math.tanh %559 : vector<2x128xf32>
    %566 = vector.extract_strided_slice %564 {offsets = [0, 0], sizes = [2, 32], strides = [1, 1]} : vector<2x128xf32> to vector<2x32xf32>
    %567 = vector.extract_strided_slice %564 {offsets = [0, 32], sizes = [2, 32], strides = [1, 1]} : vector<2x128xf32> to vector<2x32xf32>
    %568 = vector.extract_strided_slice %565 {offsets = [0, 64], sizes = [2, 32], strides = [1, 1]} : vector<2x128xf32> to vector<2x32xf32>
    %569 = vector.extract_strided_slice %564 {offsets = [0, 96], sizes = [2, 32], strides = [1, 1]} : vector<2x128xf32> to vector<2x32xf32>
    %570 = arith.mulf %567, %532 : vector<2x32xf32>
    %571 = arith.mulf %566, %568 : vector<2x32xf32>
    %572 = arith.addf %570, %571 : vector<2x32xf32>
    %573 = math.tanh %572 : vector<2x32xf32>
    %574 = arith.mulf %569, %573 : vector<2x32xf32>
    %575 = arith.maximumf %535, %556 : vector<2x32xf32>
    %576 = arith.maximumf %536, %574 : vector<2x32xf32>
    %577 = arith.addf %537, %556 : vector<2x32xf32>
    %578 = arith.addf %538, %574 : vector<2x32xf32>
    %579 = vector.extract_strided_slice %327 {offsets = [12, 0], sizes = [2, 128], strides = [1, 1]} : vector<16x128xf32> to vector<2x128xf32>
    %cst_121 = arith.constant dense<0.000000e+00> : vector<2x128xf32>
    %580 = tpu.matmul %556, %336, %cst_121 {dimension_numbers = #tpu.dot_dimension_numbers<[1], [0], [0], [1], [0, 0, 1, 1], [], []>} : vector<2x32xf32>, vector<32x128xf32>, vector<2x128xf32> -> vector<2x128xf32>
    %581 = arith.addf %579, %580 : vector<2x128xf32>
    %582 = arith.negf %581 : vector<2x128xf32>
    %583 = math.exp %582 : vector<2x128xf32>
    %cst_122 = arith.constant 1.000000e+00 : f32
    %584 = vector.broadcast %cst_122 : f32 to vector<2x128xf32>
    %585 = arith.addf %584, %583 : vector<2x128xf32>
    %586 = arith.divf %584, %585 : vector<2x128xf32>
    %587 = math.tanh %581 : vector<2x128xf32>
    %588 = vector.extract_strided_slice %586 {offsets = [0, 0], sizes = [2, 32], strides = [1, 1]} : vector<2x128xf32> to vector<2x32xf32>
    %589 = vector.extract_strided_slice %586 {offsets = [0, 32], sizes = [2, 32], strides = [1, 1]} : vector<2x128xf32> to vector<2x32xf32>
    %590 = vector.extract_strided_slice %587 {offsets = [0, 64], sizes = [2, 32], strides = [1, 1]} : vector<2x128xf32> to vector<2x32xf32>
    %591 = vector.extract_strided_slice %586 {offsets = [0, 96], sizes = [2, 32], strides = [1, 1]} : vector<2x128xf32> to vector<2x32xf32>
    %592 = arith.mulf %589, %554 : vector<2x32xf32>
    %593 = arith.mulf %588, %590 : vector<2x32xf32>
    %594 = arith.addf %592, %593 : vector<2x32xf32>
    %595 = math.tanh %594 : vector<2x32xf32>
    %596 = arith.mulf %591, %595 : vector<2x32xf32>
    %597 = vector.extract_strided_slice %335 {offsets = [2, 0], sizes = [2, 128], strides = [1, 1]} : vector<16x128xf32> to vector<2x128xf32>
    %cst_123 = arith.constant dense<0.000000e+00> : vector<2x128xf32>
    %598 = tpu.matmul %574, %337, %cst_123 {dimension_numbers = #tpu.dot_dimension_numbers<[1], [0], [0], [1], [0, 0, 1, 1], [], []>} : vector<2x32xf32>, vector<32x128xf32>, vector<2x128xf32> -> vector<2x128xf32>
    %599 = arith.addf %597, %598 : vector<2x128xf32>
    %600 = arith.negf %599 : vector<2x128xf32>
    %601 = math.exp %600 : vector<2x128xf32>
    %cst_124 = arith.constant 1.000000e+00 : f32
    %602 = vector.broadcast %cst_124 : f32 to vector<2x128xf32>
    %603 = arith.addf %602, %601 : vector<2x128xf32>
    %604 = arith.divf %602, %603 : vector<2x128xf32>
    %605 = math.tanh %599 : vector<2x128xf32>
    %606 = vector.extract_strided_slice %604 {offsets = [0, 0], sizes = [2, 32], strides = [1, 1]} : vector<2x128xf32> to vector<2x32xf32>
    %607 = vector.extract_strided_slice %604 {offsets = [0, 32], sizes = [2, 32], strides = [1, 1]} : vector<2x128xf32> to vector<2x32xf32>
    %608 = vector.extract_strided_slice %605 {offsets = [0, 64], sizes = [2, 32], strides = [1, 1]} : vector<2x128xf32> to vector<2x32xf32>
    %609 = vector.extract_strided_slice %604 {offsets = [0, 96], sizes = [2, 32], strides = [1, 1]} : vector<2x128xf32> to vector<2x32xf32>
    %610 = arith.mulf %607, %572 : vector<2x32xf32>
    %611 = arith.mulf %606, %608 : vector<2x32xf32>
    %612 = arith.addf %610, %611 : vector<2x32xf32>
    %613 = math.tanh %612 : vector<2x32xf32>
    %614 = arith.mulf %609, %613 : vector<2x32xf32>
    %615 = arith.maximumf %575, %596 : vector<2x32xf32>
    %616 = arith.maximumf %576, %614 : vector<2x32xf32>
    %617 = arith.addf %577, %596 : vector<2x32xf32>
    %618 = arith.addf %578, %614 : vector<2x32xf32>
    %619 = vector.extract_strided_slice %327 {offsets = [14, 0], sizes = [2, 128], strides = [1, 1]} : vector<16x128xf32> to vector<2x128xf32>
    %cst_125 = arith.constant dense<0.000000e+00> : vector<2x128xf32>
    %620 = tpu.matmul %596, %336, %cst_125 {dimension_numbers = #tpu.dot_dimension_numbers<[1], [0], [0], [1], [0, 0, 1, 1], [], []>} : vector<2x32xf32>, vector<32x128xf32>, vector<2x128xf32> -> vector<2x128xf32>
    %621 = arith.addf %619, %620 : vector<2x128xf32>
    %622 = arith.negf %621 : vector<2x128xf32>
    %623 = math.exp %622 : vector<2x128xf32>
    %cst_126 = arith.constant 1.000000e+00 : f32
    %624 = vector.broadcast %cst_126 : f32 to vector<2x128xf32>
    %625 = arith.addf %624, %623 : vector<2x128xf32>
    %626 = arith.divf %624, %625 : vector<2x128xf32>
    %627 = math.tanh %621 : vector<2x128xf32>
    %628 = vector.extract_strided_slice %626 {offsets = [0, 0], sizes = [2, 32], strides = [1, 1]} : vector<2x128xf32> to vector<2x32xf32>
    %629 = vector.extract_strided_slice %626 {offsets = [0, 32], sizes = [2, 32], strides = [1, 1]} : vector<2x128xf32> to vector<2x32xf32>
    %630 = vector.extract_strided_slice %627 {offsets = [0, 64], sizes = [2, 32], strides = [1, 1]} : vector<2x128xf32> to vector<2x32xf32>
    %631 = vector.extract_strided_slice %626 {offsets = [0, 96], sizes = [2, 32], strides = [1, 1]} : vector<2x128xf32> to vector<2x32xf32>
    %632 = arith.mulf %629, %594 : vector<2x32xf32>
    %633 = arith.mulf %628, %630 : vector<2x32xf32>
    %634 = arith.addf %632, %633 : vector<2x32xf32>
    %635 = math.tanh %634 : vector<2x32xf32>
    %636 = arith.mulf %631, %635 : vector<2x32xf32>
    %637 = vector.extract_strided_slice %335 {offsets = [0, 0], sizes = [2, 128], strides = [1, 1]} : vector<16x128xf32> to vector<2x128xf32>
    %cst_127 = arith.constant dense<0.000000e+00> : vector<2x128xf32>
    %638 = tpu.matmul %614, %337, %cst_127 {dimension_numbers = #tpu.dot_dimension_numbers<[1], [0], [0], [1], [0, 0, 1, 1], [], []>} : vector<2x32xf32>, vector<32x128xf32>, vector<2x128xf32> -> vector<2x128xf32>
    %639 = arith.addf %637, %638 : vector<2x128xf32>
    %640 = arith.negf %639 : vector<2x128xf32>
    %641 = math.exp %640 : vector<2x128xf32>
    %cst_128 = arith.constant 1.000000e+00 : f32
    %642 = vector.broadcast %cst_128 : f32 to vector<2x128xf32>
    %643 = arith.addf %642, %641 : vector<2x128xf32>
    %644 = arith.divf %642, %643 : vector<2x128xf32>
    %645 = math.tanh %639 : vector<2x128xf32>
    %646 = vector.extract_strided_slice %644 {offsets = [0, 0], sizes = [2, 32], strides = [1, 1]} : vector<2x128xf32> to vector<2x32xf32>
    %647 = vector.extract_strided_slice %644 {offsets = [0, 32], sizes = [2, 32], strides = [1, 1]} : vector<2x128xf32> to vector<2x32xf32>
    %648 = vector.extract_strided_slice %645 {offsets = [0, 64], sizes = [2, 32], strides = [1, 1]} : vector<2x128xf32> to vector<2x32xf32>
    %649 = vector.extract_strided_slice %644 {offsets = [0, 96], sizes = [2, 32], strides = [1, 1]} : vector<2x128xf32> to vector<2x32xf32>
    %650 = arith.mulf %647, %612 : vector<2x32xf32>
    %651 = arith.mulf %646, %648 : vector<2x32xf32>
    %652 = arith.addf %650, %651 : vector<2x32xf32>
    %653 = math.tanh %652 : vector<2x32xf32>
    %654 = arith.mulf %649, %653 : vector<2x32xf32>
    %655 = arith.maximumf %615, %636 : vector<2x32xf32>
    %656 = arith.maximumf %616, %654 : vector<2x32xf32>
    %657 = arith.addf %617, %636 : vector<2x32xf32>
    %658 = arith.addf %618, %654 : vector<2x32xf32>
    %cst_129 = arith.constant 1.250000e-01 : f32
    %659 = vector.broadcast %cst_129 : f32 to vector<2x32xf32>
    %660 = arith.mulf %657, %659 : vector<2x32xf32>
    %cst_130 = arith.constant 1.250000e-01 : f32
    %661 = vector.broadcast %cst_130 : f32 to vector<2x32xf32>
    %662 = arith.mulf %658, %661 : vector<2x32xf32>
    %663 = tpu.concatenate %655, %656, %660, %662 in 1 : vector<2x32xf32>, vector<2x32xf32>, vector<2x32xf32>, vector<2x32xf32> -> vector<2x128xf32>
    %c0_131 = arith.constant 0 : index
    %c0_132 = arith.constant 0 : index
    %664 = vector.load %arg15[%c0_131, %c0_132] : memref<128x128xf32, #tpu.memory_space<vmem>>, vector<128x128xf32>
    %cst_133 = arith.constant dense<0.000000e+00> : vector<2x128xf32>
    %665 = tpu.matmul %663, %664, %cst_133 {dimension_numbers = #tpu.dot_dimension_numbers<[1], [0], [0], [1], [0, 0, 1, 1], [], []>} : vector<2x128xf32>, vector<128x128xf32>, vector<2x128xf32> -> vector<2x128xf32>
    %c0_134 = arith.constant 0 : index
    %c0_135 = arith.constant 0 : index
    %666 = vector.load %arg16[%c0_134, %c0_135] : memref<1x128xf32, #tpu.memory_space<vmem>>, vector<1x128xf32>
    %667 = vector.broadcast %666 : vector<1x128xf32> to vector<2x128xf32>
    %668 = arith.addf %665, %667 : vector<2x128xf32>
    %cst_136 = arith.constant 0.000000e+00 : f32
    %669 = vector.broadcast %cst_136 : f32 to vector<2x128xf32>
    %670 = arith.maximumf %668, %669 : vector<2x128xf32>
    %c0_137 = arith.constant 0 : index
    %c0_138 = arith.constant 0 : index
    %671 = vector.load %arg17[%c0_137, %c0_138] : memref<128x128xf32, #tpu.memory_space<vmem>>, vector<128x128xf32>
    %cst_139 = arith.constant dense<0.000000e+00> : vector<2x128xf32>
    %672 = tpu.matmul %663, %671, %cst_139 {dimension_numbers = #tpu.dot_dimension_numbers<[1], [0], [0], [1], [0, 0, 1, 1], [], []>} : vector<2x128xf32>, vector<128x128xf32>, vector<2x128xf32> -> vector<2x128xf32>
    %c0_140 = arith.constant 0 : index
    %c0_141 = arith.constant 0 : index
    %673 = vector.load %arg18[%c0_140, %c0_141] : memref<1x128xf32, #tpu.memory_space<vmem>>, vector<1x128xf32>
    %674 = vector.broadcast %673 : vector<1x128xf32> to vector<2x128xf32>
    %675 = arith.addf %672, %674 : vector<2x128xf32>
    %cst_142 = arith.constant 0.000000e+00 : f32
    %676 = vector.broadcast %cst_142 : f32 to vector<2x128xf32>
    %677 = arith.maximumf %675, %676 : vector<2x128xf32>
    %678 = arith.addf %663, %670 : vector<2x128xf32>
    %679 = arith.addf %678, %677 : vector<2x128xf32>
    %c0_143 = arith.constant 0 : index
    %c0_144 = arith.constant 0 : index
    %680 = vector.load %arg19[%c0_143, %c0_144] : memref<128x1xf32, #tpu.memory_space<vmem>>, vector<128x1xf32>
    %cst_145 = arith.constant dense<0.000000e+00> : vector<2x1xf32>
    %681 = tpu.matmul %679, %680, %cst_145 {dimension_numbers = #tpu.dot_dimension_numbers<[1], [0], [0], [1], [0, 0, 1, 1], [], []>} : vector<2x128xf32>, vector<128x1xf32>, vector<2x1xf32> -> vector<2x1xf32>
    %c0_146 = arith.constant 0 : index
    %c0_147 = arith.constant 0 : index
    %682 = vector.load %arg20[%c0_146, %c0_147] : memref<1x1xf32, #tpu.memory_space<vmem>>, vector<1x1xf32>
    %683 = vector.broadcast %682 : vector<1x1xf32> to vector<2x1xf32>
    %684 = arith.addf %681, %683 : vector<2x1xf32>
    %c0_148 = arith.constant 0 : index
    %c0_149 = arith.constant 0 : index
    %685 = vector.load %arg21[%c0_148, %c0_149] : memref<2x1xf32, #tpu.memory_space<vmem>>, vector<2x1xf32>
    tpu.vector_store %arg21[%c0_148, %c0_149], %684 {strides = array<i32>} : memref<2x1xf32, #tpu.memory_space<vmem>>, vector<2x1xf32>,
    return
  }
}

</mosaic_0001>

<bundles_post_ra>
// kernel: toxicity_forward.1
= control target key start
LH: loop header
LB: loop body
LE: loop exit
PB: predicated region body
PF: predicated region fallthrough
CT: control target
= control target key end

     0   :  { %s4542_s0 = inlined_call_operand.vmem [shape: f32[16,16], index: 0, kind: input, shape index: {}]   ;;  %s4543_s1 = inlined_call_operand.vmem [shape: f32[16,128], index: 1, kind: input, shape index: {}]   ;;  %s4544_s2 = inlined_call_operand.hbm [shape: f32[16,128], index: 2, kind: input, shape index: {}]   ;;  %s4545_s3 = inlined_call_operand.vmem [shape: f32[32,128], index: 3, kind: input, shape index: {}]   ;;  %s4546_s4 = inlined_call_operand.vmem [shape: f32[32,128], index: 4, kind: input, shape index: {}]   ;;  %s4547_s5 = inlined_call_operand.vmem [shape: f32[1,128], index: 5, kind: input, shape index: {}]   ;;  %s4548_s6 = inlined_call_operand.hbm [shape: f32[1,128], index: 6, kind: input, shape index: {}]   ;;  %s4549_s7 = inlined_call_operand.vmem [shape: f32[32,128], index: 7, kind: input, shape index: {}]   ;;  %s4550_s8 = inlined_call_operand.hbm [shape: f32[32,128], index: 8, kind: input, shape index: {}]   ;;  %s4551_s9 = inlined_call_operand.hbm [shape: f32[32,128], index: 9, kind: input, shape index: {}]   ;;  %s4552_s10 = inlined_call_operand.hbm [shape: f32[32,128], index: 10, kind: input, shape index: {}]   ;;  %s4553_s11 = inlined_call_operand.hbm [shape: f32[32,128], index: 11, kind: input, shape index: {}]   ;;  %s4554_s12 = inlined_call_operand.hbm [shape: f32[32,128], index: 12, kind: input, shape index: {}]   ;;  %s4555_s13 = inlined_call_operand.hbm [shape: f32[1,128], index: 13, kind: input, shape index: {}]   ;;  %s4556_s14 = inlined_call_operand.hbm [shape: f32[1,128], index: 14, kind: input, shape index: {}]   ;;  %s4557_s15 = inlined_call_operand.vmem [shape: f32[128,128], index: 15, kind: input, shape index: {}]   ;;  %s4558_s16 = inlined_call_operand.hbm [shape: f32[1,128], index: 16, kind: input, shape index: {}]   ;;  %s4559_s17 = inlined_call_operand.vmem [shape: f32[128,128], index: 17, kind: input, shape index: {}]   ;;  %s4560_s18 = inlined_call_operand.vmem [shape: f32[1,128], index: 18, kind: input, shape index: {}]   ;;  %s4561_s19 = inlined_call_operand.vmem [shape: f32[128,1], index: 19, kind: input, shape index: {}]   ;;  %s4562_s20 = inlined_call_operand.<no memory space> [shape: f32[1,1], index: 20, kind: input, shape index: {}]   ;;  %s4563_s21 = inlined_call_operand.vmem [shape: f32[2,1], index: 21, kind: output, shape index: {}]  }
   0x1   :  { %4568 = sst [smem:[#allocation27_spill]] %s4542_s0  ;;  %v26_v0 = vstv %s4562_s20 }
   0x2   :  { %4569 = sst [smem:[#allocation28_spill]] %s4543_s1  ;;  %27 = vst [vmem:[#allocation4] sm:$0x1] %v26_v0 }
   0x3   :  { %4570 = sst [smem:[#allocation29_spill]] %s4544_s2 }
   0x4   :  { %4571 = sst [smem:[#allocation30_spill]] %s4545_s3 }
   0x5   :  { %4572 = sst [smem:[#allocation31_spill]] %s4546_s4 }
   0x6   :  { %4573 = sst [smem:[#allocation32_spill]] %s4547_s5 }
   0x7   :  { %28 = vsyncpa [#allocation6], 0 }
   0x8   :  { %29 = vsyncpa [#allocation8], 0 }
   0x9   :  { %30 = vsyncpa [#allocation11], 0 }
   0xa   :  { %31 = vsyncpa [#allocation14], 0 }
   0xb   :  { %32 = vsyncpa [#allocation17], 0  ;;  %s62_s3 = sshll.u32 %s4548_s6, 4  ;;  %s63_s3 = int_to_ptr.hbm [resolvable:$true] %s62_s3 }
   0xc   :  { %33 = vsyncpa [#allocation20], 0  ;;  %s3496_s28 = smov [#allocation7]   ;;  %s87_s20 = sshll.u32 %s4551_s9, 4  ;;  %s88_s20 = int_to_ptr.hbm [resolvable:$true] %s87_s20 }
   0xd   :  { %s64_s29 = sshll.u32 %s3496_s28, 4  ;;  %s3497_s30 = smov [#allocation10]   ;;  %s65_s29 = int_to_ptr.vmem [resolvable:$true] %s64_s29 }
   0xe   :  { %67 = dma.hbm_to_vmem [thread:$0]  %s63_s3, 16, %s65_s29, [#allocation8]  }
   0xf   :  { %s89_s5 = sshll.u32 %s3497_s30, 4  ;;  %s113_s1 = sshll.u32 %s4553_s11, 4  ;;  %s90_s5 = int_to_ptr.vmem [resolvable:$true] %s89_s5  ;;  %s114_s1 = int_to_ptr.hbm [resolvable:$true] %s113_s1 }
  0x10   :  { %s3498_s6 = smov 128   ;;  %s3499_s24 = smov 8  }
  0x11   :  { %95 = dma.hbm_to_vmem [thread:$0]  %s88_s20, 512, %s90_s5, [#allocation11], %s3498_s6, %s3498_s6, %s3499_s24  }
  0x12   :  { %s140_s26 = sshll.u32 %s4555_s13, 4  ;;  %s3500_s9 = smov [#allocation13]   ;;  %s141_s26 = int_to_ptr.hbm [resolvable:$true] %s140_s26 }
  0x13   :  { %s115_s27 = sshll.u32 %s3500_s9, 4  ;;  %s3501_s11 = smov [#allocation16]   ;;  %s116_s27 = int_to_ptr.vmem [resolvable:$true] %s115_s27 }
  0x14   :  { %121 = dma.hbm_to_vmem [thread:$0]  %s114_s1, 512, %s116_s27, [#allocation14], %s3498_s6, %s3498_s6, %s3499_s24  }
  0x15   :  { %s142_s3 = sshll.u32 %s3501_s11, 4  ;;  %s4574_s0 = sld [smem:[#allocation29_spill]]  ;;  %s143_s3 = int_to_ptr.vmem [resolvable:$true] %s142_s3 }
  0x16   :  { %145 = dma.hbm_to_vmem [thread:$0]  %s141_s26, 16, %s143_s3, [#allocation17]  }
  0x17   :  { %s74_s13 = sshll.u32 %s4550_s8, 4  ;;  %s3502_s5 = smov [#allocation5]   ;;  %s75_s13 = int_to_ptr.hbm [resolvable:$true] %s74_s13 }
  0x18   :  { %s44_s22 = sshll.u32 %s3502_s5, 4  ;;  %s3503_s23 = smov [#allocation9]   ;;  %s45_s22 = int_to_ptr.vmem [resolvable:$true] %s44_s22 }
  0x19   :  { %s76_s1 = sshll.u32 %s3503_s23, 4  ;;  %s100_s9 = sshll.u32 %s4552_s10, 4  ;;  %s77_s1 = int_to_ptr.vmem [resolvable:$true] %s76_s1  ;;  %s101_s9 = int_to_ptr.hbm [resolvable:$true] %s100_s9 }
  0x1a   :  { %82 = dma.hbm_to_vmem [thread:$0]  %s75_s13, 512, %s77_s1, [#allocation8], %s3498_s6, %s3498_s6, %s3499_s24  }
  0x1b   :  { %s42_s4 = sshll.u32 %s4574_s0, 4  ;;  %s126_s27 = sshll.u32 %s4554_s12, 4  ;;  %s43_s4 = int_to_ptr.hbm [resolvable:$true] %s42_s4  ;;  %s127_s27 = int_to_ptr.hbm [resolvable:$true] %s126_s27 }
  0x1c   :  { %50 = dma.hbm_to_vmem [thread:$0]  %s43_s4, 256, %s45_s22, [#allocation6], %s3498_s6, %s3498_s6, %s3499_s24  }
  0x1d   :  { %s3504_s11 = smov [#allocation12]   ;;  %s3505_s28 = smov [#allocation15]  }
  0x1e   :  { %s102_s3 = sshll.u32 %s3504_s11, 4  ;;  %s128_s10 = sshll.u32 %s3505_s28, 4  ;;  %s103_s3 = int_to_ptr.vmem [resolvable:$true] %s102_s3  ;;  %s129_s10 = int_to_ptr.vmem [resolvable:$true] %s128_s10 }
  0x1f   :  { %108 = dma.hbm_to_vmem [thread:$0]  %s101_s9, 512, %s103_s3, [#allocation11], %s3498_s6, %s3498_s6, %s3499_s24  }
  0x20   :  { %s151_s4 = sshll.u32 %s4556_s14, 4  ;;  %s164_s30 = sshll.u32 %s4558_s16, 4  ;;  %s152_s4 = int_to_ptr.hbm [resolvable:$true] %s151_s4  ;;  %s165_s30 = int_to_ptr.hbm [resolvable:$true] %s164_s30 }
  0x21   :  { %134 = dma.hbm_to_vmem [thread:$0]  %s127_s27, 512, %s129_s10, [#allocation14], %s3498_s6, %s3498_s6, %s3499_s24  }
  0x22   :  { %s3506_s13 = smov [#allocation18]   ;;  %s3507_s22 = smov [#allocation19]  }
  0x23   :  { %s153_s5 = sshll.u32 %s3506_s13, 4  ;;  %s166_s23 = sshll.u32 %s3507_s22, 4  ;;  %s154_s5 = int_to_ptr.vmem [resolvable:$true] %s153_s5  ;;  %s167_s23 = int_to_ptr.vmem [resolvable:$true] %s166_s23 }
  0x24   :  { %156 = dma.hbm_to_vmem [thread:$0]  %s152_s4, 16, %s154_s5, [#allocation17]  }
  0x25   :  { %169 = dma.hbm_to_vmem [thread:$0]  %s165_s30, 16, %s167_s23, [#allocation20]  }
  0x26   :  { %3484 = dma.done.wait [#allocation6], 256  }
  0x27   :  { %3485 = vsyncadd [#allocation6], 4294967040 }
  0x28   :  { %3486 = dma.done.wait [#allocation8], 528  }
  0x29   :  { %3487 = vsyncadd [#allocation8], 4294966768 }
  0x2a   :  { %3488 = dma.done.wait [#allocation11], 1024  }
  0x2b   :  { %3489 = vsyncadd [#allocation11], 4294966272 }
  0x2c   :  { %3490 = dma.done.wait [#allocation14], 1024  }
  0x2d   :  { %3491 = vsyncadd [#allocation14], 4294966272 }
  0x2e   :  { %3492 = dma.done.wait [#allocation17], 32  }
  0x2f   :  { %3493 = vsyncadd [#allocation17], 4294967264 }
  0x30   :  { %3494 = dma.done.wait [#allocation20], 16  }
  0x31   :  { %3495 = vsyncadd [#allocation20], 4294967280  ;;  %v257_v1 = vld [vmem:[#allocation5 + $0x8] sm:$0xff]  ;;  %v256_v2 = vld [vmem:[#allocation5] sm:$0xff]  ;;  %s4575_s6 = sld [smem:[#allocation27_spill]]  ;;  %vm226_vm0 = vcmask 130048  }
  0x32   :  { %2963 = vmatpush.msra.mxu3 %v257_v1  ;;  %276 = vmatpush.msra.mxu1 %v257_v1  ;;  %s4576_s2 = sld [smem:[#allocation31_spill]]  ;;  %v3508_v15 = vmov 0.0   ;;  %v3776_v20 = vld [vmem:[#allocation7] ss:$0 sm:$0xff]  ;;  %s3509_s25 = smov 64   ;;  %vm293_vm9 = vcmask 261120  }
  0x33   :  { %s4577_s8 = sld [smem:[#allocation28_spill]]  ;;  %s3510_s9 = smov 32   ;;  %vm420_vm10 = vcmask 254976  }
  0x34   :  { %2964 = vmatpush.msra.mxu3 %v256_v2  ;;  %s4578_s4 = sld [smem:[#allocation30_spill]]  ;;  %277 = vmatpush.msra.mxu1 %v256_v2 }
  0x37   :  { %v219_v3 = vld [vmem:[%s4575_s6 + $0x8] sm:$0xff]  ;;  %v218_v11 = vld [vmem:[%s4575_s6] sm:$0xff] }
  0x38   :  { %v3679_v4 = vld [vmem:[%s4576_s2 + $0x18] sm:$0xff]  ;;  %v3690_v7 = vld [vmem:[%s4576_s2 + $0x10] sm:$0xff]  ;;  %2892 = vmatmul.msk.f32.vlgmr.msra.gmra.mxu3 %vm226_vm0, %v219_v3  ;;  %v3696_v8 = vld [vmem:[%s4576_s2 + $0x8] sm:$0xff]  ;;  %2891 = vmatmul.msk.f32.vlgmr.msra.gmra.mxu1 %vm226_vm0, %v218_v11 }
  0x39   :  { %v221_v5 = vld [vmem:[%s4577_s8 + $0x8] sm:$0xff]  ;;  %v220_v6 = vld [vmem:[%s4577_s8] sm:$0xff]  ;;  %367 = vmatpush.msrb.mxu3 %v3679_v4  ;;  %661 = vmatpush.msrb.mxu1 %v3679_v4 }
  0x3a   :  { %2961 = vmatpush.msra.mxu2 %v221_v5  ;;  %v3701_v9 = vld [vmem:[%s4578_s4 + $0x18] sm:$0xff]  ;;  %v3706_v10 = vld [vmem:[%s4578_s4 + $0x10] sm:$0xff]  ;;  %247 = vmatpush.msra.mxu0 %v221_v5  ;;  %v3718_v12 = vld [vmem:[%s4576_s2] sm:$0xff]  ;;  %s4579_s2 = sld [smem:[#allocation32_spill]] }
  0x3b   :  { %368 = vmatpush.msrb.mxu3 %v3690_v7  ;;  %v3723_v13 = vld [vmem:[%s4578_s4 + $0x8] sm:$0xff]  ;;  %v3731_v14 = vld [vmem:[%s4578_s4] sm:$0xff]  ;;  %662 = vmatpush.msrb.mxu1 %v3690_v7 }
  0x3c   :  { %2962 = vmatpush.msra.mxu2 %v220_v6  ;;  %248 = vmatpush.msra.mxu0 %v220_v6 }
  0x3d   :  { %2890 = vmatmul.msk.f32.vlgmr.msra.gmra.mxu2 %vm226_vm0, %v219_v3  ;;  %2889 = vmatmul.msk.f32.vlgmr.msra.gmra.mxu0 %vm226_vm0, %v218_v11 }
  0x3e   :  { %309 = vmatpush.msrb.mxu2 %v3701_v9  ;;  %369 = vmatpush.msrb.mxu3 %v3696_v8 }
  0x3f   :  { %592 = vmatpush.msrb.mxu0 %v3701_v9  ;;  %663 = vmatpush.msrb.mxu1 %v3696_v8 }
  0x40   :  { %310 = vmatpush.msrb.mxu2 %v3706_v10  ;;  %370 = vmatpush.msrb.mxu3 %v3718_v12  ;;  %v2982_v17 = vld [vmem:[%s4579_s2] ss:$0 sm:$0xff] }
  0x41   :  { %371 = vmatmul.f32.vlgmr.msrb.gmra.mxu3 %v3508_v15  ;;  %593 = vmatpush.msrb.mxu0 %v3706_v10 }
  0x42   :  { %311 = vmatpush.msrb.mxu2 %v3723_v13  ;;  %511 = vmatpush.msra.mxu3 %v3679_v4 }
  0x43   :  { %664 = vmatpush.msrb.mxu1 %v3718_v12  ;;  %594 = vmatpush.msrb.mxu0 %v3723_v13 }
  0x44   :  { %312 = vmatpush.msrb.mxu2 %v3731_v14  ;;  %512 = vmatpush.msra.mxu3 %v3690_v7 }
  0x45   :  { %313 = vmatmul.f32.vlgmr.msrb.gmra.mxu2 %v3508_v15  ;;  %595 = vmatpush.msrb.mxu0 %v3731_v14 }
  0x46   :  { %442 = vmatpush.msra.mxu2 %v3701_v9  ;;  %513 = vmatpush.msra.mxu3 %v3696_v8 }
  0x47   :  { %948 = vmatpush.msra.mxu1 %v3679_v4  ;;  %885 = vmatpush.msra.mxu0 %v3701_v9 }
  0x48   :  { %443 = vmatpush.msra.mxu2 %v3706_v10  ;;  %514 = vmatpush.msra.mxu3 %v3718_v12 }
  0x49   :  { %949 = vmatpush.msra.mxu1 %v3690_v7  ;;  %886 = vmatpush.msra.mxu0 %v3706_v10 }
  0x4a   :  { %444 = vmatpush.msra.mxu2 %v3723_v13  ;;  %809 = vmatpush.msrb.mxu3 %v3679_v4 }
  0x4b   :  { %950 = vmatpush.msra.mxu1 %v3696_v8  ;;  %887 = vmatpush.msra.mxu0 %v3723_v13 }
  0x4c   :  { %445 = vmatpush.msra.mxu2 %v3731_v14  ;;  %810 = vmatpush.msrb.mxu3 %v3690_v7 }
  0x4d   :  { %951 = vmatpush.msra.mxu1 %v3718_v12  ;;  %888 = vmatpush.msra.mxu0 %v3731_v14 }
  0x4e   :  { %740 = vmatpush.msrb.mxu2 %v3701_v9  ;;  %811 = vmatpush.msrb.mxu3 %v3696_v8 }
  0x50   :  { %741 = vmatpush.msrb.mxu2 %v3706_v10  ;;  %812 = vmatpush.msrb.mxu3 %v3718_v12 }
  0x52   :  { %742 = vmatpush.msrb.mxu2 %v3723_v13 }
  0x54   :  { %743 = vmatpush.msrb.mxu2 %v3731_v14 }
  0xba   :  { %v250_v22 = vpop.f32.mrf.mxu0 }
  0xbb   :  { %v282_v16 = vpop.f32.mrf.mxu3  ;;  %v3782_v26 = vadd.f32 %v2982_v17, %v250_v22 }
  0xbc   :  { %v3779_v23 = vadd.f32 %v3776_v20, %v282_v16 }
  0xc0   :  { %v253_v18 = vpop.f32.mrf.mxu2 }
  0xc1   :  { %v3774_v19 = vadd.f32 %v2982_v17, %v253_v18 }
  0xc4   :  { %v372_v21 = vpop.f32.mrf.mxu3 }
  0xc5   :  { %v376_v24 = vrot.slane %v372_v21, 2 }
  0xc7   :  { %v378_v25 = vadd.f32 %v376_v24, %v3779_v23 }
  0xc8   :  { %v314_v27 = vpop.f32.mrf.mxu2 }
  0xc9   :  { %2988 = vtanh.f32 %v378_v25  ;;  %v317_v28 = vadd.f32 %v314_v27, %v3782_v26  ;;  %v2894_v31 = vmul.f32 -1.442695, %v378_v25 }
  0xcb   :  { %2990 = vtanh.f32 %v317_v28  ;;  %v2893_v32 = vmul.f32 -1.442695, %v317_v28 }
  0xcc   :  { %2992 = vpow2.f32 %v2894_v31 }
  0xcd   :  { %2994 = vpow2.f32 %v2893_v32 }
  0xcf   :  { %v2989_v29 = vpop.eup %2988 }
  0xd0   :  { %401 = vrot.lane.b32.xlu0 %v2989_v29, %s3509_s25 }
  0xd1   :  { %v2991_v30 = vpop.eup %2990 }
  0xd2   :  { %v2993_v33 = vpop.eup %2992 }
  0xd3   :  { %v382_v34 = vadd.f32 1.0, %v2993_v33  ;;  %v2995_v35 = vpop.eup %2994 }
  0xd4   :  { %v321_v36 = vadd.f32 1.0, %v2995_v35 }
  0xd5   :  { %2996 = vrcp.f32 %v382_v34  ;;  %v394_v45 = vand.u32 2147483648, %v382_v34  ;;  %vm388_vm2 = vweird.f32 %v382_v34  ;;  %v392_v46 = vand.u32 2147483647, %v382_v34 }
  0xd6   :  { %2998 = vrcp.f32 %v321_v36  ;;  %vm327_vm5 = vweird.f32 %v321_v36  ;;  %v333_v52 = vand.u32 2147483648, %v321_v36  ;;  %v331_v55 = vand.u32 2147483647, %v321_v36 }
  0xd7   :  { %v395_v49 = vor.u32 1.1754944e-38, %v394_v45  ;;  %vm393_vm4 = vcmp.eq.f32.partialorder %v392_v46, 8.507059e+37 }
  0xd8   :  { %340 = vrot.lane.b32.xlu0 %v2991_v30, %s3509_s25  ;;  %v334_v56 = vor.u32 1.1754944e-38, %v333_v52  ;;  %vm332_vm8 = vcmp.eq.f32.partialorder %v331_v55, 8.507059e+37 }
  0xdb   :  { %v2997_v37 = vpop.eup %2996 }
  0xdc   :  { %v384_v38 = vmul.f32 %v2997_v37, %v382_v34  ;;  %v2999_v40 = vpop.eup %2998  ;;  %vm389_vm1 = vweird.f32 %v2997_v37 }
  0xdd   :  { %v323_v42 = vmul.f32 %v2999_v40, %v321_v36  ;;  %vm390_vm3 = vmor %vm388_vm2, %vm389_vm1  ;;  %vm328_vm6 = vweird.f32 %v2999_v40 }
  0xde   :  { %v385_v39 = vsub.f32 1.0, %v384_v38  ;;  %vm329_vm7 = vmor %vm327_vm5, %vm328_vm6 }
  0xdf   :  { %v324_v44 = vsub.f32 1.0, %v323_v42 }
  0xe0   :  { %v386_v41 = vmul.f32 %v2997_v37, %v385_v39 }
  0xe1   :  { %v325_v48 = vmul.f32 %v2999_v40, %v324_v44 }
  0xe2   :  { %v387_v43 = vadd.f32 %v2997_v37, %v386_v41 }
  0xe3   :  { %v326_v54 = vadd.f32 %v2999_v40, %v325_v48 }
  0xe4   :  { %v391_v47 = vsel %vm390_vm3, %v2997_v37, %v387_v43 }
  0xe5   :  { %v396_v51 = vsel %vm393_vm4, %v395_v49, %v391_v47  ;;  %v330_v57 = vsel %vm329_vm7, %v2999_v40, %v326_v54 }
  0xe6   :  { %v335_v59 = vsel %vm332_vm8, %v334_v56, %v330_v57  ;;  %v399_v61 = vmul.f32 0.0, %v396_v51 }
  0xe7   :  { %v338_v0 = vmul.f32 0.0, %v335_v59 }
 0x142   :  { %v402_v50 = vpop.permute.xlu0 %401 }
 0x143   :  { %v404_v53 = vmul.f32 %v402_v50, %v396_v51 }
 0x145   :  { %406 = vrot.lane.b32.xlu1 %v404_v53, %s3510_s9 }
 0x14a   :  { %v341_v58 = vpop.permute.xlu0 %340 }
 0x14b   :  { %v343_v60 = vmul.f32 %v341_v58, %v335_v59 }
 0x14d   :  { %345 = vrot.lane.b32.xlu1 %v343_v60, %s3510_s9 }
 0x1b7   :  { %v407_v62 = vpop.permute.xlu1 %406 }
 0x1b8   :  { %v3789_v63 = vadd.f32 %v407_v62, %v399_v61 }
 0x1ba   :  { %3000 = vtanh.f32 %v3789_v63 }
 0x1bf   :  { %v346_v1 = vpop.permute.xlu1 %345 }
 0x1c0   :  { %v3001_v2 = vpop.eup %3000  ;;  %v3792_v3 = vadd.f32 %v346_v1, %v338_v0  ;;  %v544_v0 = vrot.slane %v3789_v63, 2 }
 0x1c1   :  { %412 = vrot.lane.b32.xlu2 %v3001_v2, %s3509_s25 }
 0x1c2   :  { %3002 = vtanh.f32 %v3792_v3 }
 0x1c8   :  { %v3003_v5 = vpop.eup %3002 }
 0x1c9   :  { %351 = vrot.lane.b32.xlu2 %v3003_v5, %s3509_s25 }
 0x21b   :  { %v413_v6 = vpop.permute.xlu2 %412 }
 0x21c   :  { %v3797_v11 = vmul.f32 %v413_v6, %v396_v51  ;;  %v475_v6 = vrot.slane %v3792_v3, 6 }
 0x21e   :  { %v494_v16 = vrot.slane %v3797_v11, 6 }
 0x220   :  { %495 = vrot.lane.b32.xlu0 %v494_v16, %s3510_s9 }
 0x223   :  { %v352_v17 = vpop.permute.xlu2 %351 }
 0x224   :  { %v354_v18 = vmul.f32 %v352_v17, %v335_v59 }
 0x226   :  { %417 = vrot.lane.b32.xlu1 %v354_v18, %s3510_s9 }
 0x292   :  { %v496_v21 = vpop.permute.xlu0 %495 }
 0x293   :  { %2897 = vmatmul.msk.f32.vlgmr.msra.gmra.mxu3 %vm293_vm9, %v496_v21 }
 0x294   :  { %1093 = vmatpush.msra.mxu3 %v3679_v4 }
 0x296   :  { %1094 = vmatpush.msra.mxu3 %v3690_v7 }
 0x298   :  { %v418_v22 = vpop.permute.xlu1 %417  ;;  %1095 = vmatpush.msra.mxu3 %v3696_v8 }
 0x299   :  { %421 = vst.msk [vmem:[#allocation2] sm:$0x3] %vm420_vm10, %v418_v22  ;;  %2895 = vmatmul.msk.f32.vlgmr.msra.gmra.mxu2 %vm293_vm9, %v418_v22 }
 0x29a   :  { %1096 = vmatpush.msra.mxu3 %v3718_v12  ;;  %1024 = vmatpush.msra.mxu2 %v3701_v9 }
 0x29c   :  { %1025 = vmatpush.msra.mxu2 %v3706_v10 }
 0x29e   :  { %1026 = vmatpush.msra.mxu2 %v3723_v13 }
 0x2a0   :  { %1027 = vmatpush.msra.mxu2 %v3731_v14 }
 0x316   :  { %v516_v24 = vpop.f32.mrf.mxu3 }
 0x317   :  { %v520_v25 = vrot.slane %v516_v24, 4 }
 0x319   :  { %v522_v27 = vadd.f32 %v520_v25, %v3779_v23 }
 0x31b   :  { %3004 = vtanh.f32 %v522_v27  ;;  %v2898_v33 = vmul.f32 -1.442695, %v522_v27 }
 0x31c   :  { %v447_v28 = vpop.f32.mrf.mxu2 }
 0x31d   :  { %v451_v29 = vrot.slane %v447_v28, 6 }
 0x31f   :  { %v453_v30 = vadd.f32 %v451_v29, %v3782_v26 }
 0x321   :  { %v3005_v31 = vpop.eup %3004  ;;  %3006 = vtanh.f32 %v453_v30  ;;  %v2896_v38 = vmul.f32 -1.442695, %v453_v30 }
 0x322   :  { %548 = vrot.lane.b32.xlu2 %v3005_v31, %s3509_s25  ;;  %3008 = vpow2.f32 %v2898_v33  ;;  %v3847_v31 = vpop.f32.mrf.mxu1 }
 0x327   :  { %v3007_v32 = vpop.eup %3006 }
 0x328   :  { %479 = vrot.lane.b32.xlu0 %v3007_v32, %s3509_s25  ;;  %v3009_v34 = vpop.eup %3008 }
 0x329   :  { %v526_v35 = vadd.f32 1.0, %v3009_v34 }
 0x32b   :  { %3010 = vrcp.f32 %v526_v35  ;;  %v538_v42 = vand.u32 2147483648, %v526_v35  ;;  %vm532_vm12 = vweird.f32 %v526_v35  ;;  %v536_v44 = vand.u32 2147483647, %v526_v35 }
 0x32c   :  { %3012 = vpow2.f32 %v2896_v38 }
 0x32d   :  { %v539_v47 = vor.u32 1.1754944e-38, %v538_v42  ;;  %vm537_vm14 = vcmp.eq.f32.partialorder %v536_v44, 8.507059e+37 }
 0x331   :  { %v3011_v36 = vpop.eup %3010 }
 0x332   :  { %v528_v37 = vmul.f32 %v3011_v36, %v526_v35  ;;  %vm533_vm11 = vweird.f32 %v3011_v36  ;;  %v3013_v43 = vpop.eup %3012 }
 0x333   :  { %vm534_vm13 = vmor %vm532_vm12, %vm533_vm11  ;;  %v457_v46 = vadd.f32 1.0, %v3013_v43 }
 0x334   :  { %v529_v39 = vsub.f32 1.0, %v528_v37 }
 0x335   :  { %3014 = vrcp.f32 %v457_v46  ;;  %v469_v56 = vand.u32 2147483648, %v457_v46  ;;  %vm463_vm0 = vweird.f32 %v457_v46  ;;  %v467_v57 = vand.u32 2147483647, %v457_v46 }
 0x336   :  { %v530_v40 = vmul.f32 %v3011_v36, %v529_v39 }
 0x337   :  { %v470_v59 = vor.u32 1.1754944e-38, %v469_v56  ;;  %vm468_vm2 = vcmp.eq.f32.partialorder %v467_v57, 8.507059e+37 }
 0x338   :  { %v531_v41 = vadd.f32 %v3011_v36, %v530_v40 }
 0x33a   :  { %v535_v45 = vsel %vm534_vm13, %v3011_v36, %v531_v41 }
 0x33b   :  { %v540_v48 = vsel %vm537_vm14, %v539_v47, %v535_v45  ;;  %v3015_v51 = vpop.eup %3014 }
 0x33c   :  { %v459_v52 = vmul.f32 %v3015_v51, %v457_v46  ;;  %vm464_vm15 = vweird.f32 %v3015_v51  ;;  %v546_v1 = vmul.f32 %v544_v0, %v540_v48 }
 0x33d   :  { %vm465_vm1 = vmor %vm463_vm0, %vm464_vm15 }
 0x33e   :  { %v460_v53 = vsub.f32 1.0, %v459_v52 }
 0x340   :  { %v461_v54 = vmul.f32 %v3015_v51, %v460_v53 }
 0x342   :  { %v462_v55 = vadd.f32 %v3015_v51, %v461_v54 }
 0x344   :  { %v466_v58 = vsel %vm465_vm1, %v3015_v51, %v462_v55 }
 0x345   :  { %v471_v61 = vsel %vm468_vm2, %v470_v59, %v466_v58 }
 0x346   :  { %v477_v16 = vmul.f32 %v475_v6, %v471_v61 }
 0x37c   :  { %v549_v49 = vpop.permute.xlu2 %548 }
 0x37d   :  { %v551_v50 = vmul.f32 %v549_v49, %v540_v48 }
 0x37f   :  { %553 = vrot.lane.b32.xlu1 %v551_v50, %s3510_s9 }
 0x39a   :  { %v480_v60 = vpop.permute.xlu0 %479 }
 0x39b   :  { %v482_v62 = vmul.f32 %v480_v60, %v471_v61 }
 0x39d   :  { %484 = vrot.lane.b32.xlu2 %v482_v62, %s3510_s9 }
 0x3f1   :  { %v554_v2 = vpop.permute.xlu1 %553 }
 0x3f2   :  { %v3820_v5 = vadd.f32 %v554_v2, %v546_v1 }
 0x3f4   :  { %3016 = vtanh.f32 %v3820_v5 }
 0x3f7   :  { %v485_v17 = vpop.permute.xlu2 %484 }
 0x3f8   :  { %v3824_v18 = vadd.f32 %v485_v17, %v477_v16 }
 0x3fa   :  { %v3017_v21 = vpop.eup %3016  ;;  %3018 = vtanh.f32 %v3824_v18 }
 0x3fb   :  { %559 = vrot.lane.b32.xlu0 %v3017_v21, %s3509_s25 }
 0x400   :  { %v3019_v22 = vpop.eup %3018 }
 0x401   :  { %490 = vrot.lane.b32.xlu1 %v3019_v22, %s3509_s25  ;;  %v694_v22 = vrot.slane %v3820_v5, 2 }
 0x46d   :  { %v560_v63 = vpop.permute.xlu0 %559 }
 0x46e   :  { %v3829_v24 = vmul.f32 %v560_v63, %v540_v48 }
 0x470   :  { %v644_v25 = vrot.slane %v3829_v24, 4 }
 0x472   :  { %645 = vrot.lane.b32.xlu2 %v644_v25, %s3510_s9 }
 0x473   :  { %v491_v3 = vpop.permute.xlu1 %490 }
 0x474   :  { %v3833_v27 = vmul.f32 %v491_v3, %v471_v61 }
 0x476   :  { %v575_v28 = vrot.slane %v3833_v27, 2 }
 0x478   :  { %576 = vrot.lane.b32.xlu0 %v575_v28, %s3510_s9  ;;  %v625_v28 = vrot.slane %v3824_v18, 6 }
 0x4cc   :  { %v646_v29 = vpop.permute.xlu2 %645 }
 0x4cd   :  { %2901 = vmatmul.msk.f32.vlgmr.msrb.gmra.mxu1 %vm293_vm9, %v646_v29 }
 0x4ce   :  { %1241 = vmatpush.msrb.mxu1 %v3679_v4 }
 0x4d0   :  { %1242 = vmatpush.msrb.mxu1 %v3690_v7 }
 0x4d2   :  { %1243 = vmatpush.msrb.mxu1 %v3696_v8 }
 0x4d4   :  { %1244 = vmatpush.msrb.mxu1 %v3718_v12 }
 0x4ea   :  { %v577_v30 = vpop.permute.xlu0 %576 }
 0x4eb   :  { %2899 = vmatmul.msk.f32.vlgmr.msrb.gmra.mxu0 %vm293_vm9, %v577_v30 }
 0x4ec   :  { %1172 = vmatpush.msrb.mxu0 %v3701_v9 }
 0x4ee   :  { %1173 = vmatpush.msrb.mxu0 %v3706_v10 }
 0x4f0   :  { %1174 = vmatpush.msrb.mxu0 %v3723_v13 }
 0x4f2   :  { %1175 = vmatpush.msrb.mxu0 %v3731_v14 }
 0x54a   :  { %v666_v32 = vpop.f32.mrf.mxu1 }
 0x54b   :  { %v670_v33 = vrot.slane %v666_v32, 6 }
 0x54d   :  { %v672_v34 = vadd.f32 %v670_v33, %v3779_v23 }
 0x54f   :  { %3020 = vtanh.f32 %v672_v34  ;;  %v2902_v40 = vmul.f32 -1.442695, %v672_v34 }
 0x555   :  { %v3021_v35 = vpop.eup %3020 }
 0x556   :  { %698 = vrot.lane.b32.xlu1 %v3021_v35, %s3509_s25 }
 0x568   :  { %v597_v36 = vpop.f32.mrf.mxu0 }
 0x569   :  { %v601_v37 = vrot.slane %v597_v36, 4 }
 0x56b   :  { %v603_v38 = vadd.f32 %v601_v37, %v3782_v26 }
 0x56d   :  { %3022 = vtanh.f32 %v603_v38  ;;  %v2900_v41 = vmul.f32 -1.442695, %v603_v38 }
 0x56e   :  { %3024 = vpow2.f32 %v2902_v40 }
 0x56f   :  { %3026 = vpow2.f32 %v2900_v41 }
 0x573   :  { %v3023_v39 = vpop.eup %3022 }
 0x574   :  { %629 = vrot.lane.b32.xlu2 %v3023_v39, %s3509_s25  ;;  %v3025_v42 = vpop.eup %3024 }
 0x575   :  { %v676_v43 = vadd.f32 1.0, %v3025_v42  ;;  %v3027_v44 = vpop.eup %3026 }
 0x576   :  { %v607_v45 = vadd.f32 1.0, %v3027_v44 }
 0x577   :  { %3028 = vrcp.f32 %v676_v43  ;;  %v688_v54 = vand.u32 2147483648, %v676_v43  ;;  %vm682_vm4 = vweird.f32 %v676_v43  ;;  %v686_v55 = vand.u32 2147483647, %v676_v43 }
 0x578   :  { %3030 = vrcp.f32 %v607_v45  ;;  %v619_v62 = vand.u32 2147483648, %v607_v45  ;;  %vm613_vm8 = vweird.f32 %v607_v45  ;;  %v617_v1 = vand.u32 2147483647, %v607_v45 }
 0x579   :  { %v689_v58 = vor.u32 1.1754944e-38, %v688_v54  ;;  %vm687_vm6 = vcmp.eq.f32.partialorder %v686_v55, 8.507059e+37 }
 0x57a   :  { %v620_v6 = vor.u32 1.1754944e-38, %v619_v62  ;;  %vm618_vm12 = vcmp.eq.f32.partialorder %v617_v1, 8.507059e+37 }
 0x57d   :  { %v3029_v46 = vpop.eup %3028 }
 0x57e   :  { %v678_v47 = vmul.f32 %v3029_v46, %v676_v43  ;;  %v3031_v48 = vpop.eup %3030  ;;  %vm683_vm3 = vweird.f32 %v3029_v46 }
 0x57f   :  { %v609_v50 = vmul.f32 %v3031_v48, %v607_v45  ;;  %vm684_vm5 = vmor %vm682_vm4, %vm683_vm3  ;;  %vm614_vm7 = vweird.f32 %v3031_v48 }
 0x580   :  { %v679_v49 = vsub.f32 1.0, %v678_v47  ;;  %vm615_vm11 = vmor %vm613_vm8, %vm614_vm7 }
 0x581   :  { %v610_v52 = vsub.f32 1.0, %v609_v50 }
 0x582   :  { %v680_v51 = vmul.f32 %v3029_v46, %v679_v49 }
 0x583   :  { %v611_v56 = vmul.f32 %v3031_v48, %v610_v52 }
 0x584   :  { %v681_v53 = vadd.f32 %v3029_v46, %v680_v51 }
 0x585   :  { %v612_v59 = vadd.f32 %v3031_v48, %v611_v56 }
 0x586   :  { %v685_v57 = vsel %vm684_vm5, %v3029_v46, %v681_v53 }
 0x587   :  { %v690_v61 = vsel %vm687_vm6, %v689_v58, %v685_v57  ;;  %v616_v2 = vsel %vm615_vm11, %v3031_v48, %v612_v59 }
 0x588   :  { %v621_v16 = vsel %vm618_vm12, %v620_v6, %v616_v2  ;;  %v696_v63 = vmul.f32 %v694_v22, %v690_v61 }
 0x589   :  { %v627_v29 = vmul.f32 %v625_v28, %v621_v16 }
 0x5c8   :  { %v699_v60 = vpop.permute.xlu1 %698 }
 0x5c9   :  { %v701_v0 = vmul.f32 %v699_v60, %v690_v61 }
 0x5cb   :  { %703 = vrot.lane.b32.xlu0 %v701_v0, %s3510_s9 }
 0x5ce   :  { %v630_v17 = vpop.permute.xlu2 %629 }
 0x5cf   :  { %v632_v21 = vmul.f32 %v630_v17, %v621_v16 }
 0x5d1   :  { %634 = vrot.lane.b32.xlu1 %v632_v21, %s3510_s9 }
 0x63d   :  { %v704_v25 = vpop.permute.xlu0 %703 }
 0x63e   :  { %v3856_v3 = vadd.f32 %v704_v25, %v696_v63 }
 0x640   :  { %3032 = vtanh.f32 %v3856_v3  ;;  %v839_v17 = vrot.slane %v3856_v3, 2 }
 0x643   :  { %v635_v30 = vpop.permute.xlu1 %634 }
 0x644   :  { %v3860_v32 = vadd.f32 %v635_v30, %v627_v29 }
 0x646   :  { %v3033_v33 = vpop.eup %3032  ;;  %3034 = vtanh.f32 %v3860_v32  ;;  %v773_v28 = vrot.slane %v3860_v32, 6 }
 0x647   :  { %709 = vrot.lane.b32.xlu2 %v3033_v33, %s3509_s25 }
 0x64c   :  { %v3035_v34 = vpop.eup %3034 }
 0x64d   :  { %640 = vrot.lane.b32.xlu0 %v3035_v34, %s3509_s25 }
 0x6a1   :  { %v710_v5 = vpop.permute.xlu2 %709 }
 0x6a2   :  { %v3865_v35 = vmul.f32 %v710_v5, %v690_v61 }
 0x6a4   :  { %v792_v36 = vrot.slane %v3865_v35, 2 }
 0x6a6   :  { %793 = vrot.lane.b32.xlu1 %v792_v36, %s3510_s9 }
 0x6bf   :  { %v641_v18 = vpop.permute.xlu0 %640 }
 0x6c0   :  { %v3869_v37 = vmul.f32 %v641_v18, %v621_v16 }
 0x6c2   :  { %v723_v38 = vrot.slane %v3869_v37, 4 }
 0x6c4   :  { %724 = vrot.lane.b32.xlu2 %v723_v38, %s3510_s9 }
 0x718   :  { %v794_v39 = vpop.permute.xlu1 %793 }
 0x719   :  { %2905 = vmatmul.msk.f32.vlgmr.msrb.gmra.mxu3 %vm293_vm9, %v794_v39 }
 0x71a   :  { %1389 = vmatpush.msrb.mxu3 %v3679_v4 }
 0x71c   :  { %1390 = vmatpush.msrb.mxu3 %v3690_v7 }
 0x71e   :  { %v725_v40 = vpop.permute.xlu2 %724  ;;  %1391 = vmatpush.msrb.mxu3 %v3696_v8 }
 0x71f   :  { %2903 = vmatmul.msk.f32.vlgmr.msrb.gmra.mxu2 %vm293_vm9, %v725_v40 }
 0x720   :  { %1392 = vmatpush.msrb.mxu3 %v3718_v12  ;;  %1320 = vmatpush.msrb.mxu2 %v3701_v9 }
 0x722   :  { %1321 = vmatpush.msrb.mxu2 %v3706_v10 }
 0x724   :  { %1322 = vmatpush.msrb.mxu2 %v3723_v13 }
 0x726   :  { %1323 = vmatpush.msrb.mxu2 %v3731_v14 }
 0x79c   :  { %v814_v41 = vpop.f32.mrf.mxu3 }
 0x79d   :  { %v817_v4 = vadd.f32 %v814_v41, %v3779_v23  ;;  %v3909_v41 = vadd.f32 %v3776_v20, %v3847_v31 }
 0x79f   :  { %3036 = vtanh.f32 %v817_v4  ;;  %v2906_v9 = vmul.f32 -1.442695, %v817_v4 }
 0x7a2   :  { %v745_v7 = vpop.f32.mrf.mxu2 }
 0x7a3   :  { %v749_v42 = vrot.slane %v745_v7, 2 }
 0x7a5   :  { %v3037_v43 = vpop.eup %3036  ;;  %v751_v8 = vadd.f32 %v749_v42, %v3782_v26 }
 0x7a6   :  { %843 = vrot.lane.b32.xlu0 %v3037_v43, %s3509_s25 }
 0x7a7   :  { %3038 = vtanh.f32 %v751_v8  ;;  %v2904_v10 = vmul.f32 -1.442695, %v751_v8 }
 0x7a8   :  { %3040 = vpow2.f32 %v2906_v9 }
 0x7a9   :  { %3042 = vpow2.f32 %v2904_v10 }
 0x7ad   :  { %v3039_v12 = vpop.eup %3038 }
 0x7ae   :  { %777 = vrot.lane.b32.xlu1 %v3039_v12, %s3509_s25  ;;  %v3041_v13 = vpop.eup %3040 }
 0x7af   :  { %v821_v14 = vadd.f32 1.0, %v3041_v13  ;;  %v3043_v23 = vpop.eup %3042 }
 0x7b0   :  { %v755_v44 = vadd.f32 1.0, %v3043_v23 }
 0x7b1   :  { %3044 = vrcp.f32 %v821_v14  ;;  %v833_v52 = vand.u32 2147483648, %v821_v14  ;;  %vm827_vm14 = vweird.f32 %v821_v14  ;;  %v831_v53 = vand.u32 2147483647, %v821_v14 }
 0x7b2   :  { %3046 = vrcp.f32 %v755_v44  ;;  %v767_v61 = vand.u32 2147483648, %v755_v44  ;;  %vm761_vm2 = vweird.f32 %v755_v44  ;;  %v765_v62 = vand.u32 2147483647, %v755_v44 }
 0x7b3   :  { %v834_v56 = vor.u32 1.1754944e-38, %v833_v52  ;;  %vm832_vm0 = vcmp.eq.f32.partialorder %v831_v53, 8.507059e+37 }
 0x7b4   :  { %v768_v1 = vor.u32 1.1754944e-38, %v767_v61  ;;  %vm766_vm4 = vcmp.eq.f32.partialorder %v765_v62, 8.507059e+37 }
 0x7b7   :  { %v3045_v45 = vpop.eup %3044 }
 0x7b8   :  { %v823_v46 = vmul.f32 %v3045_v45, %v821_v14  ;;  %v3047_v26 = vpop.eup %3046  ;;  %vm828_vm13 = vweird.f32 %v3045_v45 }
 0x7b9   :  { %v757_v49 = vmul.f32 %v3047_v26, %v755_v44  ;;  %vm829_vm15 = vmor %vm827_vm14, %vm828_vm13  ;;  %vm762_vm1 = vweird.f32 %v3047_v26 }
 0x7ba   :  { %v824_v47 = vsub.f32 1.0, %v823_v46  ;;  %vm763_vm3 = vmor %vm761_vm2, %vm762_vm1 }
 0x7bb   :  { %v758_v51 = vsub.f32 1.0, %v757_v49 }
 0x7bc   :  { %v825_v48 = vmul.f32 %v3045_v45, %v824_v47 }
 0x7bd   :  { %v759_v55 = vmul.f32 %v3047_v26, %v758_v51 }
 0x7be   :  { %v826_v50 = vadd.f32 %v3045_v45, %v825_v48 }
 0x7bf   :  { %v760_v60 = vadd.f32 %v3047_v26, %v759_v55 }
 0x7c0   :  { %v830_v54 = vsel %vm829_vm15, %v3045_v45, %v826_v50 }
 0x7c1   :  { %v835_v58 = vsel %vm832_vm0, %v834_v56, %v830_v54  ;;  %v764_v0 = vsel %vm763_vm3, %v3047_v26, %v760_v60 }
 0x7c2   :  { %v769_v6 = vsel %vm766_vm4, %v768_v1, %v764_v0  ;;  %v841_v21 = vmul.f32 %v839_v17, %v835_v58 }
 0x7c3   :  { %v775_v29 = vmul.f32 %v773_v28, %v769_v6 }
 0x818   :  { %v844_v57 = vpop.permute.xlu0 %843 }
 0x819   :  { %v846_v59 = vmul.f32 %v844_v57, %v835_v58 }
 0x81b   :  { %848 = vrot.lane.b32.xlu2 %v846_v59, %s3510_s9 }
 0x820   :  { %v778_v2 = vpop.permute.xlu1 %777 }
 0x821   :  { %v780_v16 = vmul.f32 %v778_v2, %v769_v6 }
 0x823   :  { %782 = vrot.lane.b32.xlu0 %v780_v16, %s3510_s9 }
 0x875   :  { %v849_v22 = vpop.permute.xlu2 %848 }
 0x876   :  { %v3890_v63 = vadd.f32 %v849_v22, %v841_v21 }
 0x878   :  { %3048 = vtanh.f32 %v3890_v63 }
 0x87e   :  { %v3049_v25 = vpop.eup %3048 }
 0x87f   :  { %854 = vrot.lane.b32.xlu1 %v3049_v25, %s3509_s25 }
 0x895   :  { %v783_v30 = vpop.permute.xlu0 %782 }
 0x896   :  { %v3895_v33 = vadd.f32 %v783_v30, %v775_v29 }
 0x898   :  { %3050 = vtanh.f32 %v3895_v33  ;;  %v915_v22 = vrot.slane %v3895_v33, 6 }
 0x89e   :  { %v3051_v34 = vpop.eup %3050 }
 0x89f   :  { %788 = vrot.lane.b32.xlu2 %v3051_v34, %s3509_s25 }
 0x8f1   :  { %v855_v3 = vpop.permute.xlu1 %854 }
 0x8f2   :  { %v857_v5 = vmul.f32 %v855_v3, %v835_v58 }
 0x8f4   :  { %864 = vrot.lane.b32.xlu0 %v857_v5, %s3510_s9 }
 0x8f9   :  { %v789_v36 = vpop.permute.xlu2 %788 }
 0x8fa   :  { %v3900_v18 = vmul.f32 %v789_v36, %v769_v6  ;;  %v981_v6 = vrot.slane %v3890_v63, 2 }
 0x8fc   :  { %v868_v38 = vrot.slane %v3900_v18, 6 }
 0x8fe   :  { %869 = vrot.lane.b32.xlu1 %v868_v38, %s3510_s9 }
 0x966   :  { %v865_v32 = vpop.permute.xlu0 %864 }
 0x967   :  { %867 = vst.msk [vmem:[#allocation3 + $0x8] sm:$0x3] %vm420_vm10, %v865_v32  ;;  %2909 = vmatmul.msk.f32.vlgmr.msra.gmra.mxu1 %vm293_vm9, %v865_v32 }
 0x970   :  { %v870_v39 = vpop.permute.xlu1 %869 }
 0x971   :  { %2907 = vmatmul.msk.f32.vlgmr.msra.gmra.mxu0 %vm293_vm9, %v870_v39 }
 0x9e4   :  { %v953_v40 = vpop.f32.mrf.mxu1 }
 0x9e5   :  { %v957_v4 = vrot.slane %v953_v40, 2 }
 0x9e7   :  { %v959_v7 = vadd.f32 %v957_v4, %v3909_v41 }
 0x9e9   :  { %3052 = vtanh.f32 %v959_v7  ;;  %v2910_v9 = vmul.f32 -1.442695, %v959_v7 }
 0x9ee   :  { %v890_v42 = vpop.f32.mrf.mxu0 }
 0x9ef   :  { %v3053_v43 = vpop.eup %3052  ;;  %v893_v8 = vadd.f32 %v890_v42, %v3774_v19 }
 0x9f0   :  { %985 = vrot.lane.b32.xlu2 %v3053_v43, %s3509_s25 }
 0x9f1   :  { %3054 = vtanh.f32 %v893_v8  ;;  %v2908_v23 = vmul.f32 -1.442695, %v893_v8 }
 0x9f2   :  { %3056 = vpow2.f32 %v2910_v9 }
 0x9f7   :  { %v3055_v12 = vpop.eup %3054 }
 0x9f8   :  { %919 = vrot.lane.b32.xlu0 %v3055_v12, %s3509_s25  ;;  %v3057_v10 = vpop.eup %3056 }
 0x9f9   :  { %v963_v13 = vadd.f32 1.0, %v3057_v10 }
 0x9fb   :  { %3058 = vrcp.f32 %v963_v13  ;;  %v975_v46 = vand.u32 2147483648, %v963_v13  ;;  %vm969_vm6 = vweird.f32 %v963_v13  ;;  %v973_v47 = vand.u32 2147483647, %v963_v13 }
 0x9fc   :  { %3060 = vpow2.f32 %v2908_v23 }
 0x9fd   :  { %v976_v49 = vor.u32 1.1754944e-38, %v975_v46  ;;  %vm974_vm8 = vcmp.eq.f32.partialorder %v973_v47, 8.507059e+37 }
 0xa01   :  { %v3059_v20 = vpop.eup %3058 }
 0xa02   :  { %v965_v31 = vmul.f32 %v3059_v20, %v963_v13  ;;  %vm970_vm5 = vweird.f32 %v3059_v20  ;;  %v3061_v26 = vpop.eup %3060 }
 0xa03   :  { %vm971_vm7 = vmor %vm969_vm6, %vm970_vm5  ;;  %v897_v50 = vadd.f32 1.0, %v3061_v26 }
 0xa04   :  { %v966_v14 = vsub.f32 1.0, %v965_v31 }
 0xa05   :  { %3062 = vrcp.f32 %v897_v50  ;;  %v909_v59 = vand.u32 2147483648, %v897_v50  ;;  %vm903_vm12 = vweird.f32 %v897_v50  ;;  %v907_v60 = vand.u32 2147483647, %v897_v50 }
 0xa06   :  { %v967_v44 = vmul.f32 %v3059_v20, %v966_v14 }
 0xa07   :  { %v910_v62 = vor.u32 1.1754944e-38, %v909_v59  ;;  %vm908_vm14 = vcmp.eq.f32.partialorder %v907_v60, 8.507059e+37 }
 0xa08   :  { %v968_v45 = vadd.f32 %v3059_v20, %v967_v44 }
 0xa0a   :  { %v972_v48 = vsel %vm971_vm7, %v3059_v20, %v968_v45 }
 0xa0b   :  { %v977_v51 = vsel %vm974_vm8, %v976_v49, %v972_v48  ;;  %v3063_v54 = vpop.eup %3062 }
 0xa0c   :  { %v899_v55 = vmul.f32 %v3063_v54, %v897_v50  ;;  %vm904_vm11 = vweird.f32 %v3063_v54  ;;  %v983_v16 = vmul.f32 %v981_v6, %v977_v51 }
 0xa0d   :  { %vm905_vm13 = vmor %vm903_vm12, %vm904_vm11 }
 0xa0e   :  { %v900_v56 = vsub.f32 1.0, %v899_v55 }
 0xa10   :  { %v901_v57 = vmul.f32 %v3063_v54, %v900_v56 }
 0xa12   :  { %v902_v58 = vadd.f32 %v3063_v54, %v901_v57 }
 0xa14   :  { %v906_v61 = vsel %vm905_vm13, %v3063_v54, %v902_v58 }
 0xa15   :  { %v911_v1 = vsel %vm908_vm14, %v910_v62, %v906_v61 }
 0xa16   :  { %v917_v25 = vmul.f32 %v915_v22, %v911_v1 }
 0xa4a   :  { %v986_v52 = vpop.permute.xlu2 %985 }
 0xa4b   :  { %v988_v53 = vmul.f32 %v986_v52, %v977_v51 }
 0xa4d   :  { %990 = vrot.lane.b32.xlu1 %v988_v53, %s3510_s9 }
 0xa6a   :  { %v920_v0 = vpop.permute.xlu0 %919 }
 0xa6b   :  { %v922_v2 = vmul.f32 %v920_v0, %v911_v1 }
 0xa6d   :  { %924 = vrot.lane.b32.xlu2 %v922_v2, %s3510_s9 }
 0xabf   :  { %v991_v17 = vpop.permute.xlu1 %990 }
 0xac0   :  { %v3918_v21 = vadd.f32 %v991_v17, %v983_v16 }
 0xac2   :  { %3064 = vtanh.f32 %v3918_v21  ;;  %v1126_v6 = vrot.slane %v3918_v21, 2 }
 0xac7   :  { %v925_v28 = vpop.permute.xlu2 %924 }
 0xac8   :  { %v3065_v29 = vpop.eup %3064  ;;  %v3922_v30 = vadd.f32 %v925_v28, %v917_v25 }
 0xac9   :  { %996 = vrot.lane.b32.xlu0 %v3065_v29, %s3509_s25 }
 0xaca   :  { %3066 = vtanh.f32 %v3922_v30  ;;  %v1057_v25 = vrot.slane %v3922_v30, 6 }
 0xad0   :  { %v3067_v34 = vpop.eup %3066 }
 0xad1   :  { %930 = vrot.lane.b32.xlu1 %v3067_v34, %s3509_s25 }
 0xb3b   :  { %v997_v63 = vpop.permute.xlu0 %996 }
 0xb3c   :  { %v3927_v3 = vmul.f32 %v997_v63, %v977_v51 }
 0xb3e   :  { %v1076_v5 = vrot.slane %v3927_v3, 6 }
 0xb40   :  { %1077 = vrot.lane.b32.xlu2 %v1076_v5, %s3510_s9 }
 0xb43   :  { %v931_v33 = vpop.permute.xlu1 %930 }
 0xb44   :  { %v933_v36 = vmul.f32 %v931_v33, %v911_v1 }
 0xb46   :  { %1001 = vrot.lane.b32.xlu0 %v933_v36, %s3510_s9 }
 0xb9a   :  { %v1078_v38 = vpop.permute.xlu2 %1077 }
 0xb9b   :  { %2913 = vmatmul.msk.f32.vlgmr.msra.gmra.mxu3 %vm293_vm9, %v1078_v38 }
 0xbb8   :  { %v1002_v32 = vpop.permute.xlu0 %1001 }
 0xbb9   :  { %1004 = vst.msk [vmem:[#allocation2 + $0x8] sm:$0x3] %vm420_vm10, %v1002_v32  ;;  %2911 = vmatmul.msk.f32.vlgmr.msra.gmra.mxu2 %vm293_vm9, %v1002_v32 }
 0xc1e   :  { %v1098_v39 = vpop.f32.mrf.mxu3 }
 0xc1f   :  { %v1102_v40 = vrot.slane %v1098_v39, 4 }
 0xc21   :  { %v1104_v4 = vadd.f32 %v1102_v40, %v3909_v41 }
 0xc23   :  { %3068 = vtanh.f32 %v1104_v4  ;;  %v2914_v9 = vmul.f32 -1.442695, %v1104_v4 }
 0xc29   :  { %v3069_v7 = vpop.eup %3068 }
 0xc2a   :  { %1130 = vrot.lane.b32.xlu1 %v3069_v7, %s3509_s25 }
 0xc3c   :  { %v1029_v42 = vpop.f32.mrf.mxu2 }
 0xc3d   :  { %v1033_v43 = vrot.slane %v1029_v42, 6 }
 0xc3f   :  { %v1035_v8 = vadd.f32 %v1033_v43, %v3774_v19 }
 0xc41   :  { %3070 = vtanh.f32 %v1035_v8  ;;  %v2912_v10 = vmul.f32 -1.442695, %v1035_v8 }
 0xc42   :  { %3072 = vpow2.f32 %v2914_v9 }
 0xc43   :  { %3074 = vpow2.f32 %v2912_v10 }
 0xc47   :  { %v3071_v12 = vpop.eup %3070 }
 0xc48   :  { %1061 = vrot.lane.b32.xlu2 %v3071_v12, %s3509_s25  ;;  %v3073_v13 = vpop.eup %3072 }
 0xc49   :  { %v1108_v20 = vadd.f32 1.0, %v3073_v13  ;;  %v3075_v31 = vpop.eup %3074 }
 0xc4a   :  { %v1039_v14 = vadd.f32 1.0, %v3075_v31 }
 0xc4b   :  { %3076 = vrcp.f32 %v1108_v20  ;;  %v1120_v50 = vand.u32 2147483648, %v1108_v20  ;;  %vm1114_vm0 = vweird.f32 %v1108_v20  ;;  %v1118_v51 = vand.u32 2147483647, %v1108_v20 }
 0xc4c   :  { %3078 = vrcp.f32 %v1039_v14  ;;  %v1051_v58 = vand.u32 2147483648, %v1039_v14  ;;  %vm1045_vm4 = vweird.f32 %v1039_v14  ;;  %v1049_v60 = vand.u32 2147483647, %v1039_v14 }
 0xc4d   :  { %v1121_v54 = vor.u32 1.1754944e-38, %v1120_v50  ;;  %vm1119_vm2 = vcmp.eq.f32.partialorder %v1118_v51, 8.507059e+37 }
 0xc4e   :  { %v1052_v62 = vor.u32 1.1754944e-38, %v1051_v58  ;;  %vm1050_vm6 = vcmp.eq.f32.partialorder %v1049_v60, 8.507059e+37 }
 0xc51   :  { %v3077_v23 = vpop.eup %3076 }
 0xc52   :  { %v1110_v44 = vmul.f32 %v3077_v23, %v1108_v20  ;;  %v3079_v45 = vpop.eup %3078  ;;  %vm1115_vm15 = vweird.f32 %v3077_v23 }
 0xc53   :  { %v1041_v47 = vmul.f32 %v3079_v45, %v1039_v14  ;;  %vm1116_vm1 = vmor %vm1114_vm0, %vm1115_vm15  ;;  %vm1046_vm3 = vweird.f32 %v3079_v45 }
 0xc54   :  { %v1111_v46 = vsub.f32 1.0, %v1110_v44  ;;  %vm1047_vm5 = vmor %vm1045_vm4, %vm1046_vm3 }
 0xc55   :  { %v1042_v48 = vsub.f32 1.0, %v1041_v47 }
 0xc56   :  { %v1112_v26 = vmul.f32 %v3077_v23, %v1111_v46 }
 0xc57   :  { %v1043_v52 = vmul.f32 %v3079_v45, %v1042_v48 }
 0xc58   :  { %v1113_v49 = vadd.f32 %v3077_v23, %v1112_v26 }
 0xc59   :  { %v1044_v55 = vadd.f32 %v3079_v45, %v1043_v52 }
 0xc5a   :  { %v1117_v53 = vsel %vm1116_vm1, %v3077_v23, %v1113_v49 }
 0xc5b   :  { %v1122_v57 = vsel %vm1119_vm2, %v1121_v54, %v1117_v53  ;;  %v1048_v61 = vsel %vm1047_vm5, %v3079_v45, %v1044_v55 }
 0xc5c   :  { %v1053_v0 = vsel %vm1050_vm6, %v1052_v62, %v1048_v61  ;;  %v1128_v16 = vmul.f32 %v1126_v6, %v1122_v57 }
 0xc5d   :  { %v1059_v28 = vmul.f32 %v1057_v25, %v1053_v0 }
 0xc9c   :  { %v1131_v56 = vpop.permute.xlu1 %1130 }
 0xc9d   :  { %v1133_v59 = vmul.f32 %v1131_v56, %v1122_v57 }
 0xc9f   :  { %1135 = vrot.lane.b32.xlu0 %v1133_v59, %s3510_s9 }
 0xca2   :  { %v1062_v1 = vpop.permute.xlu2 %1061 }
 0xca3   :  { %v1064_v2 = vmul.f32 %v1062_v1, %v1053_v0 }
 0xca5   :  { %1066 = vrot.lane.b32.xlu1 %v1064_v2, %s3510_s9 }
 0xd11   :  { %v1136_v17 = vpop.permute.xlu0 %1135 }
 0xd12   :  { %v3942_v22 = vadd.f32 %v1136_v17, %v1128_v16 }
 0xd14   :  { %3080 = vtanh.f32 %v3942_v22  ;;  %v1274_v17 = vrot.slane %v3942_v22, 2 }
 0xd17   :  { %v1067_v29 = vpop.permute.xlu1 %1066 }
 0xd18   :  { %v3946_v34 = vadd.f32 %v1067_v29, %v1059_v28 }
 0xd1a   :  { %v3081_v63 = vpop.eup %3080  ;;  %3082 = vtanh.f32 %v3946_v34 }
 0xd1b   :  { %1141 = vrot.lane.b32.xlu2 %v3081_v63, %s3509_s25 }
 0xd20   :  { %v3083_v5 = vpop.eup %3082 }
 0xd21   :  { %1072 = vrot.lane.b32.xlu0 %v3083_v5, %s3509_s25  ;;  %v1205_v5 = vrot.slane %v3946_v34, 6 }
 0xd75   :  { %v1142_v21 = vpop.permute.xlu2 %1141 }
 0xd76   :  { %v3951_v33 = vmul.f32 %v1142_v21, %v1122_v57 }
 0xd78   :  { %v1224_v36 = vrot.slane %v3951_v33, 4 }
 0xd7a   :  { %1225 = vrot.lane.b32.xlu1 %v1224_v36, %s3510_s9 }
 0xd93   :  { %v1073_v30 = vpop.permute.xlu0 %1072 }
 0xd94   :  { %v3955_v38 = vmul.f32 %v1073_v30, %v1053_v0 }
 0xd96   :  { %v1155_v32 = vrot.slane %v3955_v38, 2 }
 0xd98   :  { %1156 = vrot.lane.b32.xlu2 %v1155_v32, %s3510_s9 }
 0xdec   :  { %v1226_v39 = vpop.permute.xlu1 %1225 }
 0xded   :  { %2917 = vmatmul.msk.f32.vlgmr.msrb.gmra.mxu1 %vm293_vm9, %v1226_v39 }
 0xdf2   :  { %v1157_v40 = vpop.permute.xlu2 %1156 }
 0xdf3   :  { %2915 = vmatmul.msk.f32.vlgmr.msrb.gmra.mxu0 %vm293_vm9, %v1157_v40 }
 0xe6a   :  { %v1246_v4 = vpop.f32.mrf.mxu1 }
 0xe6b   :  { %v1250_v7 = vrot.slane %v1246_v4, 6 }
 0xe6d   :  { %v1252_v42 = vadd.f32 %v1250_v7, %v3909_v41 }
 0xe6f   :  { %3084 = vtanh.f32 %v1252_v42  ;;  %v2918_v13 = vmul.f32 -1.442695, %v1252_v42 }
 0xe70   :  { %v1177_v43 = vpop.f32.mrf.mxu0 }
 0xe71   :  { %v1181_v8 = vrot.slane %v1177_v43, 4 }
 0xe73   :  { %v1183_v12 = vadd.f32 %v1181_v8, %v3774_v19 }
 0xe75   :  { %v3085_v9 = vpop.eup %3084  ;;  %3086 = vtanh.f32 %v1183_v12  ;;  %v2916_v20 = vmul.f32 -1.442695, %v1183_v12 }
 0xe76   :  { %1278 = vrot.lane.b32.xlu0 %v3085_v9, %s3509_s25  ;;  %3088 = vpow2.f32 %v2918_v13 }
 0xe77   :  { %3090 = vpow2.f32 %v2916_v20 }
 0xe7b   :  { %v3087_v10 = vpop.eup %3086 }
 0xe7c   :  { %1209 = vrot.lane.b32.xlu1 %v3087_v10, %s3509_s25  ;;  %v3089_v31 = vpop.eup %3088 }
 0xe7d   :  { %v1256_v14 = vadd.f32 1.0, %v3089_v31  ;;  %v3091_v23 = vpop.eup %3090 }
 0xe7e   :  { %v1187_v44 = vadd.f32 1.0, %v3091_v23 }
 0xe7f   :  { %3092 = vrcp.f32 %v1256_v14  ;;  %v1268_v52 = vand.u32 2147483648, %v1256_v14  ;;  %vm1262_vm8 = vweird.f32 %v1256_v14  ;;  %v1266_v53 = vand.u32 2147483647, %v1256_v14 }
 0xe80   :  { %3094 = vrcp.f32 %v1187_v44  ;;  %v1199_v60 = vand.u32 2147483648, %v1187_v44  ;;  %vm1193_vm14 = vweird.f32 %v1187_v44  ;;  %v1197_v62 = vand.u32 2147483647, %v1187_v44 }
 0xe81   :  { %v1269_v56 = vor.u32 1.1754944e-38, %v1268_v52  ;;  %vm1267_vm12 = vcmp.eq.f32.partialorder %v1266_v53, 8.507059e+37 }
 0xe82   :  { %v1200_v1 = vor.u32 1.1754944e-38, %v1199_v60  ;;  %vm1198_vm0 = vcmp.eq.f32.partialorder %v1197_v62, 8.507059e+37 }
 0xe85   :  { %v3093_v45 = vpop.eup %3092 }
 0xe86   :  { %v1258_v46 = vmul.f32 %v3093_v45, %v1256_v14  ;;  %v3095_v47 = vpop.eup %3094  ;;  %vm1263_vm7 = vweird.f32 %v3093_v45 }
 0xe87   :  { %v1189_v48 = vmul.f32 %v3095_v47, %v1187_v44  ;;  %vm1264_vm11 = vmor %vm1262_vm8, %vm1263_vm7  ;;  %vm1194_vm13 = vweird.f32 %v3095_v47 }
 0xe88   :  { %v1259_v26 = vsub.f32 1.0, %v1258_v46  ;;  %vm1195_vm15 = vmor %vm1193_vm14, %vm1194_vm13  ;;  %vm567_vm13 = vcmask 257026  }
 0xe89   :  { %v1190_v50 = vsub.f32 1.0, %v1189_v48 }
 0xe8a   :  { %v1260_v49 = vmul.f32 %v3093_v45, %v1259_v26 }
 0xe8b   :  { %v1191_v54 = vmul.f32 %v3095_v47, %v1190_v50 }
 0xe8c   :  { %v1261_v51 = vadd.f32 %v3093_v45, %v1260_v49 }
 0xe8d   :  { %v1192_v57 = vadd.f32 %v3095_v47, %v1191_v54 }
 0xe8e   :  { %v1265_v55 = vsel %vm1264_vm11, %v3093_v45, %v1261_v51  ;;  %vm426_vm11 = vcmask 261126  }
 0xe8f   :  { %v1270_v59 = vsel %vm1267_vm12, %v1269_v56, %v1265_v55  ;;  %v1196_v0 = vsel %vm1195_vm15, %v3095_v47, %v1192_v57  ;;  %vm573_vm12 = vcmask 259076  }
 0xe90   :  { %v1201_v6 = vsel %vm1198_vm0, %v1200_v1, %v1196_v0  ;;  %v1276_v25 = vmul.f32 %v1274_v17, %v1270_v59 }
 0xe91   :  { %v1207_v21 = vmul.f32 %v1205_v5, %v1201_v6 }
 0xee8   :  { %v1279_v58 = vpop.permute.xlu0 %1278 }
 0xee9   :  { %v1281_v61 = vmul.f32 %v1279_v58, %v1270_v59 }
 0xeeb   :  { %1283 = vrot.lane.b32.xlu2 %v1281_v61, %s3510_s9 }
 0xeee   :  { %v1210_v2 = vpop.permute.xlu1 %1209 }
 0xeef   :  { %v1212_v16 = vmul.f32 %v1210_v2, %v1201_v6 }
 0xef1   :  { %1214 = vrot.lane.b32.xlu0 %v1212_v16, %s3510_s9 }
 0xf45   :  { %v1284_v28 = vpop.permute.xlu2 %1283 }
 0xf46   :  { %v3968_v29 = vadd.f32 %v1284_v28, %v1276_v25 }
 0xf48   :  { %3096 = vtanh.f32 %v3968_v29  ;;  %v1419_v25 = vrot.slane %v3968_v29, 2 }
 0xf4e   :  { %v3097_v63 = vpop.eup %3096 }
 0xf4f   :  { %1289 = vrot.lane.b32.xlu1 %v3097_v63, %s3509_s25 }
 0xf63   :  { %v1215_v36 = vpop.permute.xlu0 %1214 }
 0xf64   :  { %v3973_v30 = vadd.f32 %v1215_v36, %v1207_v21 }
 0xf66   :  { %3098 = vtanh.f32 %v3973_v30  ;;  %v1353_v21 = vrot.slane %v3973_v30, 6 }
 0xf6c   :  { %v3099_v32 = vpop.eup %3098 }
 0xf6d   :  { %1220 = vrot.lane.b32.xlu2 %v3099_v32, %s3509_s25 }
 0xfc1   :  { %v1290_v22 = vpop.permute.xlu1 %1289 }
 0xfc2   :  { %v3977_v39 = vmul.f32 %v1290_v22, %v1270_v59 }
 0xfc4   :  { %v1372_v40 = vrot.slane %v3977_v39, 2 }
 0xfc6   :  { %1373 = vrot.lane.b32.xlu0 %v1372_v40, %s3510_s9 }
 0xfc7   :  { %v1221_v4 = vpop.permute.xlu2 %1220 }
 0xfc8   :  { %v3981_v7 = vmul.f32 %v1221_v4, %v1201_v6 }
 0xfca   :  { %v1303_v34 = vrot.slane %v3981_v7, 4 }
 0xfcc   :  { %1304 = vrot.lane.b32.xlu1 %v1303_v34, %s3510_s9 }
0x1038   :  { %v1374_v42 = vpop.permute.xlu0 %1373 }
0x1039   :  { %2921 = vmatmul.msk.f32.vlgmr.msrb.gmra.mxu3 %vm293_vm9, %v1374_v42  ;;  %v1531_v42 = vld [vmem:[#allocation12 + $0x18] sm:$0xff] }
0x103a   :  { %1544 = vmatpush.msra.mxu3 %v1531_v42 }
0x103e   :  { %v1305_v43 = vpop.permute.xlu1 %1304 }
0x103f   :  { %2919 = vmatmul.msk.f32.vlgmr.msrb.gmra.mxu2 %vm293_vm9, %v1305_v43  ;;  %v1530_v43 = vld [vmem:[#allocation12 + $0x10] sm:$0xff] }
0x1040   :  { %1545 = vmatpush.msra.mxu3 %v1530_v43 }
0x10bc   :  { %v1394_v8 = vpop.f32.mrf.mxu3 }
0x10bd   :  { %v1397_v12 = vadd.f32 %v1394_v8, %v3909_v41  ;;  %v1458_v8 = vld [vmem:[#allocation9 + $0x10] sm:$0xff] }
0x10bf   :  { %3100 = vtanh.f32 %v1397_v12  ;;  %v2922_v14 = vmul.f32 -1.442695, %v1397_v12  ;;  %v1529_v12 = vld [vmem:[#allocation12 + $0x8] sm:$0xff] }
0x10c0   :  { %1546 = vmatpush.msra.mxu3 %v1529_v12 }
0x10c2   :  { %v1325_v9 = vpop.f32.mrf.mxu2 }
0x10c3   :  { %v1329_v10 = vrot.slane %v1325_v9, 2  ;;  %v1457_v9 = vld [vmem:[#allocation9 + $0x8] sm:$0xff] }
0x10c5   :  { %v3101_v13 = vpop.eup %3100  ;;  %v1331_v20 = vadd.f32 %v1329_v10, %v3774_v19  ;;  %v1528_v10 = vld [vmem:[#allocation12] sm:$0xff] }
0x10c6   :  { %1423 = vrot.lane.b32.xlu2 %v3101_v13, %s3509_s25  ;;  %v1456_v13 = vld [vmem:[#allocation9] sm:$0xff]  ;;  %1547 = vmatpush.msra.mxu3 %v1528_v10 }
0x10c7   :  { %3102 = vtanh.f32 %v1331_v20  ;;  %v2920_v47 = vmul.f32 -1.442695, %v1331_v20  ;;  %v1527_v20 = vld [vmem:[#allocation10 + $0x18] sm:$0xff] }
0x10c8   :  { %3104 = vpow2.f32 %v2922_v14  ;;  %1567 = vmatpush.msrb.mxu3 %v1527_v20  ;;  %v1455_v14 = vld [vmem:[%s4549_s7 + $0x18] sm:$0xff] }
0x10c9   :  { %1507 = vmatpush.msra.mxu1 %v1455_v14 }
0x10cd   :  { %v3103_v31 = vpop.eup %3102 }
0x10ce   :  { %1357 = vrot.lane.b32.xlu0 %v3103_v31, %s3509_s25  ;;  %v3105_v23 = vpop.eup %3104  ;;  %v1526_v31 = vld [vmem:[#allocation10 + $0x10] sm:$0xff] }
0x10cf   :  { %v1401_v44 = vadd.f32 1.0, %v3105_v23  ;;  %1568 = vmatpush.msrb.mxu3 %v1526_v31  ;;  %v1525_v23 = vld [vmem:[#allocation10 + $0x8] sm:$0xff] }
0x10d1   :  { %3106 = vrcp.f32 %v1401_v44  ;;  %v1413_v19 = vand.u32 2147483648, %v1401_v44  ;;  %vm1407_vm2 = vweird.f32 %v1401_v44  ;;  %v1411_v49 = vand.u32 2147483647, %v1401_v44  ;;  %1569 = vmatpush.msrb.mxu3 %v1525_v23 }
0x10d2   :  { %3108 = vpow2.f32 %v2920_v47  ;;  %v4042_v47 = vld [vmem:[#allocation13 + $0x10] sm:$0xff] }
0x10d3   :  { %v1414_v52 = vor.u32 1.1754944e-38, %v1413_v19  ;;  %vm1412_vm4 = vcmp.eq.f32.partialorder %v1411_v49, 8.507059e+37  ;;  %v4052_v19 = vld [vmem:[#allocation13 + $0x8] sm:$0xff]  ;;  %v4054_v49 = vld [vmem:[#allocation13] sm:$0xff] }
0x10d7   :  { %v3107_v45 = vpop.eup %3106 }
0x10d8   :  { %v1403_v46 = vmul.f32 %v3107_v45, %v1401_v44  ;;  %vm1408_vm1 = vweird.f32 %v3107_v45  ;;  %v3109_v50 = vpop.eup %3108  ;;  %v1454_v44 = vld [vmem:[%s4549_s7 + $0x10] sm:$0xff] }
0x10d9   :  { %vm1409_vm3 = vmor %vm1407_vm2, %vm1408_vm1  ;;  %v1335_v53 = vadd.f32 1.0, %v3109_v50  ;;  %1508 = vmatpush.msra.mxu1 %v1454_v44  ;;  %v4058_v50 = vld [vmem:[#allocation15 + $0x10] sm:$0xff] }
0x10da   :  { %v1404_v41 = vsub.f32 1.0, %v1403_v46  ;;  %v4036_v46 = vld [vmem:[#allocation13 + $0x18] sm:$0xff] }
0x10db   :  { %3110 = vrcp.f32 %v1335_v53  ;;  %v1347_v62 = vand.u32 2147483648, %v1335_v53  ;;  %vm1341_vm6 = vweird.f32 %v1335_v53  ;;  %v1345_v0 = vand.u32 2147483647, %v1335_v53  ;;  %1730 = vmatpush.msra.mxu2 %v4036_v46 }
0x10dc   :  { %v1405_v26 = vmul.f32 %v3107_v45, %v1404_v41  ;;  %v1453_v41 = vld [vmem:[%s4549_s7 + $0x8] sm:$0xff] }
0x10dd   :  { %v1348_v2 = vor.u32 1.1754944e-38, %v1347_v62  ;;  %vm1346_vm8 = vcmp.eq.f32.partialorder %v1345_v0, 8.507059e+37  ;;  %1731 = vmatpush.msra.mxu2 %v4042_v47  ;;  %1509 = vmatpush.msra.mxu1 %v1453_v41 }
0x10de   :  { %v1406_v48 = vadd.f32 %v3107_v45, %v1405_v26  ;;  %v1452_v26 = vld [vmem:[%s4549_s7] sm:$0xff]  ;;  %s3511_s7 = smov 96  }
0x10df   :  { %1510 = vmatpush.msra.mxu1 %v1452_v26  ;;  %1732 = vmatpush.msra.mxu2 %v4052_v19 }
0x10e0   :  { %v1410_v51 = vsel %vm1409_vm3, %v3107_v45, %v1406_v48  ;;  %v1524_v45 = vld [vmem:[#allocation10] sm:$0xff]  ;;  %v4050_v48 = vld [vmem:[#allocation15 + $0x18] sm:$0xff] }
0x10e1   :  { %v1415_v54 = vsel %vm1412_vm4, %v1414_v52, %v1410_v51  ;;  %v3111_v57 = vpop.eup %3110  ;;  %1570 = vmatpush.msrb.mxu3 %v1524_v45  ;;  %1662 = vmatpush.msrb.mxu1 %v4050_v48  ;;  %v4067_v52 = vld [vmem:[#allocation15 + $0x8] sm:$0xff] }
0x10e2   :  { %v1337_v58 = vmul.f32 %v3111_v57, %v1335_v53  ;;  %vm1342_vm5 = vweird.f32 %v3111_v57  ;;  %v1421_v28 = vmul.f32 %v1419_v25, %v1415_v54  ;;  %1733 = vmatpush.msra.mxu2 %v4054_v49  ;;  %v4069_v53 = vld [vmem:[#allocation15] sm:$0xff] }
0x10e3   :  { %vm1343_vm7 = vmor %vm1341_vm6, %vm1342_vm5  ;;  %1663 = vmatpush.msrb.mxu1 %v4058_v50 }
0x10e4   :  { %v1338_v59 = vsub.f32 1.0, %v1337_v58  ;;  %2025 = vmatpush.msrb.mxu2 %v4036_v46 }
0x10e5   :  { %1664 = vmatpush.msrb.mxu1 %v4067_v52 }
0x10e6   :  { %v1339_v60 = vmul.f32 %v3111_v57, %v1338_v59  ;;  %2026 = vmatpush.msrb.mxu2 %v4042_v47 }
0x10e7   :  { %1665 = vmatpush.msrb.mxu1 %v4069_v53 }
0x10e8   :  { %v1340_v61 = vadd.f32 %v3111_v57, %v1339_v60  ;;  %2027 = vmatpush.msrb.mxu2 %v4052_v19 }
0x10ea   :  { %v1344_v1 = vsel %vm1343_vm7, %v3111_v57, %v1340_v61  ;;  %2028 = vmatpush.msrb.mxu2 %v4054_v49 }
0x10eb   :  { %v1349_v16 = vsel %vm1346_vm8, %v1348_v2, %v1344_v1  ;;  %v2983_v2 = vld [vmem:[#allocation16] ss:$0 sm:$0xff] }
0x10ec   :  { %v1355_v36 = vmul.f32 %v1353_v21, %v1349_v16 }
0x1120   :  { %v1424_v55 = vpop.permute.xlu2 %1423 }
0x1121   :  { %v1426_v56 = vmul.f32 %v1424_v55, %v1415_v54 }
0x1123   :  { %1428 = vrot.lane.b32.xlu1 %v1426_v56, %s3510_s9 }
0x1140   :  { %v1358_v6 = vpop.permute.xlu0 %1357 }
0x1141   :  { %v1360_v17 = vmul.f32 %v1358_v6, %v1349_v16 }
0x1143   :  { %1362 = vrot.lane.b32.xlu2 %v1360_v17, %s3510_s9 }
0x114b   :  { %1006 = vrot.lane.b32.xlu2 %v3927_v3, %s3510_s9 }
0x1195   :  { %v1429_v63 = vpop.permute.xlu1 %1428 }
0x1196   :  { %v1431_v5 = vadd.f32 %v1429_v63, %v1421_v28  ;;  %v2984_v28 = vld [vmem:[#allocation18] ss:$0 sm:$0xff] }
0x1198   :  { %3112 = vtanh.f32 %v1431_v5 }
0x119d   :  { %v1363_v32 = vpop.permute.xlu2 %1362 }
0x119e   :  { %v3113_v22 = vpop.eup %3112  ;;  %v1365_v40 = vadd.f32 %v1363_v32, %v1355_v36 }
0x119f   :  { %1434 = vrot.lane.b32.xlu0 %v3113_v22, %s3509_s25 }
0x11a0   :  { %3114 = vtanh.f32 %v1365_v40 }
0x11a5   :  { %v1007_v4 = vpop.permute.xlu2 %1006 }
0x11a6   :  { %v3115_v34 = vpop.eup %3114  ;;  %1009 = vst.msk [vmem:[#allocation3] sm:$0xc0] %vm426_vm11, %v1007_v4 }
0x11a7   :  { %1151 = vrot.lane.b32.xlu0 %v3951_v33, %s3510_s9  ;;  %1368 = vrot.lane.b32.xlu1 %v3115_v34, %s3509_s25 }
0x11af   :  { %423 = vrot.lane.b32.xlu0 %v3797_v11, %s3510_s9  ;;  %1299 = vrot.lane.b32.xlu1 %v3977_v39, %s3510_s9 }
0x11b7   :  { %564 = vrot.lane.b32.xlu0 %v3833_v27, %s3510_s9  ;;  %570 = vrot.lane.b32.xlu1 %v3829_v24, %s3510_s9 }
0x11bf   :  { %1146 = vrot.lane.b32.xlu0 %v3955_v38, %s3510_s9  ;;  %714 = vrot.lane.b32.xlu1 %v3869_v37, %s3510_s9 }
0x11c7   :  { %1294 = vrot.lane.b32.xlu1 %v3981_v7, %s3510_s9 }
0x1211   :  { %v1435_v3 = vpop.permute.xlu0 %1434 }
0x1212   :  { %v1437_v11 = vmul.f32 %v1435_v3, %v1415_v54 }
0x1214   :  { %1444 = vrot.lane.b32.xlu2 %v1437_v11, %s3510_s9 }
0x1219   :  { %v1152_v33 = vpop.permute.xlu0 %1151  ;;  %v1369_v29 = vpop.permute.xlu1 %1368 }
0x121a   :  { %1154 = vst.msk [vmem:[#allocation3] sm:$0x30] %vm573_vm12, %v1152_v33  ;;  %v1371_v30 = vmul.f32 %v1369_v29, %v1349_v16 }
0x121c   :  { %719 = vrot.lane.b32.xlu2 %v3865_v35, %s3510_s9 }
0x1221   :  { %v424_v24 = vpop.permute.xlu0 %423  ;;  %v1300_v27 = vpop.permute.xlu1 %1299 }
0x1222   :  { %427 = vst.msk [vmem:[#allocation3 + $0x8] sm:$0xc0] %vm426_vm11, %v424_v24 }
0x1223   :  { %1302 = vst.msk [vmem:[#allocation3] sm:$0xc] %vm567_vm13, %v1300_v27 }
0x1224   :  { %859 = vrot.lane.b32.xlu2 %v3900_v18, %s3510_s9  ;;  %v1459_v18 = vld [vmem:[#allocation9 + $0x18] sm:$0xff] }
0x1225   :  { %1478 = vmatpush.msra.mxu0 %v1459_v18 }
0x1227   :  { %1479 = vmatpush.msra.mxu0 %v1458_v8 }
0x1229   :  { %v565_v37 = vpop.permute.xlu0 %564  ;;  %v571_v38 = vpop.permute.xlu1 %570  ;;  %1480 = vmatpush.msra.mxu0 %v1457_v9 }
0x122a   :  { %568 = vst.msk [vmem:[#allocation2] sm:$0xc] %vm567_vm13, %v565_v37 }
0x122b   :  { %574 = vst.msk [vmem:[#allocation3 + $0x8] sm:$0x30] %vm573_vm12, %v571_v38  ;;  %1481 = vmatpush.msra.mxu0 %v1456_v13 }
0x122c   :  { %1439 = vrot.lane.b32.xlu2 %v1371_v30, %s3510_s9 }
0x122d   :  { %1604 = vmatpush.msrb.mxu0 %v4036_v46 }
0x122f   :  { %1605 = vmatpush.msrb.mxu0 %v4042_v47 }
0x1231   :  { %v1147_v35 = vpop.permute.xlu0 %1146  ;;  %v715_v39 = vpop.permute.xlu1 %714  ;;  %1606 = vmatpush.msrb.mxu0 %v4052_v19 }
0x1232   :  { %1149 = vst.msk [vmem:[#allocation2 + $0x8] sm:$0xc] %vm567_vm13, %v1147_v35 }
0x1233   :  { %717 = vst.msk [vmem:[#allocation2] sm:$0x30] %vm573_vm12, %v715_v39  ;;  %1607 = vmatpush.msrb.mxu0 %v4054_v49 }
0x1239   :  { %v1295_v7 = vpop.permute.xlu1 %1294 }
0x123a   :  { %1297 = vst.msk [vmem:[#allocation2 + $0x8] sm:$0x30] %vm573_vm12, %v1295_v7 }
0x126e   :  { %v1445_v51 = vpop.permute.xlu2 %1444 }
0x126f   :  { %1447 = vst.msk [vmem:[#allocation3] sm:$0x3] %vm420_vm10, %v1445_v51 }
0x1276   :  { %v720_v54 = vpop.permute.xlu2 %719  ;;  %v1450_v55 = vld [vmem:[#allocation3] sm:$0xff] }
0x1277   :  { %722 = vst.msk [vmem:[#allocation3 + $0x8] sm:$0xc] %vm567_vm13, %v720_v54  ;;  %2923 = vmatmul.msk.f32.vlgmr.msra.gmra.mxu0 %vm293_vm9, %v1450_v55  ;;  %2927 = vmatmul.msk.f32.vlgmr.msra.gmra.mxu3 %vm293_vm9, %v1450_v55 }
0x1278   :  { %1800 = vmatpush.msra.mxu3 %v4050_v48  ;;  %1878 = vmatpush.msra.mxu0 %v4036_v46 }
0x127a   :  { %1801 = vmatpush.msra.mxu3 %v4058_v50  ;;  %1879 = vmatpush.msra.mxu0 %v4042_v47 }
0x127c   :  { %1802 = vmatpush.msra.mxu3 %v4067_v52  ;;  %1880 = vmatpush.msra.mxu0 %v4052_v19 }
0x127e   :  { %v860_v56 = vpop.permute.xlu2 %859  ;;  %v1451_v57 = vld [vmem:[#allocation3 + $0x8] sm:$0xff]  ;;  %1803 = vmatpush.msra.mxu3 %v4069_v53  ;;  %1881 = vmatpush.msra.mxu0 %v4054_v49 }
0x127f   :  { %862 = vst.msk [vmem:[#allocation2] sm:$0xc0] %vm426_vm11, %v860_v56  ;;  %2924 = vmatmul.msk.f32.gmra.mxu0 %vm293_vm9, %v1451_v57  ;;  %2928 = vmatmul.msk.f32.gmra.mxu3 %vm293_vm9, %v1451_v57 }
0x1286   :  { %v1440_v58 = vpop.permute.xlu2 %1439  ;;  %v1448_v59 = vld [vmem:[#allocation2] sm:$0xff] }
0x1287   :  { %1442 = vst.msk [vmem:[#allocation2 + $0x8] sm:$0xc0] %vm426_vm11, %v1440_v58  ;;  %2925 = vmatmul.msk.f32.vlgmr.msra.gmra.mxu1 %vm293_vm9, %v1448_v59  ;;  %2929 = vmatmul.msk.f32.vlgmr.msrb.gmra.mxu3 %vm293_vm9, %v1448_v59 }
0x1288   :  { %1608 = vmatmul.f32.vlgmr.msrb.gmra.mxu0 %v3508_v15  ;;  %1947 = vmatpush.msra.mxu1 %v4050_v48 }
0x1289   :  { %2094 = vmatpush.msrb.mxu3 %v4050_v48  ;;  %2169 = vmatpush.msrb.mxu0 %v4036_v46 }
0x128a   :  { %1948 = vmatpush.msra.mxu1 %v4058_v50 }
0x128b   :  { %2095 = vmatpush.msrb.mxu3 %v4058_v50  ;;  %2170 = vmatpush.msrb.mxu0 %v4042_v47 }
0x128c   :  { %1949 = vmatpush.msra.mxu1 %v4067_v52 }
0x128d   :  { %2096 = vmatpush.msrb.mxu3 %v4067_v52  ;;  %2171 = vmatpush.msrb.mxu0 %v4052_v19 }
0x128e   :  { %v1449_v60 = vld [vmem:[#allocation2 + $0x8] sm:$0xff]  ;;  %1950 = vmatpush.msra.mxu1 %v4069_v53 }
0x128f   :  { %2926 = vmatmul.msk.f32.gmra.mxu1 %vm293_vm9, %v1449_v60  ;;  %2930 = vmatmul.msk.f32.gmra.mxu3 %vm293_vm9, %v1449_v60 }
0x1290   :  { %2097 = vmatpush.msrb.mxu3 %v4069_v53  ;;  %2172 = vmatpush.msrb.mxu0 %v4054_v49 }
0x1297   :  { %1666 = vmatmul.f32.vlgmr.msrb.gmra.mxu1 %v3508_v15 }
0x1298   :  { %2234 = vmatpush.msrb.mxu1 %v4050_v48 }
0x129a   :  { %2235 = vmatpush.msrb.mxu1 %v4058_v50 }
0x129c   :  { %2236 = vmatpush.msrb.mxu1 %v4067_v52 }
0x129e   :  { %2237 = vmatpush.msrb.mxu1 %v4069_v53 }
0x12f4   :  { %v1483_v61 = vpop.f32.mrf.mxu0 }
0x12fa   :  { %v1549_v62 = vpop.f32.mrf.mxu3 }
0x12fc   :  { %v1486_v0 = vpop.f32.mrf.mxu0 }
0x1302   :  { %v1552_v1 = vpop.f32.mrf.mxu3 }
0x1304   :  { %v1512_v6 = vpop.f32.mrf.mxu1 }
0x1305   :  { %v1513_v16 = vadd.f32 %v1512_v6, %v1483_v61  ;;  %v1609_v17 = vpop.f32.mrf.mxu0 }
0x1307   :  { %v4112_v25 = vadd.f32 %v2983_v2, %v1513_v16 }
0x1309   :  { %v1612_v15 = vadd.f32 %v1609_v17, %v4112_v25 }
0x130a   :  { %v1572_v63 = vpop.f32.mrf.mxu3 }
0x130b   :  { %3116 = vtanh.f32 %v1612_v15  ;;  %v1573_v5 = vadd.f32 %v1572_v63, %v1549_v62  ;;  %v2931_v27 = vmul.f32 -1.442695, %v1612_v15 }
0x130c   :  { %v1515_v21 = vpop.f32.mrf.mxu1 }
0x130d   :  { %v4115_v36 = vadd.f32 %v2984_v28, %v1573_v5  ;;  %v1516_v32 = vadd.f32 %v1515_v21, %v1486_v0 }
0x130f   :  { %v4117_v22 = vadd.f32 %v2983_v2, %v1516_v32 }
0x1311   :  { %v3117_v40 = vpop.eup %3116 }
0x1312   :  { %1635 = vrot.lane.b32.xlu1 %v3117_v40, %s3509_s25  ;;  %v1575_v4 = vpop.f32.mrf.mxu3 }
0x1313   :  { %v1576_v34 = vadd.f32 %v1575_v4, %v1552_v1 }
0x1314   :  { %v1667_v3 = vpop.f32.mrf.mxu1 }
0x1315   :  { %v4120_v11 = vadd.f32 %v2984_v28, %v1576_v34  ;;  %v1671_v33 = vrot.slane %v1667_v3, 2 }
0x1317   :  { %v1673_v29 = vadd.f32 %v1671_v33, %v4120_v11 }
0x1319   :  { %3118 = vtanh.f32 %v1673_v29  ;;  %v2932_v30 = vmul.f32 -1.442695, %v1673_v29 }
0x131a   :  { %3120 = vpow2.f32 %v2931_v27 }
0x131f   :  { %v3119_v24 = vpop.eup %3118 }
0x1320   :  { %1696 = vrot.lane.b32.xlu0 %v3119_v24, %s3509_s25  ;;  %v3121_v37 = vpop.eup %3120 }
0x1321   :  { %v1616_v38 = vadd.f32 1.0, %v3121_v37 }
0x1323   :  { %3122 = vrcp.f32 %v1616_v38  ;;  %v1628_v9 = vand.u32 2147483648, %v1616_v38  ;;  %vm1622_vm14 = vweird.f32 %v1616_v38  ;;  %v1626_v10 = vand.u32 2147483647, %v1616_v38 }
0x1324   :  { %3124 = vpow2.f32 %v2932_v30 }
0x1325   :  { %v1629_v31 = vor.u32 1.1754944e-38, %v1628_v9  ;;  %vm1627_vm0 = vcmp.eq.f32.partialorder %v1626_v10, 8.507059e+37 }
0x1329   :  { %v3123_v35 = vpop.eup %3122 }
0x132a   :  { %v3125_v39 = vpop.eup %3124  ;;  %v1618_v7 = vmul.f32 %v3123_v35, %v1616_v38  ;;  %vm1623_vm10 = vweird.f32 %v3123_v35 }
0x132b   :  { %v1677_v42 = vadd.f32 1.0, %v3125_v39  ;;  %vm1624_vm15 = vmor %vm1622_vm14, %vm1623_vm10 }
0x132c   :  { %v1619_v18 = vsub.f32 1.0, %v1618_v7 }
0x132d   :  { %3126 = vrcp.f32 %v1677_v42  ;;  %v1689_v51 = vand.u32 2147483648, %v1677_v42  ;;  %vm1683_vm2 = vweird.f32 %v1677_v42  ;;  %v1687_v54 = vand.u32 2147483647, %v1677_v42 }
0x132e   :  { %v1620_v43 = vmul.f32 %v3123_v35, %v1619_v18 }
0x132f   :  { %v1690_v56 = vor.u32 1.1754944e-38, %v1689_v51  ;;  %vm1688_vm4 = vcmp.eq.f32.partialorder %v1687_v54, 8.507059e+37 }
0x1330   :  { %v1621_v12 = vadd.f32 %v3123_v35, %v1620_v43 }
0x1332   :  { %v1625_v20 = vsel %vm1624_vm15, %v3123_v35, %v1621_v12 }
0x1333   :  { %v3127_v8 = vpop.eup %3126  ;;  %v1630_v44 = vsel %vm1627_vm0, %v1629_v31, %v1625_v20 }
0x1334   :  { %v1679_v13 = vmul.f32 %v3127_v8, %v1677_v42  ;;  %vm1684_vm1 = vweird.f32 %v3127_v8  ;;  %v1633_v1 = vmul.f32 0.0, %v1630_v44 }
0x1335   :  { %vm1685_vm3 = vmor %vm1683_vm2, %vm1684_vm1 }
0x1336   :  { %v1680_v14 = vsub.f32 1.0, %v1679_v13 }
0x1338   :  { %v1681_v41 = vmul.f32 %v3127_v8, %v1680_v14 }
0x133a   :  { %v1682_v26 = vadd.f32 %v3127_v8, %v1681_v41 }
0x133c   :  { %v1686_v55 = vsel %vm1685_vm3, %v3127_v8, %v1682_v26 }
0x133d   :  { %v1691_v58 = vsel %vm1688_vm4, %v1690_v56, %v1686_v55 }
0x133e   :  { %v1694_v60 = vmul.f32 0.0, %v1691_v58 }
0x1384   :  { %v1636_v23 = vpop.permute.xlu1 %1635 }
0x1385   :  { %v1638_v45 = vmul.f32 %v1636_v23, %v1630_v44 }
0x1387   :  { %1640 = vrot.lane.b32.xlu0 %v1638_v45, %s3510_s9 }
0x1392   :  { %v1697_v57 = vpop.permute.xlu0 %1696 }
0x1393   :  { %v1699_v59 = vmul.f32 %v1697_v57, %v1691_v58 }
0x1395   :  { %1701 = vrot.lane.b32.xlu2 %v1699_v59, %s3510_s9 }
0x13ef   :  { %v1702_v61 = vpop.permute.xlu2 %1701 }
0x13f0   :  { %v4126_v62 = vadd.f32 %v1702_v61, %v1694_v60 }
0x13f2   :  { %3128 = vtanh.f32 %v4126_v62 }
0x13f8   :  { %v3129_v0 = vpop.eup %3128 }
0x13f9   :  { %v1641_v2 = vpop.permute.xlu0 %1640  ;;  %1707 = vrot.lane.b32.xlu1 %v3129_v0, %s3509_s25 }
0x13fa   :  { %v4130_v6 = vadd.f32 %v1641_v2, %v1633_v1 }
0x13fc   :  { %3130 = vtanh.f32 %v4130_v6  ;;  %v1763_v61 = vrot.slane %v4130_v6, 6 }
0x1402   :  { %v3131_v16 = vpop.eup %3130 }
0x1403   :  { %1646 = vrot.lane.b32.xlu2 %v3131_v16, %s3509_s25 }
0x145d   :  { %v1647_v17 = vpop.permute.xlu2 %1646 }
0x145e   :  { %v4134_v15 = vmul.f32 %v1647_v17, %v1630_v44  ;;  %v1833_v17 = vrot.slane %v4126_v62, 2 }
0x1460   :  { %1714 = vrot.lane.b32.xlu0 %v4134_v15, %s3510_s9 }
0x146b   :  { %v1708_v28 = vpop.permute.xlu1 %1707 }
0x146c   :  { %v4138_v63 = vmul.f32 %v1708_v28, %v1691_v58 }
0x146e   :  { %v1783_v5 = vrot.slane %v4138_v63, 6 }
0x1470   :  { %1784 = vrot.lane.b32.xlu1 %v1783_v5, %s3510_s9 }
0x14d2   :  { %v1715_v21 = vpop.permute.xlu0 %1714 }
0x14d3   :  { %2933 = vmatmul.msk.f32.vlgmr.msra.gmra.mxu2 %vm293_vm9, %v1715_v21 }
0x14d4   :  { %2307 = vmatpush.msra.mxu2 %v4036_v46 }
0x14d6   :  { %2308 = vmatpush.msra.mxu2 %v4042_v47 }
0x14d8   :  { %2309 = vmatpush.msra.mxu2 %v4052_v19 }
0x14da   :  { %2310 = vmatpush.msra.mxu2 %v4054_v49 }
0x14e2   :  { %v1785_v32 = vpop.permute.xlu1 %1784 }
0x14e3   :  { %2935 = vmatmul.msk.f32.vlgmr.msra.gmra.mxu3 %vm293_vm9, %v1785_v32 }
0x14e4   :  { %2377 = vmatpush.msra.mxu3 %v4050_v48 }
0x14e6   :  { %2378 = vmatpush.msra.mxu3 %v4058_v50 }
0x14e8   :  { %2379 = vmatpush.msra.mxu3 %v4067_v52 }
0x14ea   :  { %2380 = vmatpush.msra.mxu3 %v4069_v53 }
0x1556   :  { %v1735_v40 = vpop.f32.mrf.mxu2 }
0x1557   :  { %v1739_v4 = vrot.slane %v1735_v40, 6 }
0x1559   :  { %v1741_v34 = vadd.f32 %v1739_v4, %v4112_v25 }
0x155b   :  { %3132 = vtanh.f32 %v1741_v34  ;;  %v2934_v37 = vmul.f32 -1.442695, %v1741_v34 }
0x1561   :  { %v3133_v3 = vpop.eup %3132 }
0x1562   :  { %1767 = vrot.lane.b32.xlu2 %v3133_v3, %s3509_s25 }
0x1566   :  { %v1805_v33 = vpop.f32.mrf.mxu3 }
0x1567   :  { %v1809_v29 = vrot.slane %v1805_v33, 4 }
0x1569   :  { %v1811_v24 = vadd.f32 %v1809_v29, %v4120_v11 }
0x156b   :  { %3134 = vtanh.f32 %v1811_v24  ;;  %v2936_v8 = vmul.f32 -1.442695, %v1811_v24 }
0x156c   :  { %3136 = vpow2.f32 %v2934_v37 }
0x1571   :  { %v3135_v27 = vpop.eup %3134 }
0x1572   :  { %1837 = vrot.lane.b32.xlu0 %v3135_v27, %s3509_s25  ;;  %v3137_v38 = vpop.eup %3136 }
0x1573   :  { %v1745_v30 = vadd.f32 1.0, %v3137_v38 }
0x1575   :  { %3138 = vrcp.f32 %v1745_v30  ;;  %v1757_v43 = vand.u32 2147483648, %v1745_v30  ;;  %vm1751_vm6 = vweird.f32 %v1745_v30  ;;  %v1755_v12 = vand.u32 2147483647, %v1745_v30 }
0x1576   :  { %3140 = vpow2.f32 %v2936_v8 }
0x1577   :  { %v1758_v10 = vor.u32 1.1754944e-38, %v1757_v43  ;;  %vm1756_vm8 = vcmp.eq.f32.partialorder %v1755_v12, 8.507059e+37 }
0x157b   :  { %v3139_v35 = vpop.eup %3138 }
0x157c   :  { %v1747_v39 = vmul.f32 %v3139_v35, %v1745_v30  ;;  %vm1752_vm5 = vweird.f32 %v3139_v35  ;;  %v3141_v14 = vpop.eup %3140 }
0x157d   :  { %vm1753_vm7 = vmor %vm1751_vm6, %vm1752_vm5  ;;  %v1815_v23 = vadd.f32 1.0, %v3141_v14 }
0x157e   :  { %v1748_v7 = vsub.f32 1.0, %v1747_v39 }
0x157f   :  { %3142 = vrcp.f32 %v1815_v23  ;;  %v1827_v54 = vand.u32 2147483648, %v1815_v23  ;;  %vm1821_vm12 = vweird.f32 %v1815_v23  ;;  %v1825_v55 = vand.u32 2147483647, %v1815_v23 }
0x1580   :  { %v1749_v42 = vmul.f32 %v3139_v35, %v1748_v7 }
0x1581   :  { %v1828_v57 = vor.u32 1.1754944e-38, %v1827_v54  ;;  %vm1826_vm10 = vcmp.eq.f32.partialorder %v1825_v55, 8.507059e+37 }
0x1582   :  { %v1750_v18 = vadd.f32 %v3139_v35, %v1749_v42 }
0x1584   :  { %v1754_v9 = vsel %vm1753_vm7, %v3139_v35, %v1750_v18 }
0x1585   :  { %v1759_v20 = vsel %vm1756_vm8, %v1758_v10, %v1754_v9  ;;  %v3143_v44 = vpop.eup %3142 }
0x1586   :  { %v1817_v45 = vmul.f32 %v3143_v44, %v1815_v23  ;;  %vm1822_vm11 = vweird.f32 %v3143_v44  ;;  %v1765_v0 = vmul.f32 %v1763_v61, %v1759_v20 }
0x1587   :  { %vm1823_vm13 = vmor %vm1821_vm12, %vm1822_vm11 }
0x1588   :  { %v1818_v41 = vsub.f32 1.0, %v1817_v45 }
0x158a   :  { %v1819_v26 = vmul.f32 %v3143_v44, %v1818_v41 }
0x158c   :  { %v1820_v51 = vadd.f32 %v3143_v44, %v1819_v26 }
0x158e   :  { %v1824_v56 = vsel %vm1823_vm13, %v3143_v44, %v1820_v51 }
0x158f   :  { %v1829_v59 = vsel %vm1826_vm10, %v1828_v57, %v1824_v56 }
0x1590   :  { %v1835_v28 = vmul.f32 %v1833_v17, %v1829_v59 }
0x15bc   :  { %v1768_v13 = vpop.permute.xlu2 %1767 }
0x15bd   :  { %v1770_v31 = vmul.f32 %v1768_v13, %v1759_v20 }
0x15bf   :  { %1772 = vrot.lane.b32.xlu1 %v1770_v31, %s3510_s9 }
0x15e4   :  { %v1838_v58 = vpop.permute.xlu0 %1837 }
0x15e5   :  { %v1840_v60 = vmul.f32 %v1838_v58, %v1829_v59 }
0x15e7   :  { %1842 = vrot.lane.b32.xlu2 %v1840_v60, %s3510_s9 }
0x1631   :  { %v1773_v1 = vpop.permute.xlu1 %1772 }
0x1632   :  { %v4159_v2 = vadd.f32 %v1773_v1, %v1765_v0 }
0x1634   :  { %3144 = vtanh.f32 %v4159_v2 }
0x163a   :  { %v3145_v16 = vpop.eup %3144 }
0x163b   :  { %1778 = vrot.lane.b32.xlu0 %v3145_v16, %s3509_s25 }
0x1641   :  { %v1843_v5 = vpop.permute.xlu2 %1842 }
0x1642   :  { %v4164_v21 = vadd.f32 %v1843_v5, %v1835_v28  ;;  %v1911_v5 = vrot.slane %v4159_v2, 6 }
0x1644   :  { %3146 = vtanh.f32 %v4164_v21 }
0x164a   :  { %v3147_v32 = vpop.eup %3146 }
0x164b   :  { %1848 = vrot.lane.b32.xlu1 %v3147_v32, %s3509_s25 }
0x16ad   :  { %v1779_v6 = vpop.permute.xlu0 %1778 }
0x16ae   :  { %v1781_v40 = vmul.f32 %v1779_v6, %v1759_v20 }
0x16b0   :  { %v4168_v4 = vrot.slane %v1781_v40, 2 }
0x16b2   :  { %1862 = vrot.lane.b32.xlu2 %v4168_v4, %s3510_s9 }
0x16bd   :  { %v1849_v34 = vpop.permute.xlu1 %1848 }
0x16be   :  { %v4172_v3 = vmul.f32 %v1849_v34, %v1829_v59 }
0x16c0   :  { %v1930_v62 = vrot.slane %v4172_v3, 4 }
0x16c2   :  { %1931 = vrot.lane.b32.xlu0 %v1930_v62, %s3510_s9  ;;  %v1980_v62 = vrot.slane %v4164_v21, 2 }
0x170c   :  { %v1863_v33 = vpop.permute.xlu2 %1862 }
0x170d   :  { %2937 = vmatmul.msk.f32.vlgmr.msra.gmra.mxu0 %vm293_vm9, %v1863_v33 }
0x170e   :  { %2455 = vmatpush.msra.mxu0 %v4036_v46 }
0x1710   :  { %2456 = vmatpush.msra.mxu0 %v4042_v47 }
0x1712   :  { %2457 = vmatpush.msra.mxu0 %v4052_v19 }
0x1714   :  { %2458 = vmatpush.msra.mxu0 %v4054_v49 }
0x1734   :  { %v1932_v29 = vpop.permute.xlu0 %1931 }
0x1735   :  { %2939 = vmatmul.msk.f32.vlgmr.msra.gmra.mxu1 %vm293_vm9, %v1932_v29 }
0x1736   :  { %2524 = vmatpush.msra.mxu1 %v4050_v48 }
0x1738   :  { %2525 = vmatpush.msra.mxu1 %v4058_v50 }
0x173a   :  { %2526 = vmatpush.msra.mxu1 %v4067_v52 }
0x173c   :  { %2527 = vmatpush.msra.mxu1 %v4069_v53 }
0x178a   :  { %v1883_v24 = vpop.f32.mrf.mxu0 }
0x178b   :  { %v1887_v27 = vrot.slane %v1883_v24, 4 }
0x178d   :  { %v1889_v37 = vadd.f32 %v1887_v27, %v4112_v25 }
0x178f   :  { %3148 = vtanh.f32 %v1889_v37  ;;  %v2938_v42 = vmul.f32 -1.442695, %v1889_v37 }
0x1795   :  { %v3149_v38 = vpop.eup %3148 }
0x1796   :  { %1915 = vrot.lane.b32.xlu1 %v3149_v38, %s3509_s25  ;;  %v1855_v38 = vmax.f32 %v4134_v15, %v4168_v4 }
0x17b2   :  { %v1952_v30 = vpop.f32.mrf.mxu1 }
0x17b3   :  { %v1956_v35 = vrot.slane %v1952_v30, 6  ;;  %v1860_v30 = vadd.f32 %v4168_v4, %v4134_v15 }
0x17b5   :  { %v1958_v39 = vadd.f32 %v1956_v35, %v4120_v11 }
0x17b7   :  { %3150 = vtanh.f32 %v1958_v39  ;;  %v2940_v8 = vmul.f32 -1.442695, %v1958_v39 }
0x17b8   :  { %3152 = vpow2.f32 %v2938_v42 }
0x17bd   :  { %v3151_v7 = vpop.eup %3150 }
0x17be   :  { %1984 = vrot.lane.b32.xlu2 %v3151_v7, %s3509_s25  ;;  %v3153_v18 = vpop.eup %3152  ;;  %v1857_v7 = vrot.slane %v4172_v3, 6 }
0x17bf   :  { %v1893_v43 = vadd.f32 1.0, %v3153_v18 }
0x17c1   :  { %3154 = vrcp.f32 %v1893_v43  ;;  %v1905_v44 = vand.u32 2147483648, %v1893_v43  ;;  %vm1899_vm15 = vweird.f32 %v1893_v43  ;;  %v1903_v45 = vand.u32 2147483647, %v1893_v43 }
0x17c2   :  { %3156 = vpow2.f32 %v2940_v8  ;;  %v1861_v8 = vadd.f32 %v1857_v7, %v4138_v63 }
0x17c3   :  { %v1906_v51 = vor.u32 1.1754944e-38, %v1905_v44  ;;  %vm1904_vm1 = vcmp.eq.f32.partialorder %v1903_v45, 8.507059e+37 }
0x17c7   :  { %v3155_v12 = vpop.eup %3154 }
0x17c8   :  { %v3157_v9 = vpop.eup %3156  ;;  %v1895_v10 = vmul.f32 %v3155_v12, %v1893_v43  ;;  %vm1900_vm14 = vweird.f32 %v3155_v12  ;;  %v1859_v43 = vmax.f32 %v4138_v63, %v1857_v7 }
0x17c9   :  { %v1962_v13 = vadd.f32 1.0, %v3157_v9  ;;  %vm1901_vm0 = vmor %vm1899_vm15, %vm1900_vm14 }
0x17ca   :  { %v1896_v20 = vsub.f32 1.0, %v1895_v10 }
0x17cb   :  { %3158 = vrcp.f32 %v1962_v13  ;;  %v1974_v60 = vand.u32 2147483648, %v1962_v13  ;;  %vm1968_vm3 = vweird.f32 %v1962_v13  ;;  %v1972_v61 = vand.u32 2147483647, %v1962_v13 }
0x17cc   :  { %v1897_v31 = vmul.f32 %v3155_v12, %v1896_v20 }
0x17cd   :  { %v1975_v1 = vor.u32 1.1754944e-38, %v1974_v60  ;;  %vm1973_vm5 = vcmp.eq.f32.partialorder %v1972_v61, 8.507059e+37 }
0x17ce   :  { %v1898_v14 = vadd.f32 %v3155_v12, %v1897_v31 }
0x17d0   :  { %v1902_v41 = vsel %vm1901_vm0, %v3155_v12, %v1898_v14 }
0x17d1   :  { %v3159_v23 = vpop.eup %3158  ;;  %v1907_v54 = vsel %vm1904_vm1, %v1906_v51, %v1902_v41 }
0x17d2   :  { %v1964_v26 = vmul.f32 %v3159_v23, %v1962_v13  ;;  %vm1969_vm2 = vweird.f32 %v3159_v23  ;;  %v1913_v32 = vmul.f32 %v1911_v5, %v1907_v54 }
0x17d3   :  { %vm1970_vm4 = vmor %vm1968_vm3, %vm1969_vm2 }
0x17d4   :  { %v1965_v57 = vsub.f32 1.0, %v1964_v26 }
0x17d6   :  { %v1966_v58 = vmul.f32 %v3159_v23, %v1965_v57 }
0x17d8   :  { %v1967_v59 = vadd.f32 %v3159_v23, %v1966_v58 }
0x17da   :  { %v1971_v0 = vsel %vm1970_vm4, %v3159_v23, %v1967_v59 }
0x17db   :  { %v1976_v17 = vsel %vm1973_vm5, %v1975_v1, %v1971_v0 }
0x17dc   :  { %v1982_v33 = vmul.f32 %v1980_v62, %v1976_v17 }
0x1808   :  { %v1916_v55 = vpop.permute.xlu1 %1915 }
0x1809   :  { %v1918_v56 = vmul.f32 %v1916_v55, %v1907_v54 }
0x180b   :  { %1920 = vrot.lane.b32.xlu0 %v1918_v56, %s3510_s9 }
0x1818   :  { %v1985_v16 = vpop.permute.xlu2 %1984 }
0x1819   :  { %v1987_v28 = vmul.f32 %v1985_v16, %v1976_v17 }
0x181b   :  { %1989 = vrot.lane.b32.xlu1 %v1987_v28, %s3510_s9 }
0x187d   :  { %v1921_v6 = vpop.permute.xlu0 %1920 }
0x187e   :  { %v4193_v40 = vadd.f32 %v1921_v6, %v1913_v32 }
0x1880   :  { %3160 = vtanh.f32 %v4193_v40 }
0x1886   :  { %v3161_v34 = vpop.eup %3160 }
0x1887   :  { %1926 = vrot.lane.b32.xlu2 %v3161_v34, %s3509_s25 }
0x188d   :  { %v1990_v29 = vpop.permute.xlu1 %1989 }
0x188e   :  { %v4198_v24 = vadd.f32 %v1990_v29, %v1982_v33 }
0x1890   :  { %3162 = vtanh.f32 %v4198_v24  ;;  %v2124_v34 = vrot.slane %v4198_v24, 2 }
0x1896   :  { %v3163_v27 = vpop.eup %3162 }
0x1897   :  { %1995 = vrot.lane.b32.xlu0 %v3163_v27, %s3509_s25  ;;  %v2058_v27 = vrot.slane %v4193_v40, 6 }
0x18e1   :  { %v1927_v2 = vpop.permute.xlu2 %1926 }
0x18e2   :  { %v1929_v37 = vmul.f32 %v1927_v2, %v1907_v54 }
0x18e4   :  { %v2000_v35 = vrot.slane %v1929_v37, 4 }
0x18e6   :  { %v4206_v39 = vmax.f32 %v1855_v38, %v2000_v35  ;;  %v4208_v21 = vadd.f32 %v2000_v35, %v1860_v30  ;;  %2009 = vrot.lane.b32.xlu1 %v2000_v35, %s3510_s9 }
0x1909   :  { %v1996_v42 = vpop.permute.xlu0 %1995 }
0x190a   :  { %v1998_v18 = vmul.f32 %v1996_v42, %v1976_v17 }
0x190c   :  { %v2004_v12 = vrot.slane %v1998_v18, 4  ;;  %v2077_v9 = vrot.slane %v1998_v18, 2 }
0x190e   :  { %v4214_v10 = vmax.f32 %v1859_v43, %v2004_v12  ;;  %v4216_v15 = vadd.f32 %v2004_v12, %v1861_v8  ;;  %2078 = vrot.lane.b32.xlu2 %v2077_v9, %s3510_s9 }
0x1958   :  { %v2010_v4 = vpop.permute.xlu1 %2009 }
0x1959   :  { %2941 = vmatmul.msk.f32.vlgmr.msrb.gmra.mxu2 %vm293_vm9, %v2010_v4 }
0x195a   :  { %2602 = vmatpush.msrb.mxu2 %v4036_v46 }
0x195c   :  { %2603 = vmatpush.msrb.mxu2 %v4042_v47 }
0x195e   :  { %2604 = vmatpush.msrb.mxu2 %v4052_v19 }
0x1960   :  { %2605 = vmatpush.msrb.mxu2 %v4054_v49 }
0x1968   :  { %v2079_v63 = vpop.permute.xlu2 %2078 }
0x1969   :  { %2943 = vmatmul.msk.f32.vlgmr.msrb.gmra.mxu3 %vm293_vm9, %v2079_v63 }
0x196a   :  { %2671 = vmatpush.msrb.mxu3 %v4050_v48 }
0x196c   :  { %2672 = vmatpush.msrb.mxu3 %v4058_v50 }
0x196e   :  { %2673 = vmatpush.msrb.mxu3 %v4067_v52 }
0x1970   :  { %2674 = vmatpush.msrb.mxu3 %v4069_v53 }
0x19dc   :  { %v2030_v3 = vpop.f32.mrf.mxu2 }
0x19dd   :  { %v2034_v13 = vrot.slane %v2030_v3, 2 }
0x19df   :  { %v2036_v46 = vadd.f32 %v2034_v13, %v4112_v25 }
0x19e1   :  { %3164 = vtanh.f32 %v2036_v46  ;;  %v2942_v48 = vmul.f32 -1.442695, %v2036_v46 }
0x19e7   :  { %v3165_v47 = vpop.eup %3164 }
0x19e8   :  { %2062 = vrot.lane.b32.xlu1 %v3165_v47, %s3509_s25 }
0x19ec   :  { %v2099_v19 = vpop.f32.mrf.mxu3 }
0x19ed   :  { %v2102_v49 = vadd.f32 %v2099_v19, %v4120_v11 }
0x19ef   :  { %3166 = vtanh.f32 %v2102_v49  ;;  %v2944_v53 = vmul.f32 -1.442695, %v2102_v49 }
0x19f0   :  { %3168 = vpow2.f32 %v2942_v48 }
0x19f5   :  { %v3167_v20 = vpop.eup %3166 }
0x19f6   :  { %2128 = vrot.lane.b32.xlu0 %v3167_v20, %s3509_s25  ;;  %v3169_v50 = vpop.eup %3168 }
0x19f7   :  { %v2040_v52 = vadd.f32 1.0, %v3169_v50 }
0x19f9   :  { %3170 = vrcp.f32 %v2040_v52  ;;  %v2052_v26 = vand.u32 2147483648, %v2040_v52  ;;  %vm2046_vm7 = vweird.f32 %v2040_v52  ;;  %v2050_v51 = vand.u32 2147483647, %v2040_v52 }
0x19fa   :  { %3172 = vpow2.f32 %v2944_v53 }
0x19fb   :  { %v2053_v56 = vor.u32 1.1754944e-38, %v2052_v26  ;;  %vm2051_vm11 = vcmp.eq.f32.partialorder %v2050_v51, 8.507059e+37 }
0x19ff   :  { %v3171_v31 = vpop.eup %3170 }
0x1a00   :  { %v3173_v25 = vpop.eup %3172  ;;  %v2042_v14 = vmul.f32 %v3171_v31, %v2040_v52  ;;  %vm2047_vm6 = vweird.f32 %v3171_v31 }
0x1a01   :  { %v2106_v23 = vadd.f32 1.0, %v3173_v25  ;;  %vm2048_vm8 = vmor %vm2046_vm7, %vm2047_vm6 }
0x1a02   :  { %v2043_v44 = vsub.f32 1.0, %v2042_v14 }
0x1a03   :  { %3174 = vrcp.f32 %v2106_v23  ;;  %v2118_v1 = vand.u32 2147483648, %v2106_v23  ;;  %vm2112_vm13 = vweird.f32 %v2106_v23  ;;  %v2116_v16 = vand.u32 2147483647, %v2106_v23 }
0x1a04   :  { %v2044_v45 = vmul.f32 %v3171_v31, %v2043_v44 }
0x1a05   :  { %v2119_v28 = vor.u32 1.1754944e-38, %v2118_v1  ;;  %vm2117_vm14 = vcmp.eq.f32.partialorder %v2116_v16, 8.507059e+37 }
0x1a06   :  { %v2045_v11 = vadd.f32 %v3171_v31, %v2044_v45 }
0x1a08   :  { %v2049_v55 = vsel %vm2048_vm8, %v3171_v31, %v2045_v11 }
0x1a09   :  { %v3175_v41 = vpop.eup %3174  ;;  %v2054_v59 = vsel %vm2051_vm11, %v2053_v56, %v2049_v55 }
0x1a0a   :  { %v2108_v54 = vmul.f32 %v3175_v41, %v2106_v23  ;;  %vm2113_vm12 = vweird.f32 %v3175_v41  ;;  %v2060_v37 = vmul.f32 %v2058_v27, %v2054_v59 }
0x1a0b   :  { %vm2114_vm10 = vmor %vm2112_vm13, %vm2113_vm12 }
0x1a0c   :  { %v2109_v57 = vsub.f32 1.0, %v2108_v54 }
0x1a0e   :  { %v2110_v61 = vmul.f32 %v3175_v41, %v2109_v57 }
0x1a10   :  { %v2111_v0 = vadd.f32 %v3175_v41, %v2110_v61 }
0x1a12   :  { %v2115_v17 = vsel %vm2114_vm10, %v3175_v41, %v2111_v0 }
0x1a13   :  { %v2120_v32 = vsel %vm2117_vm14, %v2119_v28, %v2115_v17 }
0x1a14   :  { %v2126_v62 = vmul.f32 %v2124_v34, %v2120_v32 }
0x1a5a   :  { %v2063_v58 = vpop.permute.xlu1 %2062 }
0x1a5b   :  { %v2065_v60 = vmul.f32 %v2063_v58, %v2054_v59 }
0x1a5d   :  { %2067 = vrot.lane.b32.xlu0 %v2065_v60, %s3510_s9 }
0x1a68   :  { %v2129_v5 = vpop.permute.xlu0 %2128 }
0x1a69   :  { %v2131_v6 = vmul.f32 %v2129_v5, %v2120_v32 }
0x1a6b   :  { %2133 = vrot.lane.b32.xlu2 %v2131_v6, %s3510_s9 }
0x1ac5   :  { %v2134_v33 = vpop.permute.xlu2 %2133 }
0x1ac6   :  { %v4236_v29 = vadd.f32 %v2134_v33, %v2126_v62 }
0x1ac8   :  { %3176 = vtanh.f32 %v4236_v29  ;;  %v2267_v27 = vrot.slane %v4236_v29, 2 }
0x1ace   :  { %v3177_v2 = vpop.eup %3176 }
0x1acf   :  { %2139 = vrot.lane.b32.xlu1 %v3177_v2, %s3509_s25  ;;  %v2068_v38 = vpop.permute.xlu0 %2067 }
0x1ad0   :  { %v4241_v30 = vadd.f32 %v2068_v38, %v2060_v37 }
0x1ad2   :  { %3178 = vtanh.f32 %v4241_v30 }
0x1ad8   :  { %v3179_v35 = vpop.eup %3178 }
0x1ad9   :  { %2073 = vrot.lane.b32.xlu2 %v3179_v35, %s3509_s25 }
0x1b33   :  { %v2074_v24 = vpop.permute.xlu2 %2073 }
0x1b34   :  { %v2076_v7 = vmul.f32 %v2074_v24, %v2054_v59 }
0x1b36   :  { %v4245_v42 = vrot.slane %v2076_v7, 6 }
0x1b38   :  { %v2146_v18 = vmax.f32 %v4206_v39, %v4245_v42  ;;  %v4251_v40 = vadd.f32 %v4245_v42, %v4208_v21  ;;  %2153 = vrot.lane.b32.xlu1 %v4245_v42, %s3510_s9 }
0x1b41   :  { %v2140_v43 = vpop.permute.xlu1 %2139 }
0x1b42   :  { %v2142_v8 = vmul.f32 %v2140_v43, %v2120_v32  ;;  %v2199_v32 = vrot.slane %v4241_v30, 6 }
0x1b44   :  { %v2148_v12 = vrot.slane %v2142_v8, 2  ;;  %2218 = vrot.lane.b32.xlu0 %v2142_v8, %s3510_s9 }
0x1b46   :  { %v4257_v9 = vmax.f32 %v4214_v10, %v2148_v12  ;;  %v4260_v4 = vadd.f32 %v2148_v12, %v4216_v15 }
0x1baa   :  { %v2154_v63 = vpop.permute.xlu1 %2153 }
0x1bab   :  { %2945 = vmatmul.msk.f32.vlgmr.msrb.gmra.mxu0 %vm293_vm9, %v2154_v63 }
0x1bb6   :  { %v2219_v3 = vpop.permute.xlu0 %2218 }
0x1bb7   :  { %2947 = vmatmul.msk.f32.vlgmr.msrb.gmra.mxu1 %vm293_vm9, %v2219_v3 }
0x1c28   :  { %v2174_v21 = vpop.f32.mrf.mxu0 }
0x1c29   :  { %v2177_v13 = vadd.f32 %v2174_v21, %v4117_v22 }
0x1c2b   :  { %3180 = vtanh.f32 %v2177_v13  ;;  %v2946_v48 = vmul.f32 -1.442695, %v2177_v13 }
0x1c31   :  { %v3181_v46 = vpop.eup %3180 }
0x1c32   :  { %2203 = vrot.lane.b32.xlu0 %v3181_v46, %s3509_s25 }
0x1c34   :  { %v2239_v47 = vpop.f32.mrf.mxu1 }
0x1c35   :  { %v2243_v19 = vrot.slane %v2239_v47, 2 }
0x1c37   :  { %v2245_v10 = vadd.f32 %v2243_v19, %v4115_v36 }
0x1c39   :  { %3182 = vtanh.f32 %v2245_v10  ;;  %v2948_v49 = vmul.f32 -1.442695, %v2245_v10 }
0x1c3b   :  { %3184 = vpow2.f32 %v2948_v49 }
0x1c3c   :  { %3186 = vpow2.f32 %v2946_v48 }
0x1c3f   :  { %v3183_v15 = vpop.eup %3182 }
0x1c40   :  { %2271 = vrot.lane.b32.xlu2 %v3183_v15, %s3509_s25 }
0x1c41   :  { %v3185_v20 = vpop.eup %3184 }
0x1c42   :  { %v2249_v50 = vadd.f32 1.0, %v3185_v20  ;;  %v3187_v52 = vpop.eup %3186 }
0x1c43   :  { %v2181_v31 = vadd.f32 1.0, %v3187_v52 }
0x1c44   :  { %3188 = vrcp.f32 %v2249_v50  ;;  %v2261_v11 = vand.u32 2147483648, %v2249_v50  ;;  %vm2255_vm0 = vweird.f32 %v2249_v50  ;;  %v2259_v26 = vand.u32 2147483647, %v2249_v50 }
0x1c45   :  { %3190 = vrcp.f32 %v2181_v31  ;;  %v2193_v61 = vand.u32 2147483648, %v2181_v31  ;;  %vm2187_vm4 = vweird.f32 %v2181_v31  ;;  %v2191_v0 = vand.u32 2147483647, %v2181_v31 }
0x1c46   :  { %v2262_v55 = vor.u32 1.1754944e-38, %v2261_v11  ;;  %vm2260_vm2 = vcmp.eq.f32.partialorder %v2259_v26, 8.507059e+37 }
0x1c47   :  { %v2194_v16 = vor.u32 1.1754944e-38, %v2193_v61  ;;  %vm2192_vm6 = vcmp.eq.f32.partialorder %v2191_v0, 8.507059e+37 }
0x1c4a   :  { %v3189_v53 = vpop.eup %3188 }
0x1c4b   :  { %v2251_v25 = vmul.f32 %v3189_v53, %v2249_v50  ;;  %v3191_v23 = vpop.eup %3190  ;;  %vm2256_vm15 = vweird.f32 %v3189_v53 }
0x1c4c   :  { %v2183_v45 = vmul.f32 %v3191_v23, %v2181_v31  ;;  %vm2257_vm1 = vmor %vm2255_vm0, %vm2256_vm15  ;;  %vm2188_vm3 = vweird.f32 %v3191_v23 }
0x1c4d   :  { %v2252_v14 = vsub.f32 1.0, %v2251_v25  ;;  %vm2189_vm5 = vmor %vm2187_vm4, %vm2188_vm3 }
0x1c4e   :  { %v2184_v51 = vsub.f32 1.0, %v2183_v45 }
0x1c4f   :  { %v2253_v44 = vmul.f32 %v3189_v53, %v2252_v14 }
0x1c50   :  { %v2185_v56 = vmul.f32 %v3191_v23, %v2184_v51 }
0x1c51   :  { %v2254_v41 = vadd.f32 %v3189_v53, %v2253_v44 }
0x1c52   :  { %v2186_v60 = vadd.f32 %v3191_v23, %v2185_v56 }
0x1c53   :  { %v2258_v54 = vsel %vm2257_vm1, %v3189_v53, %v2254_v41 }
0x1c54   :  { %v2263_v57 = vsel %vm2260_vm2, %v2262_v55, %v2258_v54  ;;  %v2190_v1 = vsel %vm2189_vm5, %v3191_v23, %v2186_v60 }
0x1c55   :  { %v2195_v28 = vsel %vm2192_vm6, %v2194_v16, %v2190_v1  ;;  %v2269_v2 = vmul.f32 %v2267_v27, %v2263_v57 }
0x1c56   :  { %v2201_v6 = vmul.f32 %v2199_v32, %v2195_v28 }
0x1c9a   :  { %v2272_v58 = vpop.permute.xlu2 %2271 }
0x1c9b   :  { %v2274_v59 = vmul.f32 %v2272_v58, %v2263_v57 }
0x1c9d   :  { %2276 = vrot.lane.b32.xlu1 %v2274_v59, %s3510_s9 }
0x1ca4   :  { %v2204_v17 = vpop.permute.xlu0 %2203 }
0x1ca5   :  { %v2206_v5 = vmul.f32 %v2204_v17, %v2195_v28 }
0x1ca7   :  { %2208 = vrot.lane.b32.xlu2 %v2206_v5, %s3510_s9 }
0x1d01   :  { %v2209_v34 = vpop.permute.xlu2 %2208 }
0x1d02   :  { %v4271_v62 = vadd.f32 %v2209_v34, %v2201_v6 }
0x1d04   :  { %3192 = vtanh.f32 %v4271_v62 }
0x1d0a   :  { %v3193_v33 = vpop.eup %3192 }
0x1d0b   :  { %2214 = vrot.lane.b32.xlu1 %v3193_v33, %s3509_s25 }
0x1d0f   :  { %v2277_v37 = vpop.permute.xlu1 %2276 }
0x1d10   :  { %v4276_v38 = vadd.f32 %v2277_v37, %v2269_v2 }
0x1d12   :  { %3194 = vtanh.f32 %v4276_v38  ;;  %v2410_v33 = vrot.slane %v4276_v38, 2 }
0x1d18   :  { %v3195_v35 = vpop.eup %3194 }
0x1d19   :  { %2282 = vrot.lane.b32.xlu0 %v3195_v35, %s3509_s25 }
0x1d7d   :  { %v2215_v30 = vpop.permute.xlu1 %2214 }
0x1d7e   :  { %v2217_v24 = vmul.f32 %v2215_v30, %v2195_v28  ;;  %v2340_v28 = vrot.slane %v4271_v62, 6 }
0x1d80   :  { %v4283_v7 = vmax.f32 %v2146_v18, %v2217_v24  ;;  %v4286_v43 = vadd.f32 %v2217_v24, %v4251_v40  ;;  %2291 = vrot.lane.b32.xlu2 %v2217_v24, %s3510_s9 }
0x1d8b   :  { %v2283_v29 = vpop.permute.xlu0 %2282 }
0x1d8c   :  { %v4289_v8 = vmul.f32 %v2283_v29, %v2263_v57 }
0x1d8e   :  { %v2287_v12 = vmax.f32 %v4257_v9, %v4289_v8  ;;  %v4295_v63 = vadd.f32 %v4289_v8, %v4260_v4  ;;  %v2360_v3 = vrot.slane %v4289_v8, 6 }
0x1d90   :  { %2361 = vrot.lane.b32.xlu0 %v2360_v3, %s3510_s9 }
0x1dda   :  { %v2292_v39 = vpop.permute.xlu2 %2291 }
0x1ddb   :  { %2949 = vmatmul.msk.f32.vlgmr.msra.gmra.mxu2 %vm293_vm9, %v2292_v39 }
0x1e02   :  { %v2362_v42 = vpop.permute.xlu0 %2361 }
0x1e03   :  { %2951 = vmatmul.msk.f32.vlgmr.msra.gmra.mxu3 %vm293_vm9, %v2362_v42 }
0x1e5e   :  { %v2312_v18 = vpop.f32.mrf.mxu2 }
0x1e5f   :  { %v2316_v40 = vrot.slane %v2312_v18, 6 }
0x1e61   :  { %v2318_v21 = vadd.f32 %v2316_v40, %v4117_v22 }
0x1e63   :  { %3196 = vtanh.f32 %v2318_v21  ;;  %v2950_v10 = vmul.f32 -1.442695, %v2318_v21 }
0x1e69   :  { %v3197_v13 = vpop.eup %3196 }
0x1e6a   :  { %2344 = vrot.lane.b32.xlu1 %v3197_v13, %s3509_s25 }
0x1e86   :  { %v2382_v4 = vpop.f32.mrf.mxu3 }
0x1e87   :  { %v2386_v46 = vrot.slane %v2382_v4, 4 }
0x1e89   :  { %v2388_v47 = vadd.f32 %v2386_v46, %v4115_v36 }
0x1e8b   :  { %3198 = vtanh.f32 %v2388_v47  ;;  %v2952_v20 = vmul.f32 -1.442695, %v2388_v47 }
0x1e8c   :  { %3200 = vpow2.f32 %v2950_v10 }
0x1e91   :  { %v3199_v19 = vpop.eup %3198 }
0x1e92   :  { %2414 = vrot.lane.b32.xlu2 %v3199_v19, %s3509_s25  ;;  %v3201_v15 = vpop.eup %3200 }
0x1e93   :  { %v2322_v49 = vadd.f32 1.0, %v3201_v15 }
0x1e95   :  { %3202 = vrcp.f32 %v2322_v49  ;;  %v2334_v44 = vand.u32 2147483648, %v2322_v49  ;;  %vm2328_vm8 = vweird.f32 %v2322_v49  ;;  %v2332_v45 = vand.u32 2147483647, %v2322_v49 }
0x1e96   :  { %3204 = vpow2.f32 %v2952_v20 }
0x1e97   :  { %v2335_v26 = vor.u32 1.1754944e-38, %v2334_v44  ;;  %vm2333_vm12 = vcmp.eq.f32.partialorder %v2332_v45, 8.507059e+37 }
0x1e9b   :  { %v3203_v48 = vpop.eup %3202 }
0x1e9c   :  { %v3205_v50 = vpop.eup %3204  ;;  %v2324_v52 = vmul.f32 %v3203_v48, %v2322_v49  ;;  %vm2329_vm7 = vweird.f32 %v3203_v48 }
0x1e9d   :  { %v2392_v53 = vadd.f32 1.0, %v3205_v50  ;;  %vm2330_vm11 = vmor %vm2328_vm8, %vm2329_vm7 }
0x1e9e   :  { %v2325_v31 = vsub.f32 1.0, %v2324_v52 }
0x1e9f   :  { %3206 = vrcp.f32 %v2392_v53  ;;  %v2404_v59 = vand.u32 2147483648, %v2392_v53  ;;  %vm2398_vm10 = vweird.f32 %v2392_v53  ;;  %v2402_v60 = vand.u32 2147483647, %v2392_v53 }
0x1ea0   :  { %v2326_v25 = vmul.f32 %v3203_v48, %v2325_v31 }
0x1ea1   :  { %v2405_v0 = vor.u32 1.1754944e-38, %v2404_v59  ;;  %vm2403_vm15 = vcmp.eq.f32.partialorder %v2402_v60, 8.507059e+37 }
0x1ea2   :  { %v2327_v14 = vadd.f32 %v3203_v48, %v2326_v25 }
0x1ea4   :  { %v2331_v41 = vsel %vm2330_vm11, %v3203_v48, %v2327_v14 }
0x1ea5   :  { %v3207_v23 = vpop.eup %3206  ;;  %v2336_v54 = vsel %vm2333_vm12, %v2335_v26, %v2331_v41 }
0x1ea6   :  { %v2394_v11 = vmul.f32 %v3207_v23, %v2392_v53  ;;  %vm2399_vm13 = vweird.f32 %v3207_v23  ;;  %v2342_v5 = vmul.f32 %v2340_v28, %v2336_v54 }
0x1ea7   :  { %vm2400_vm14 = vmor %vm2398_vm10, %vm2399_vm13 }
0x1ea8   :  { %v2395_v56 = vsub.f32 1.0, %v2394_v11 }
0x1eaa   :  { %v2396_v57 = vmul.f32 %v3207_v23, %v2395_v56 }
0x1eac   :  { %v2397_v58 = vadd.f32 %v3207_v23, %v2396_v57 }
0x1eae   :  { %v2401_v61 = vsel %vm2400_vm14, %v3207_v23, %v2397_v58 }
0x1eaf   :  { %v2406_v1 = vsel %vm2403_vm15, %v2405_v0, %v2401_v61 }
0x1eb0   :  { %v2412_v27 = vmul.f32 %v2410_v33, %v2406_v1 }
0x1edc   :  { %v2345_v51 = vpop.permute.xlu1 %2344 }
0x1edd   :  { %v2347_v55 = vmul.f32 %v2345_v51, %v2336_v54 }
0x1edf   :  { %2349 = vrot.lane.b32.xlu0 %v2347_v55, %s3510_s9 }
0x1eec   :  { %v2415_v16 = vpop.permute.xlu2 %2414 }
0x1eed   :  { %v2417_v17 = vmul.f32 %v2415_v16, %v2406_v1 }
0x1eef   :  { %2419 = vrot.lane.b32.xlu1 %v2417_v17, %s3510_s9 }
0x1f51   :  { %v2350_v32 = vpop.permute.xlu0 %2349 }
0x1f52   :  { %v4308_v6 = vadd.f32 %v2350_v32, %v2342_v5 }
0x1f54   :  { %3208 = vtanh.f32 %v4308_v6  ;;  %v2488_v28 = vrot.slane %v4308_v6, 6 }
0x1f5a   :  { %v3209_v34 = vpop.eup %3208 }
0x1f5b   :  { %2355 = vrot.lane.b32.xlu2 %v3209_v34, %s3509_s25 }
0x1f61   :  { %v2420_v2 = vpop.permute.xlu1 %2419 }
0x1f62   :  { %v4313_v37 = vadd.f32 %v2420_v2, %v2412_v27 }
0x1f64   :  { %3210 = vtanh.f32 %v4313_v37  ;;  %v2557_v27 = vrot.slane %v4313_v37, 2 }
0x1f6a   :  { %v3211_v35 = vpop.eup %3210 }
0x1f6b   :  { %2425 = vrot.lane.b32.xlu0 %v3211_v35, %s3509_s25 }
0x1fb5   :  { %v2356_v62 = vpop.permute.xlu2 %2355 }
0x1fb6   :  { %v2358_v30 = vmul.f32 %v2356_v62, %v2336_v54 }
0x1fb8   :  { %v4317_v24 = vrot.slane %v2358_v30, 2 }
0x1fba   :  { %v2432_v29 = vmax.f32 %v4283_v7, %v4317_v24  ;;  %v4323_v3 = vadd.f32 %v4317_v24, %v4286_v43  ;;  %2439 = vrot.lane.b32.xlu1 %v4317_v24, %s3510_s9 }
0x1fdd   :  { %v2426_v38 = vpop.permute.xlu0 %2425 }
0x1fde   :  { %v2428_v39 = vmul.f32 %v2426_v38, %v2406_v1 }
0x1fe0   :  { %v2434_v42 = vrot.slane %v2428_v39, 6  ;;  %v2507_v18 = vrot.slane %v2428_v39, 4 }
0x1fe2   :  { %v4330_v40 = vmax.f32 %v2287_v12, %v2434_v42  ;;  %v4333_v21 = vadd.f32 %v2434_v42, %v4295_v63  ;;  %2508 = vrot.lane.b32.xlu2 %v2507_v18, %s3510_s9 }
0x202c   :  { %v2440_v13 = vpop.permute.xlu1 %2439 }
0x202d   :  { %2953 = vmatmul.msk.f32.vlgmr.msra.gmra.mxu0 %vm293_vm9, %v2440_v13 }
0x203c   :  { %v2509_v43 = vpop.permute.xlu2 %2508 }
0x203d   :  { %2955 = vmatmul.msk.f32.vlgmr.msra.gmra.mxu1 %vm293_vm9, %v2509_v43 }
0x20aa   :  { %v2460_v4 = vpop.f32.mrf.mxu0 }
0x20ab   :  { %v2464_v46 = vrot.slane %v2460_v4, 4 }
0x20ad   :  { %v2466_v47 = vadd.f32 %v2464_v46, %v4117_v22 }
0x20af   :  { %3212 = vtanh.f32 %v2466_v47  ;;  %v2954_v10 = vmul.f32 -1.442695, %v2466_v47 }
0x20b5   :  { %v3213_v19 = vpop.eup %3212 }
0x20b6   :  { %2492 = vrot.lane.b32.xlu0 %v3213_v19, %s3509_s25 }
0x20ba   :  { %v2529_v9 = vpop.f32.mrf.mxu1 }
0x20bb   :  { %v2533_v8 = vrot.slane %v2529_v9, 6 }
0x20bd   :  { %v2535_v12 = vadd.f32 %v2533_v8, %v4115_v36 }
0x20bf   :  { %3214 = vtanh.f32 %v2535_v12  ;;  %v2956_v20 = vmul.f32 -1.442695, %v2535_v12 }
0x20c0   :  { %3216 = vpow2.f32 %v2954_v10 }
0x20c5   :  { %v3215_v63 = vpop.eup %3214 }
0x20c6   :  { %2561 = vrot.lane.b32.xlu1 %v3215_v63, %s3509_s25  ;;  %v3217_v15 = vpop.eup %3216 }
0x20c7   :  { %v2470_v49 = vadd.f32 1.0, %v3217_v15 }
0x20c9   :  { %3218 = vrcp.f32 %v2470_v49  ;;  %v2482_v44 = vand.u32 2147483648, %v2470_v49  ;;  %vm2476_vm1 = vweird.f32 %v2470_v49  ;;  %v2480_v45 = vand.u32 2147483647, %v2470_v49 }
0x20ca   :  { %3220 = vpow2.f32 %v2956_v20 }
0x20cb   :  { %v2483_v26 = vor.u32 1.1754944e-38, %v2482_v44  ;;  %vm2481_vm3 = vcmp.eq.f32.partialorder %v2480_v45, 8.507059e+37 }
0x20cf   :  { %v3219_v48 = vpop.eup %3218 }
0x20d0   :  { %v3221_v50 = vpop.eup %3220  ;;  %v2472_v52 = vmul.f32 %v3219_v48, %v2470_v49  ;;  %vm2477_vm0 = vweird.f32 %v3219_v48 }
0x20d1   :  { %v2539_v53 = vadd.f32 1.0, %v3221_v50  ;;  %vm2478_vm2 = vmor %vm2476_vm1, %vm2477_vm0  ;;  %vm2749_vm1 = vcmask 523264  }
0x20d2   :  { %v2473_v31 = vsub.f32 1.0, %v2472_v52 }
0x20d3   :  { %3222 = vrcp.f32 %v2539_v53  ;;  %v2551_v59 = vand.u32 2147483648, %v2539_v53  ;;  %vm2545_vm5 = vweird.f32 %v2539_v53  ;;  %v2549_v60 = vand.u32 2147483647, %v2539_v53 }
0x20d4   :  { %v2474_v25 = vmul.f32 %v3219_v48, %v2473_v31 }
0x20d5   :  { %v2552_v0 = vor.u32 1.1754944e-38, %v2551_v59  ;;  %vm2550_vm7 = vcmp.eq.f32.partialorder %v2549_v60, 8.507059e+37 }
0x20d6   :  { %v2475_v14 = vadd.f32 %v3219_v48, %v2474_v25 }
0x20d8   :  { %v2479_v41 = vsel %vm2478_vm2, %v3219_v48, %v2475_v14  ;;  %vm2751_vm2 = vcmask 785408  }
0x20d9   :  { %v3223_v23 = vpop.eup %3222  ;;  %v2484_v54 = vsel %vm2481_vm3, %v2483_v26, %v2479_v41 }
0x20da   :  { %v2541_v11 = vmul.f32 %v3223_v23, %v2539_v53  ;;  %vm2546_vm4 = vweird.f32 %v3223_v23  ;;  %v2490_v5 = vmul.f32 %v2488_v28, %v2484_v54 }
0x20db   :  { %vm2547_vm6 = vmor %vm2545_vm5, %vm2546_vm4 }
0x20dc   :  { %v2542_v56 = vsub.f32 1.0, %v2541_v11 }
0x20de   :  { %v2543_v57 = vmul.f32 %v3223_v23, %v2542_v56 }
0x20e0   :  { %v2544_v58 = vadd.f32 %v3223_v23, %v2543_v57 }
0x20e2   :  { %v2548_v61 = vsel %vm2547_vm6, %v3223_v23, %v2544_v58 }
0x20e3   :  { %v2553_v16 = vsel %vm2550_vm7, %v2552_v0, %v2548_v61 }
0x20e4   :  { %v2559_v2 = vmul.f32 %v2557_v27, %v2553_v16 }
0x2128   :  { %v2493_v51 = vpop.permute.xlu0 %2492 }
0x2129   :  { %v2495_v55 = vmul.f32 %v2493_v51, %v2484_v54 }
0x212b   :  { %2497 = vrot.lane.b32.xlu2 %v2495_v55, %s3510_s9 }
0x2138   :  { %v2562_v1 = vpop.permute.xlu1 %2561 }
0x2139   :  { %v2564_v17 = vmul.f32 %v2562_v1, %v2553_v16 }
0x213b   :  { %2566 = vrot.lane.b32.xlu0 %v2564_v17, %s3510_s9 }
0x2185   :  { %v2498_v32 = vpop.permute.xlu2 %2497 }
0x2186   :  { %v4345_v34 = vadd.f32 %v2498_v32, %v2490_v5 }
0x2188   :  { %3224 = vtanh.f32 %v4345_v34  ;;  %v2635_v0 = vrot.slane %v4345_v34, 6 }
0x218e   :  { %v3225_v33 = vpop.eup %3224 }
0x218f   :  { %2503 = vrot.lane.b32.xlu1 %v3225_v33, %s3509_s25 }
0x21ad   :  { %v2567_v35 = vpop.permute.xlu0 %2566 }
0x21ae   :  { %v4350_v62 = vadd.f32 %v2567_v35, %v2559_v2 }
0x21b0   :  { %3226 = vtanh.f32 %v4350_v62  ;;  %v2701_v5 = vrot.slane %v4350_v62, 2 }
0x21b6   :  { %v3227_v30 = vpop.eup %3226 }
0x21b7   :  { %2572 = vrot.lane.b32.xlu2 %v3227_v30, %s3509_s25 }
0x2201   :  { %v2504_v6 = vpop.permute.xlu1 %2503 }
0x2202   :  { %v2506_v38 = vmul.f32 %v2504_v6, %v2484_v54 }
0x2204   :  { %v2577_v39 = vrot.slane %v2506_v38, 4 }
0x2206   :  { %2586 = vrot.lane.b32.xlu0 %v2577_v39, %s3510_s9  ;;  %v4358_v42 = vmax.f32 %v2432_v29, %v2577_v39  ;;  %v4361_v37 = vadd.f32 %v2577_v39, %v4323_v3 }
0x2211   :  { %v2573_v18 = vpop.permute.xlu2 %2572 }
0x2212   :  { %v2575_v13 = vmul.f32 %v2573_v18, %v2553_v16 }
0x2214   :  { %v2581_v43 = vrot.slane %v2575_v13, 4  ;;  %v2654_v4 = vrot.slane %v2575_v13, 2 }
0x2216   :  { %v4364_v46 = vmax.f32 %v4330_v40, %v2581_v43  ;;  %v4367_v47 = vadd.f32 %v2581_v43, %v4333_v21  ;;  %2655 = vrot.lane.b32.xlu1 %v2654_v4, %s3510_s9 }
0x2278   :  { %v2587_v19 = vpop.permute.xlu0 %2586 }
0x2279   :  { %2957 = vmatmul.msk.f32.vlgmr.msrb.gmra.mxu2 %vm293_vm9, %v2587_v19 }
0x2288   :  { %v2656_v7 = vpop.permute.xlu1 %2655 }
0x2289   :  { %2959 = vmatmul.msk.f32.vlgmr.msrb.gmra.mxu3 %vm293_vm9, %v2656_v7  ;;  %v2767_v7 = vld [vmem:[%s4557_s15 + $0x70] sm:$0xff] }
0x22fc   :  { %v2607_v24 = vpop.f32.mrf.mxu2 }
0x22fd   :  { %v2611_v29 = vrot.slane %v2607_v24, 2  ;;  %v2807_v24 = vld [vmem:[%s4559_s17 + $0x68] sm:$0xff] }
0x22ff   :  { %v2613_v3 = vadd.f32 %v2611_v29, %v4117_v22  ;;  %v2765_v29 = vld [vmem:[%s4557_s15 + $0x60] sm:$0xff] }
0x2301   :  { %3228 = vtanh.f32 %v2613_v3  ;;  %v2958_v10 = vmul.f32 -1.442695, %v2613_v3  ;;  %v2806_v3 = vld [vmem:[%s4559_s17 + $0x60] sm:$0xff] }
0x2307   :  { %v3229_v9 = vpop.eup %3228 }
0x2308   :  { %2639 = vrot.lane.b32.xlu0 %v3229_v9, %s3509_s25  ;;  %v2764_v9 = vld [vmem:[%s4557_s15 + $0x58] sm:$0xff] }
0x230c   :  { %v2676_v40 = vpop.f32.mrf.mxu3 }
0x230d   :  { %v2679_v21 = vadd.f32 %v2676_v40, %v4115_v36  ;;  %v2805_v40 = vld [vmem:[%s4559_s17 + $0x58] sm:$0xff] }
0x230f   :  { %3230 = vtanh.f32 %v2679_v21  ;;  %v2960_v12 = vmul.f32 -1.442695, %v2679_v21  ;;  %v2763_v21 = vld [vmem:[%s4557_s15 + $0x50] sm:$0xff] }
0x2311   :  { %3232 = vpow2.f32 %v2960_v12  ;;  %v2762_v12 = vld [vmem:[%s4557_s15 + $0x48] sm:$0xff] }
0x2312   :  { %3234 = vpow2.f32 %v2958_v10  ;;  %v2761_v10 = vld [vmem:[%s4557_s15 + $0x40] sm:$0xff] }
0x2315   :  { %v3231_v8 = vpop.eup %3230 }
0x2316   :  { %2705 = vrot.lane.b32.xlu2 %v3231_v8, %s3509_s25  ;;  %v2804_v8 = vld [vmem:[%s4559_s17 + $0x50] sm:$0xff] }
0x2317   :  { %v3233_v63 = vpop.eup %3232 }
0x2318   :  { %v2683_v15 = vadd.f32 1.0, %v3233_v63  ;;  %v3235_v49 = vpop.eup %3234  ;;  %v2803_v63 = vld [vmem:[%s4559_s17 + $0x48] sm:$0xff] }
0x2319   :  { %v2617_v20 = vadd.f32 1.0, %v3235_v49  ;;  %v2760_v49 = vld [vmem:[%s4557_s15 + $0x38] sm:$0xff] }
0x231a   :  { %3236 = vrcp.f32 %v2683_v15  ;;  %v2695_v25 = vand.u32 2147483648, %v2683_v15  ;;  %vm2689_vm11 = vweird.f32 %v2683_v15  ;;  %v2693_v14 = vand.u32 2147483647, %v2683_v15 }
0x231b   :  { %3238 = vrcp.f32 %v2617_v20  ;;  %v2629_v55 = vand.u32 2147483648, %v2617_v20  ;;  %vm2623_vm14 = vweird.f32 %v2617_v20  ;;  %v2627_v56 = vand.u32 2147483647, %v2617_v20 }
0x231c   :  { %v2696_v45 = vor.u32 1.1754944e-38, %v2695_v25  ;;  %vm2694_vm13 = vcmp.eq.f32.partialorder %v2693_v14, 8.507059e+37  ;;  %v2797_v25 = vld [vmem:[%s4559_s17 + $0x18] sm:$0xff]  ;;  %v2755_v14 = vld [vmem:[%s4557_s15 + $0x10] sm:$0xff] }
0x231d   :  { %v2630_v58 = vor.u32 1.1754944e-38, %v2629_v55  ;;  %vm2628_vm0 = vcmp.eq.f32.partialorder %v2627_v56, 8.507059e+37  ;;  %v2849_v55 = vld [vmem:[%s4561_s19 + $0x60] sm:$0xff]  ;;  %v2848_v56 = vld [vmem:[%s4561_s19 + $0x58] sm:$0xff] }
0x2320   :  { %v3237_v22 = vpop.eup %3236 }
0x2321   :  { %v2685_v48 = vmul.f32 %v3237_v22, %v2683_v15  ;;  %v3239_v52 = vpop.eup %3238  ;;  %vm2690_vm8 = vweird.f32 %v3237_v22  ;;  %v2802_v15 = vld [vmem:[%s4559_s17 + $0x40] sm:$0xff] }
0x2322   :  { %v2619_v36 = vmul.f32 %v3239_v52, %v2617_v20  ;;  %vm2691_vm12 = vmor %vm2689_vm11, %vm2690_vm8  ;;  %vm2624_vm10 = vweird.f32 %v3239_v52  ;;  %v2759_v20 = vld [vmem:[%s4557_s15 + $0x30] sm:$0xff] }
0x2323   :  { %v2686_v50 = vsub.f32 1.0, %v2685_v48  ;;  %vm2625_vm15 = vmor %vm2623_vm14, %vm2624_vm10  ;;  %v2800_v48 = vld [vmem:[%s4559_s17 + $0x30] sm:$0xff] }
0x2324   :  { %v2620_v23 = vsub.f32 1.0, %v2619_v36  ;;  %v2798_v36 = vld [vmem:[%s4559_s17 + $0x20] sm:$0xff] }
0x2325   :  { %v2687_v53 = vmul.f32 %v3237_v22, %v2686_v50  ;;  %v2758_v50 = vld [vmem:[%s4557_s15 + $0x28] sm:$0xff] }
0x2326   :  { %v2621_v41 = vmul.f32 %v3239_v52, %v2620_v23  ;;  %v2796_v23 = vld [vmem:[%s4559_s17 + $0x10] sm:$0xff] }
0x2327   :  { %v2688_v31 = vadd.f32 %v3237_v22, %v2687_v53  ;;  %v2757_v53 = vld [vmem:[%s4557_s15 + $0x20] sm:$0xff] }
0x2328   :  { %v2622_v54 = vadd.f32 %v3239_v52, %v2621_v41  ;;  %v2753_v41 = vld [vmem:[%s4557_s15] sm:$0xff] }
0x2329   :  { %v2692_v44 = vsel %vm2691_vm12, %v3237_v22, %v2688_v31  ;;  %v2801_v22 = vld [vmem:[%s4559_s17 + $0x38] sm:$0xff] }
0x232a   :  { %v2697_v26 = vsel %vm2694_vm13, %v2696_v45, %v2692_v44  ;;  %v2626_v57 = vsel %vm2625_vm15, %v3239_v52, %v2622_v54  ;;  %v2799_v52 = vld [vmem:[%s4559_s17 + $0x28] sm:$0xff]  ;;  %v2756_v31 = vld [vmem:[%s4557_s15 + $0x18] sm:$0xff] }
0x232b   :  { %v2631_v60 = vsel %vm2628_vm0, %v2630_v58, %v2626_v57  ;;  %v2703_v32 = vmul.f32 %v2701_v5, %v2697_v26  ;;  %v2754_v44 = vld [vmem:[%s4557_s15 + $0x8] sm:$0xff]  ;;  %v2847_v57 = vld [vmem:[%s4561_s19 + $0x50] sm:$0xff] }
0x232c   :  { %v2637_v1 = vmul.f32 %v2635_v0, %v2631_v60  ;;  %v2795_v45 = vld [vmem:[%s4559_s17 + $0x8] sm:$0xff] }
0x232d   :  { %v2850_v54 = vld [vmem:[%s4561_s19 + $0x68] sm:$0xff] }
0x232e   :  { %v2846_v58 = vld [vmem:[%s4561_s19 + $0x48] sm:$0xff] }
0x232f   :  { %v2842_v0 = vld [vmem:[%s4561_s19 + $0x28] sm:$0xff] }
0x2370   :  { %v2706_v11 = vpop.permute.xlu2 %2705 }
0x2371   :  { %v2708_v51 = vmul.f32 %v2706_v11, %v2697_v26  ;;  %v2794_v11 = vld [vmem:[%s4559_s17] sm:$0xff] }
0x2373   :  { %2710 = vrot.lane.b32.xlu1 %v2708_v51, %s3510_s9  ;;  %v2851_v51 = vld [vmem:[%s4561_s19 + $0x70] sm:$0xff] }
0x237a   :  { %v2640_v59 = vpop.permute.xlu0 %2639 }
0x237b   :  { %v2642_v61 = vmul.f32 %v2640_v59, %v2631_v60  ;;  %v2845_v59 = vld [vmem:[%s4561_s19 + $0x40] sm:$0xff] }
0x237d   :  { %2644 = vrot.lane.b32.xlu2 %v2642_v61, %s3510_s9  ;;  %v2843_v61 = vld [vmem:[%s4561_s19 + $0x30] sm:$0xff] }
0x23d7   :  { %v2645_v16 = vpop.permute.xlu2 %2644 }
0x23d8   :  { %v2647_v17 = vadd.f32 %v2645_v16, %v2637_v1 }
0x23da   :  { %3240 = vtanh.f32 %v2647_v17 }
0x23e0   :  { %v3241_v28 = vpop.eup %3240 }
0x23e1   :  { %2650 = vrot.lane.b32.xlu1 %v3241_v28, %s3509_s25 }
0x23e5   :  { %v2711_v33 = vpop.permute.xlu1 %2710 }
0x23e6   :  { %v2713_v27 = vadd.f32 %v2711_v33, %v2703_v32 }
0x23e8   :  { %3242 = vtanh.f32 %v2713_v27 }
0x23ee   :  { %v3243_v2 = vpop.eup %3242 }
0x23ef   :  { %2716 = vrot.lane.b32.xlu0 %v3243_v2, %s3509_s25  ;;  %v2841_v2 = vld [vmem:[%s4561_s19 + $0x20] sm:$0xff] }
0x2453   :  { %v2651_v35 = vpop.permute.xlu1 %2650 }
0x2454   :  { %v2653_v30 = vmul.f32 %v2651_v35, %v2631_v60  ;;  %v2844_v60 = vld [vmem:[%s4561_s19 + $0x38] sm:$0xff] }
0x2455   :  { %v2840_v35 = vld [vmem:[%s4561_s19 + $0x18] sm:$0xff] }
0x2456   :  { %v2721_v6 = vrot.slane %v2653_v30, 6  ;;  %v2839_v30 = vld [vmem:[%s4561_s19 + $0x10] sm:$0xff] }
0x2458   :  { %v2723_v34 = vmax.f32 %v4358_v42, %v2721_v6  ;;  %v2728_v38 = vadd.f32 %v2721_v6, %v4361_v37  ;;  %v2768_v42 = vld [vmem:[%s4557_s15 + $0x78] sm:$0xff]  ;;  %v2838_v6 = vld [vmem:[%s4561_s19 + $0x8] sm:$0xff] }
0x2459   :  { %v2809_v37 = vld [vmem:[%s4559_s17 + $0x78] sm:$0xff]  ;;  %2773 = vmatpush.msrb.mxu0 %v2768_v42 }
0x245a   :  { %v2730_v39 = vmul.f32 0.125, %v2728_v38  ;;  %2733 = vrot.lane.b32.xlu2 %v2723_v34, %s3510_s9  ;;  %2814 = vmatpush.msrb.mxu1 %v2809_v37  ;;  %v2837_v34 = vld [vmem:[%s4561_s19] sm:$0xff]  ;;  %v2985_v38 = vld [vmem:[#allocation19] ss:$0 sm:$0xff] }
0x245b   :  { %2774 = vmatpush.msrb.mxu0 %v2767_v7  ;;  %v2987_v7 = vld [vmem:[#allocation4] ss:$0 sm:$0xff] }
0x245c   :  { %2742 = vrot.lane.b32.xlu1 %v2730_v39, %s3511_s7  ;;  %v2986_v39 = vld [vmem:[%s4560_s18] ss:$0 sm:$0xff] }
0x2461   :  { %v2717_v62 = vpop.permute.xlu0 %2716 }
0x2462   :  { %v2719_v18 = vmul.f32 %v2717_v62, %v2697_v26  ;;  %v2852_v26 = vld [vmem:[%s4561_s19 + $0x78] sm:$0xff] }
0x2463   :  { %2857 = vmatpush.msra.mxu2 %v2852_v26 }
0x2464   :  { %v2725_v13 = vrot.slane %v2719_v18, 2 }
0x2465   :  { %2858 = vmatpush.msra.mxu2 %v2851_v51 }
0x2466   :  { %v2727_v43 = vmax.f32 %v4364_v46, %v2725_v13  ;;  %v4387_v4 = vadd.f32 %v2725_v13, %v4367_v47  ;;  %v2808_v46 = vld [vmem:[%s4559_s17 + $0x70] sm:$0xff]  ;;  %v2766_v47 = vld [vmem:[%s4557_s15 + $0x68] sm:$0xff] }
0x2467   :  { %2815 = vmatpush.msrb.mxu1 %v2808_v46  ;;  %2775 = vmatpush.msrb.mxu0 %v2766_v47 }
0x2468   :  { %v2737_v19 = vrot.slane %v2727_v43, 6  ;;  %2859 = vmatpush.msra.mxu2 %v2850_v54  ;;  %v2731_v1 = vmul.f32 0.125, %v4387_v4 }
0x2469   :  { %2816 = vmatpush.msrb.mxu1 %v2807_v24  ;;  %2776 = vmatpush.msrb.mxu0 %v2765_v29 }
0x246a   :  { %2738 = vrot.lane.b32.xlu0 %v2737_v19, %s3509_s25  ;;  %2860 = vmatpush.msra.mxu2 %v2849_v55  ;;  %v2746_v28 = vrot.slane %v2731_v1, 6 }
0x246b   :  { %2817 = vmatpush.msrb.mxu1 %v2806_v3  ;;  %2777 = vmatpush.msrb.mxu0 %v2764_v9 }
0x246c   :  { %2861 = vmatpush.msra.mxu2 %v2848_v56 }
0x246d   :  { %2818 = vmatpush.msrb.mxu1 %v2805_v40  ;;  %2778 = vmatpush.msrb.mxu0 %v2763_v21 }
0x246e   :  { %2862 = vmatpush.msra.mxu2 %v2847_v57 }
0x246f   :  { %2819 = vmatpush.msrb.mxu1 %v2804_v8  ;;  %2779 = vmatpush.msrb.mxu0 %v2762_v12 }
0x2470   :  { %2863 = vmatpush.msra.mxu2 %v2846_v58 }
0x2471   :  { %2820 = vmatpush.msrb.mxu1 %v2803_v63  ;;  %2780 = vmatpush.msrb.mxu0 %v2761_v10 }
0x2472   :  { %2864 = vmatpush.msra.mxu2 %v2845_v59 }
0x2473   :  { %2821 = vmatpush.msrb.mxu1 %v2802_v15  ;;  %2781 = vmatpush.msrb.mxu0 %v2760_v49 }
0x2474   :  { %2865 = vmatpush.msra.mxu2 %v2844_v60 }
0x2475   :  { %2822 = vmatpush.msrb.mxu1 %v2801_v22  ;;  %2782 = vmatpush.msrb.mxu0 %v2759_v20 }
0x2476   :  { %2866 = vmatpush.msra.mxu2 %v2843_v61 }
0x2477   :  { %2823 = vmatpush.msrb.mxu1 %v2800_v48  ;;  %2783 = vmatpush.msrb.mxu0 %v2758_v50 }
0x2478   :  { %2867 = vmatpush.msra.mxu2 %v2842_v0 }
0x2479   :  { %2824 = vmatpush.msrb.mxu1 %v2799_v52  ;;  %2784 = vmatpush.msrb.mxu0 %v2757_v53 }
0x247a   :  { %2868 = vmatpush.msra.mxu2 %v2841_v2 }
0x247b   :  { %2825 = vmatpush.msrb.mxu1 %v2798_v36  ;;  %2785 = vmatpush.msrb.mxu0 %v2756_v31 }
0x247c   :  { %2869 = vmatpush.msra.mxu2 %v2840_v35 }
0x247d   :  { %2826 = vmatpush.msrb.mxu1 %v2797_v25  ;;  %2786 = vmatpush.msrb.mxu0 %v2755_v14 }
0x247e   :  { %2870 = vmatpush.msra.mxu2 %v2839_v30 }
0x247f   :  { %2827 = vmatpush.msrb.mxu1 %v2796_v23  ;;  %2787 = vmatpush.msrb.mxu0 %v2754_v44 }
0x2480   :  { %2871 = vmatpush.msra.mxu2 %v2838_v6 }
0x2481   :  { %2828 = vmatpush.msrb.mxu1 %v2795_v45  ;;  %2788 = vmatpush.msrb.mxu0 %v2753_v41 }
0x2482   :  { %2872 = vmatpush.msra.mxu2 %v2837_v34 }
0x2483   :  { %2829 = vmatpush.msrb.mxu1 %v2794_v11 }
0x24b4   :  { %v2734_v16 = vpop.permute.xlu2 %2733 }
0x24ce   :  { %v2743_v5 = vpop.permute.xlu1 %2742 }
0x24dc   :  { %v2739_v17 = vpop.permute.xlu0 %2738 }
0x24dd   :  { %v2748_v32 = vsel %vm293_vm9, %v2734_v16, %v2739_v17  ;;  %vm2877_vm9 = vcmask 1024  }
0x24de   :  { %v2750_v33 = vsel %vm2749_vm1, %v2748_v32, %v2743_v5 }
0x24df   :  { %v2752_v27 = vsel %vm2751_vm2, %v2750_v33, %v2746_v28 }
0x24e0   :  { %2789 = vmatmul.f32.vlgmr.msrb.gmra.mxu0 %v2752_v27  ;;  %2830 = vmatmul.f32.vlgmr.msrb.gmra.mxu1 %v2752_v27 }
0x255d   :  { %v2790_v62 = vpop.f32.mrf.mxu0  ;;  %v2831_v18 = vpop.f32.mrf.mxu1 }
0x255e   :  { %v2791_v13 = vadd.f32 %v2985_v38, %v2790_v62  ;;  %v2832_v43 = vadd.f32 %v2986_v39, %v2831_v18 }
0x2560   :  { %v2793_v4 = vmax.f32 %v2791_v13, 0.0  ;;  %v2834_v42 = vmax.f32 %v2832_v43, 0.0 }
0x2562   :  { %v2835_v19 = vadd.f32 %v2793_v4, %v2752_v27 }
0x2564   :  { %v2836_v37 = vadd.f32 %v2835_v19, %v2834_v42 }
0x2566   :  { %2873 = vmatmul.f32.vlgmr.msra.gmra.mxu2 %v2836_v37 }
0x25e9   :  { %v2874_v46 = vpop.f32.mrf.mxu2 }
0x25ea   :  { %v2875_v47 = vadd.f32 %v2987_v7, %v2874_v46 }
0x25ec   :  { %2878 = vst.msk [vmem:[%s4563_s21] sm:$0x3] %vm2877_vm9, %v2875_v47 }
0x25ed   :  { %2883 = vsyncpa [#allocation6], 1 }
0x25ee   :  { %2884 = vsyncpa [#allocation8], 1 }
0x25ef   :  { %2885 = vsyncpa [#allocation11], 1 }
0x25f0   :  { %2886 = vsyncpa [#allocation14], 1 }
0x25f1   :  { %2887 = vsyncpa [#allocation17], 1 }
0x25f2   :  { %2888 = vsyncpa [#allocation20], 1 }

</bundles_post_ra>
